<compile_context>
chip_gen: v7x
topology: tpu7x:2x2x1
jax: 0.10.0
libtpu: 0.0.40
codegen_flags: <defaults>
</compile_context>

<pallas_src>
import functools

import jax
import jax.numpy as jnp
from jax import lax
from jax.experimental import pallas as pl
from jax.experimental.pallas import tpu as pltpu

NC = 1          # input channels (grayscale)
LEAKY = 0.2     # LeakyReLU slope
BN_EPS = 1e-5   # nn.BatchNorm2d default eps


def _round_up(x, m):
    return (x + m - 1) // m * m


def _pick_tm(M):
    """Row-tile: multiple of 16 (bf16 sublane packing), <=512, and >=2 M-tiles
    whenever M allows it (v7x has 2 TensorCores that want parallel grid points)."""
    if M >= 1024:
        return 512
    return max(16, _round_up((M + 1) // 2, 16))


# --------------------------------------------------------------------------
# Pallas kernels
# --------------------------------------------------------------------------
def _matmul_bn_kernel(a_ref, b_ref, o_ref, s_ref, q_ref):
    """Single-K-step matmul (bf16 x bf16 -> f32) with fused per-tile BN stats.

    s_ref/q_ref blocks are (1, 8, tn); only sublane-row 0 carries the column
    sum / sum-of-squares of this output tile, the rest is zero (layout-friendly
    8-row block)."""
    y = jnp.dot(a_ref[...], b_ref[...], preferred_element_type=jnp.float32)
    o_ref[...] = y

    cs = jnp.sum(y, axis=0, keepdims=True)          # (1, tn)
    cq = jnp.sum(y * y, axis=0, keepdims=True)      # (1, tn)
    row = lax.broadcasted_iota(jnp.int32, (8, y.shape[1]), 0)
    s_ref[...] = jnp.where(row == 0, cs, 0.0)[None]
    q_ref[...] = jnp.where(row == 0, cq, 0.0)[None]


def matmul_bn(a, b, cout):
    """a: (M, K) activations/patches, b: (K, cout) weights.

    Returns (y_padded (Mp, Np) f32, sums (Gm, 8, Np), sqsums (Gm, 8, Np), tm).
    Only M (at most one tile) and the channel axis (to 128) are zero-padded;
    K is never padded (single reduction step)."""
    M, K = a.shape
    tm = _pick_tm(M)
    Mp = _round_up(M, tm)
    Np = _round_up(cout, 128)
    tn = 256 if Np % 256 == 0 else 128
    Gm, Gn = Mp // tm, Np // tn

    a_bf = a.astype(jnp.bfloat16)
    if Mp != M:
        a_bf = jnp.pad(a_bf, ((0, Mp - M), (0, 0)))
    b_bf = b.astype(jnp.bfloat16)
    if Np != cout:
        b_bf = jnp.pad(b_bf, ((0, 0), (0, Np - cout)))

    out, ssum, ssq = pl.pallas_call(
        _matmul_bn_kernel,
        out_shape=(jax.ShapeDtypeStruct((Mp, Np), jnp.float32),
                   jax.ShapeDtypeStruct((Gm, 8, Np), jnp.float32),
                   jax.ShapeDtypeStruct((Gm, 8, Np), jnp.float32)),
        grid_spec=pltpu.PrefetchScalarGridSpec(
            num_scalar_prefetch=0,
            grid=(Gm, Gn),
            in_specs=[pl.BlockSpec((tm, K), lambda i, j: (i, 0)),
                      pl.BlockSpec((K, tn), lambda i, j: (0, j))],
            out_specs=(pl.BlockSpec((tm, tn), lambda i, j: (i, j)),
                       pl.BlockSpec((1, 8, tn), lambda i, j: (i, 0, j)),
                       pl.BlockSpec((1, 8, tn), lambda i, j: (i, 0, j)))),
        compiler_params=pltpu.CompilerParams(
            dimension_semantics=("parallel", "parallel")),
    )(a_bf, b_bf)
    return out, ssum, ssq, tm


def _affine_lrelu_kernel(y_ref, scale_ref, shift_ref, o_ref):
    z = y_ref[...] * scale_ref[...] + shift_ref[...]
    o_ref[...] = jnp.where(z >= 0, z, LEAKY * z).astype(o_ref.dtype)


def affine_leaky_relu(y, scale, shift, tm, out_dtype):
    """Fused (folded) BatchNorm affine + LeakyReLU(0.2) over padded (Mp, Np)."""
    Mp, Np = y.shape
    return pl.pallas_call(
        _affine_lrelu_kernel,
        out_shape=jax.ShapeDtypeStruct((Mp, Np), out_dtype),
        grid_spec=pltpu.PrefetchScalarGridSpec(
            num_scalar_prefetch=0,
            grid=(Mp // tm,),
            in_specs=[pl.BlockSpec((tm, Np), lambda i: (i, 0)),
                      pl.BlockSpec((1, Np), lambda i: (0, 0)),
                      pl.BlockSpec((1, Np), lambda i: (0, 0))],
            out_specs=pl.BlockSpec((tm, Np), lambda i: (i, 0))),
        compiler_params=pltpu.CompilerParams(
            dimension_semantics=("parallel",)),
    )(y, scale.reshape(1, Np), shift.reshape(1, Np))


def _head_kernel(flat_ref, lab_ref, wf_ref, wl_ref, b_ref, o_ref):
    # Linear over [features ; label] as a VPU row reduction, then sigmoid.
    z = jnp.sum(flat_ref[...] * wf_ref[...], axis=-1, keepdims=True)   # (N, 1)
    z = z + lab_ref[...] * wl_ref[0, 0] + b_ref[0, 0]
    o_ref[...] = 1.0 / (1.0 + jnp.exp(-z))


def linear_sigmoid_head(flat, labels, w, b):
    """flat: (N, F), labels: (N,), w: (1, F+1), b: (1,) -> (N, 1) sigmoid."""
    N, F = flat.shape
    wf = w[:, :F].astype(jnp.float32)                 # (1, F)
    wl = w[:, F:].reshape(1, 1).astype(jnp.float32)   # label weight (scalar)
    bb = b.reshape(1, 1).astype(jnp.float32)
    lab = labels.reshape(N, 1).astype(jnp.float32)
    return pl.pallas_call(
        _head_kernel,
        out_shape=jax.ShapeDtypeStruct((N, 1), jnp.float32),
        in_specs=[pl.BlockSpec(memory_space=pltpu.MemorySpace.VMEM),
                  pl.BlockSpec(memory_space=pltpu.MemorySpace.VMEM),
                  pl.BlockSpec(memory_space=pltpu.MemorySpace.VMEM),
                  pl.BlockSpec(memory_space=pltpu.MemorySpace.SMEM),
                  pl.BlockSpec(memory_space=pltpu.MemorySpace.SMEM)],
        out_specs=pl.BlockSpec(memory_space=pltpu.MemorySpace.VMEM),
    )(flat.astype(jnp.float32), lab, wf, wl, bb)


# --------------------------------------------------------------------------
# Plain-JAX glue: channel-last im2col + conv block
# --------------------------------------------------------------------------
def im2col_nhwc(x, k=4, s=2, p=1):
    """NHWC -> (N*OH*OW, k*k*C) patches, feature order (kh, kw, cin)."""
    N, H, W, C = x.shape
    xp = jnp.pad(x, ((0, 0), (p, p), (p, p), (0, 0)))
    OH = (H + 2 * p - k) // s + 1
    OW = (W + 2 * p - k) // s + 1
    cols = []
    for i in range(k):
        for j in range(k):
            cols.append(xp[:, i:i + s * OH:s, j:j + s * OW:s, :])  # (N,OH,OW,C)
    pt = jnp.stack(cols, axis=3)                       # (N, OH, OW, k*k, C)
    pt = pt.reshape(N * OH * OW, k * k * C)
    return pt, OH, OW


def conv_block(x_nhwc, w, gamma=None, beta=None, apply_bn=True,
               out_dtype=jnp.bfloat16):
    """Conv2d(k=4,s=2,p=1,bias=False) [+ BatchNorm2d] + LeakyReLU(0.2); NHWC in/out."""
    Cout, Cin, KH, KW = w.shape
    N = x_nhwc.shape[0]
    patches, OH, OW = im2col_nhwc(x_nhwc)
    M = patches.shape[0]
    # (kh, kw, cin) -> cout, matching the patch feature order above.
    wm = w.transpose(2, 3, 1, 0).reshape(KH * KW * Cin, Cout)

    y, ssum, ssq, tm = matmul_bn(patches, wm, Cout)    # y: (Mp, Np) f32
    Np = y.shape[1]

    if apply_bn:
        total = jnp.sum(ssum, axis=(0, 1))[:Cout]
        totsq = jnp.sum(ssq, axis=(0, 1))[:Cout]
        mean = total / M
        # Biased variance (BN training forward). Clamped >=0 to guard the
        # E[x^2]-E[x]^2 cancellation in f32.
        var = jnp.maximum(totsq / M - mean * mean, 0.0)
        invstd = lax.rsqrt(var + BN_EPS)
        scale = gamma * invstd
        shift = beta - mean * scale
    else:
        scale = jnp.ones((Cout,), jnp.float32)
        shift = jnp.zeros((Cout,), jnp.float32)

    # Pad the per-channel affine to Np (identity on padded channels: they are 0).
    scale_p = jnp.ones((Np,), jnp.float32).at[:Cout].set(scale)
    shift_p = jnp.zeros((Np,), jnp.float32).at[:Cout].set(shift)

    z = affine_leaky_relu(y, scale_p, shift_p, tm, out_dtype)   # (Mp, Np)
    return z[:M, :Cout].reshape(N, OH, OW, Cout)                # stay NHWC


# --------------------------------------------------------------------------
# Parameters + forward
# --------------------------------------------------------------------------
def init_params(key, nc=NC, ndf=32, dim_c=1):
    ks = jax.random.split(key, 11)

    def conv_w(k, cout, cin):
        return 0.02 * jax.random.normal(k, (cout, cin, 4, 4), jnp.float32)

    return {
        "w1": conv_w(ks[0], ndf, nc),
        "g1": 1.0 + 0.1 * jax.random.normal(ks[1], (ndf,), jnp.float32),
        "b1": 0.1 * jax.random.normal(ks[2], (ndf,), jnp.float32),
        "w2": conv_w(ks[3], ndf * 2, ndf),
        "g2": 1.0 + 0.1 * jax.random.normal(ks[4], (ndf * 2,), jnp.float32),
        "b2": 0.1 * jax.random.normal(ks[5], (ndf * 2,), jnp.float32),
        "w3": conv_w(ks[6], ndf * 4, ndf * 2),
        "g3": 1.0 + 0.1 * jax.random.normal(ks[7], (ndf * 4,), jnp.float32),
        "b3": 0.1 * jax.random.normal(ks[8], (ndf * 4,), jnp.float32),
        "w4": conv_w(ks[9], ndf * 8, ndf * 4),
        "lw": 0.01 * jax.random.normal(ks[10], (1, ndf * 8 * 4 * 4 + dim_c),
                                       jnp.float32),
        "lb": jnp.zeros((1,), jnp.float32),
    }


def cond_cnn_discriminator_forward(params, x, labels, ndf=32):
    # One tiny NCHW->NHWC transpose of the input; activations stay NHWC after.
    h = x.transpose(0, 2, 3, 1)
    h = conv_block(h, params["w1"], params["g1"], params["b1"], apply_bn=True)
    h = conv_block(h, params["w2"], params["g2"], params["b2"], apply_bn=True)
    h = conv_block(h, params["w3"], params["g3"], params["b3"], apply_bn=True)
    h = conv_block(h, params["w4"], apply_bn=False, out_dtype=jnp.float32)
    N = x.shape[0]
    # PyTorch flattens NCHW: transpose the tiny (N,4,4,8*ndf) map back first.
    flat = h.transpose(0, 3, 1, 2).reshape(N, ndf * 8 * 4 * 4)
    out = linear_sigmoid_head(flat, labels, params["lw"], params["lb"])
    return out                                   # (N, 1)


if __name__ == "__main__":
    key = jax.random.PRNGKey(0)
    kp, kx, kl = jax.random.split(key, 3)

    # 64x64 input is required by the ndf*8*4*4 flatten (64->32->16->8->4);
    # ndf shrunk 128 -> 32 for a small, fast test config.
    NDF = 32
    N = 2
    params = init_params(kp, nc=NC, ndf=NDF, dim_c=1)
    x = jax.random.normal(kx, (N, NC, 64, 64), jnp.float32)
    labels = jax.random.uniform(kl, (N,), jnp.float32)

    fwd = jax.jit(functools.partial(cond_cnn_discriminator_forward, ndf=NDF))
    out = jax.block_until_ready(fwd(params, x, labels))

    assert out.shape == (N, 1)
    assert bool(jnp.all(jnp.isfinite(out)))
    assert bool(jnp.all((out >= 0.0) & (out <= 1.0)))   # sigmoid output range
    print("KERNEL_OK")
</pallas_src>

<mosaic_0001>
module attributes {stable_mosaic.version = 11 : i64} {
  func.func @_affine_lrelu_kernel(%arg0: i32, %arg1: memref<512x128xf32, #tpu.memory_space<vmem>>, %arg2: memref<1x128xf32, #tpu.memory_space<vmem>>, %arg3: memref<1x128xf32, #tpu.memory_space<vmem>>, %arg4: memref<512x128xbf16, #tpu.memory_space<vmem>>) attributes {dimension_semantics = [#tpu.dimension_semantics<parallel>], iteration_bounds = array<i64: 4>, scalar_prefetch = 0 : i64, scratch_operands = 0 : i64, tpu.core_type = #tpu.core_type<tc>, window_params = [{transform_indices = @transform_0, window_bounds = array<i64: 512, 128>}, {pipeline_mode = #tpu.pipeline_mode<synchronous>, transform_indices = @transform_1, window_bounds = array<i64: 1, 128>}, {pipeline_mode = #tpu.pipeline_mode<synchronous>, transform_indices = @transform_2, window_bounds = array<i64: 1, 128>}, {transform_indices = @transform_3, window_bounds = array<i64: 512, 128>}]} {
    %c0 = arith.constant 0 : index
    %c0_0 = arith.constant 0 : index
    %0 = vector.load %arg1[%c0, %c0_0] : memref<512x128xf32, #tpu.memory_space<vmem>>, vector<512x128xf32>
    %c0_1 = arith.constant 0 : index
    %c0_2 = arith.constant 0 : index
    %1 = vector.load %arg2[%c0_1, %c0_2] : memref<1x128xf32, #tpu.memory_space<vmem>>, vector<1x128xf32>
    %2 = vector.broadcast %1 : vector<1x128xf32> to vector<512x128xf32>
    %3 = arith.mulf %0, %2 : vector<512x128xf32>
    %c0_3 = arith.constant 0 : index
    %c0_4 = arith.constant 0 : index
    %4 = vector.load %arg3[%c0_3, %c0_4] : memref<1x128xf32, #tpu.memory_space<vmem>>, vector<1x128xf32>
    %5 = vector.broadcast %4 : vector<1x128xf32> to vector<512x128xf32>
    %6 = arith.addf %3, %5 : vector<512x128xf32>
    %cst = arith.constant 0.000000e+00 : f32
    %7 = vector.broadcast %cst : f32 to vector<512x128xf32>
    %8 = arith.cmpf oge, %6, %7 : vector<512x128xf32>
    %cst_5 = arith.constant 2.000000e-01 : f32
    %9 = vector.broadcast %cst_5 : f32 to vector<512x128xf32>
    %10 = arith.mulf %9, %6 : vector<512x128xf32>
    %11 = arith.select %8, %6, %10 : vector<512x128xi1>, vector<512x128xf32>
    %12 = arith.truncf %11 : vector<512x128xf32> to vector<512x128xbf16>
    %c0_6 = arith.constant 0 : index
    %c0_7 = arith.constant 0 : index
    %13 = vector.load %arg4[%c0_6, %c0_7] : memref<512x128xbf16, #tpu.memory_space<vmem>>, vector<512x128xbf16>
    tpu.vector_store %arg4[%c0_6, %c0_7], %12 {strides = array<i32>} : memref<512x128xbf16, #tpu.memory_space<vmem>>, vector<512x128xbf16>,
    return
  }
  func.func @transform_0(%arg0: i32) -> (i32, i32) {
    %c0_i32 = arith.constant 0 : i32
    %c0_i32_0 = arith.constant 0 : i32
    return %arg0, %c0_i32 : i32, i32
  }
  func.func @transform_1(%arg0: i32) -> (i32, i32) {
    %c0_i32 = arith.constant 0 : i32
    %c0_i32_0 = arith.constant 0 : i32
    %c0_i32_1 = arith.constant 0 : i32
    return %c0_i32, %c0_i32_0 : i32, i32
  }
  func.func @transform_2(%arg0: i32) -> (i32, i32) {
    %c0_i32 = arith.constant 0 : i32
    %c0_i32_0 = arith.constant 0 : i32
    %c0_i32_1 = arith.constant 0 : i32
    return %c0_i32, %c0_i32_0 : i32, i32
  }
  func.func @transform_3(%arg0: i32) -> (i32, i32) {
    %c0_i32 = arith.constant 0 : i32
    %c0_i32_0 = arith.constant 0 : i32
    return %arg0, %c0_i32 : i32, i32
  }
}

module attributes {stable_mosaic.version = 11 : i64} {
  func.func @_matmul_bn_kernel(%arg0: i32, %arg1: i32, %arg2: memref<512x16xbf16, #tpu.memory_space<vmem>>, %arg3: memref<16x128xbf16, #tpu.memory_space<vmem>>, %arg4: memref<512x128xf32, #tpu.memory_space<vmem>>, %arg5: memref<1x8x128xf32, #tpu.memory_space<vmem>>, %arg6: memref<1x8x128xf32, #tpu.memory_space<vmem>>) attributes {dimension_semantics = [#tpu.dimension_semantics<parallel>, #tpu.dimension_semantics<parallel>], iteration_bounds = array<i64: 4, 1>, scalar_prefetch = 0 : i64, scratch_operands = 0 : i64, tpu.core_type = #tpu.core_type<tc>, window_params = [{transform_indices = @transform_0, window_bounds = array<i64: 512, 16>}, {transform_indices = @transform_1, window_bounds = array<i64: 16, 128>}, {transform_indices = @transform_2, window_bounds = array<i64: 512, 128>}, {transform_indices = @transform_3, window_bounds = array<i64: 1, 8, 128>}, {transform_indices = @transform_4, window_bounds = array<i64: 1, 8, 128>}]} {
    %c0 = arith.constant 0 : index
    %c0_0 = arith.constant 0 : index
    %0 = vector.load %arg2[%c0, %c0_0] : memref<512x16xbf16, #tpu.memory_space<vmem>>, vector<512x16xbf16>
    %c0_1 = arith.constant 0 : index
    %c0_2 = arith.constant 0 : index
    %1 = vector.load %arg3[%c0_1, %c0_2] : memref<16x128xbf16, #tpu.memory_space<vmem>>, vector<16x128xbf16>
    %cst = arith.constant dense<0.000000e+00> : vector<512x128xf32>
    %2 = tpu.matmul %0, %1, %cst {dimension_numbers = #tpu.dot_dimension_numbers<[1], [0], [0], [1], [0, 0, 1, 1], [], []>} : vector<512x16xbf16>, vector<16x128xbf16>, vector<512x128xf32> -> vector<512x128xf32>
    %c0_3 = arith.constant 0 : index
    %c0_4 = arith.constant 0 : index
    %3 = vector.load %arg4[%c0_3, %c0_4] : memref<512x128xf32, #tpu.memory_space<vmem>>, vector<512x128xf32>
    tpu.vector_store %arg4[%c0_3, %c0_4], %2 {strides = array<i32>} : memref<512x128xf32, #tpu.memory_space<vmem>>, vector<512x128xf32>,
    %cst_5 = arith.constant dense<0.000000e+00> : vector<128xf32>
    %4 = vector.multi_reduction <add>, %2, %cst_5 [0] : vector<512x128xf32> to vector<128xf32>
    %5 = vector.shape_cast %4 : vector<128xf32> to vector<1x128xf32>
    %6 = arith.mulf %2, %2 : vector<512x128xf32>
    %cst_6 = arith.constant dense<0.000000e+00> : vector<128xf32>
    %7 = vector.multi_reduction <add>, %6, %cst_6 [0] : vector<512x128xf32> to vector<128xf32>
    %8 = vector.shape_cast %7 : vector<128xf32> to vector<1x128xf32>
    %9 = tpu.iota {dimensions = array<i32: 0>} : vector<8x128xi32>
    %c0_i32 = arith.constant 0 : i32
    %10 = vector.broadcast %c0_i32 : i32 to vector<8x128xi32>
    %11 = arith.cmpi eq, %9, %10 : vector<8x128xi32>
    %cst_7 = arith.constant 0.000000e+00 : f32
    %12 = vector.shape_cast %5 : vector<1x128xf32> to vector<1x128xf32>
    %13 = vector.broadcast %12 : vector<1x128xf32> to vector<8x128xf32>
    %14 = vector.broadcast %cst_7 : f32 to vector<8x128xf32>
    %15 = arith.select %11, %13, %14 : vector<8x128xi1>, vector<8x128xf32>
    %16 = vector.shape_cast %15 : vector<8x128xf32> to vector<1x8x128xf32>
    %c0_8 = arith.constant 0 : index
    %c0_9 = arith.constant 0 : index
    %c0_10 = arith.constant 0 : index
    %17 = vector.load %arg5[%c0_8, %c0_9, %c0_10] : memref<1x8x128xf32, #tpu.memory_space<vmem>>, vector<1x8x128xf32>
    tpu.vector_store %arg5[%c0_8, %c0_9, %c0_10], %16 {strides = array<i32>} : memref<1x8x128xf32, #tpu.memory_space<vmem>>, vector<1x8x128xf32>,
    %c0_i32_11 = arith.constant 0 : i32
    %18 = vector.broadcast %c0_i32_11 : i32 to vector<8x128xi32>
    %19 = arith.cmpi eq, %9, %18 : vector<8x128xi32>
    %cst_12 = arith.constant 0.000000e+00 : f32
    %20 = vector.shape_cast %8 : vector<1x128xf32> to vector<1x128xf32>
    %21 = vector.broadcast %20 : vector<1x128xf32> to vector<8x128xf32>
    %22 = vector.broadcast %cst_12 : f32 to vector<8x128xf32>
    %23 = arith.select %19, %21, %22 : vector<8x128xi1>, vector<8x128xf32>
    %24 = vector.shape_cast %23 : vector<8x128xf32> to vector<1x8x128xf32>
    %c0_13 = arith.constant 0 : index
    %c0_14 = arith.constant 0 : index
    %c0_15 = arith.constant 0 : index
    %25 = vector.load %arg6[%c0_13, %c0_14, %c0_15] : memref<1x8x128xf32, #tpu.memory_space<vmem>>, vector<1x8x128xf32>
    tpu.vector_store %arg6[%c0_13, %c0_14, %c0_15], %24 {strides = array<i32>} : memref<1x8x128xf32, #tpu.memory_space<vmem>>, vector<1x8x128xf32>,
    return
  }
  func.func @transform_0(%arg0: i32, %arg1: i32) -> (i32, i32) {
    %c0_i32 = arith.constant 0 : i32
    %c0_i32_0 = arith.constant 0 : i32
    return %arg0, %c0_i32 : i32, i32
  }
  func.func @transform_1(%arg0: i32, %arg1: i32) -> (i32, i32) {
    %c0_i32 = arith.constant 0 : i32
    %c0_i32_0 = arith.constant 0 : i32
    return %c0_i32, %arg1 : i32, i32
  }
  func.func @transform_2(%arg0: i32, %arg1: i32) -> (i32, i32) {
    %c0_i32 = arith.constant 0 : i32
    return %arg0, %arg1 : i32, i32
  }
  func.func @transform_3(%arg0: i32, %arg1: i32) -> (i32, i32, i32) {
    %c0_i32 = arith.constant 0 : i32
    %c0_i32_0 = arith.constant 0 : i32
    return %arg0, %c0_i32, %arg1 : i32, i32, i32
  }
  func.func @transform_4(%arg0: i32, %arg1: i32) -> (i32, i32, i32) {
    %c0_i32 = arith.constant 0 : i32
    %c0_i32_0 = arith.constant 0 : i32
    return %arg0, %c0_i32, %arg1 : i32, i32, i32
  }
}

module attributes {stable_mosaic.version = 11 : i64} {
  func.func @_matmul_bn_kernel(%arg0: i32, %arg1: i32, %arg2: memref<256x512xbf16, #tpu.memory_space<vmem>>, %arg3: memref<512x128xbf16, #tpu.memory_space<vmem>>, %arg4: memref<256x128xf32, #tpu.memory_space<vmem>>, %arg5: memref<1x8x128xf32, #tpu.memory_space<vmem>>, %arg6: memref<1x8x128xf32, #tpu.memory_space<vmem>>) attributes {dimension_semantics = [#tpu.dimension_semantics<parallel>, #tpu.dimension_semantics<parallel>], iteration_bounds = array<i64: 2, 1>, scalar_prefetch = 0 : i64, scratch_operands = 0 : i64, tpu.core_type = #tpu.core_type<tc>, window_params = [{transform_indices = @transform_0, window_bounds = array<i64: 256, 512>}, {transform_indices = @transform_1, window_bounds = array<i64: 512, 128>}, {transform_indices = @transform_2, window_bounds = array<i64: 256, 128>}, {transform_indices = @transform_3, window_bounds = array<i64: 1, 8, 128>}, {transform_indices = @transform_4, window_bounds = array<i64: 1, 8, 128>}]} {
    %c0 = arith.constant 0 : index
    %c0_0 = arith.constant 0 : index
    %0 = vector.load %arg2[%c0, %c0_0] : memref<256x512xbf16, #tpu.memory_space<vmem>>, vector<256x512xbf16>
    %c0_1 = arith.constant 0 : index
    %c0_2 = arith.constant 0 : index
    %1 = vector.load %arg3[%c0_1, %c0_2] : memref<512x128xbf16, #tpu.memory_space<vmem>>, vector<512x128xbf16>
    %cst = arith.constant dense<0.000000e+00> : vector<256x128xf32>
    %2 = tpu.matmul %0, %1, %cst {dimension_numbers = #tpu.dot_dimension_numbers<[1], [0], [0], [1], [0, 0, 1, 1], [], []>} : vector<256x512xbf16>, vector<512x128xbf16>, vector<256x128xf32> -> vector<256x128xf32>
    %c0_3 = arith.constant 0 : index
    %c0_4 = arith.constant 0 : index
    %3 = vector.load %arg4[%c0_3, %c0_4] : memref<256x128xf32, #tpu.memory_space<vmem>>, vector<256x128xf32>
    tpu.vector_store %arg4[%c0_3, %c0_4], %2 {strides = array<i32>} : memref<256x128xf32, #tpu.memory_space<vmem>>, vector<256x128xf32>,
    %cst_5 = arith.constant dense<0.000000e+00> : vector<128xf32>
    %4 = vector.multi_reduction <add>, %2, %cst_5 [0] : vector<256x128xf32> to vector<128xf32>
    %5 = vector.shape_cast %4 : vector<128xf32> to vector<1x128xf32>
    %6 = arith.mulf %2, %2 : vector<256x128xf32>
    %cst_6 = arith.constant dense<0.000000e+00> : vector<128xf32>
    %7 = vector.multi_reduction <add>, %6, %cst_6 [0] : vector<256x128xf32> to vector<128xf32>
    %8 = vector.shape_cast %7 : vector<128xf32> to vector<1x128xf32>
    %9 = tpu.iota {dimensions = array<i32: 0>} : vector<8x128xi32>
    %c0_i32 = arith.constant 0 : i32
    %10 = vector.broadcast %c0_i32 : i32 to vector<8x128xi32>
    %11 = arith.cmpi eq, %9, %10 : vector<8x128xi32>
    %cst_7 = arith.constant 0.000000e+00 : f32
    %12 = vector.shape_cast %5 : vector<1x128xf32> to vector<1x128xf32>
    %13 = vector.broadcast %12 : vector<1x128xf32> to vector<8x128xf32>
    %14 = vector.broadcast %cst_7 : f32 to vector<8x128xf32>
    %15 = arith.select %11, %13, %14 : vector<8x128xi1>, vector<8x128xf32>
    %16 = vector.shape_cast %15 : vector<8x128xf32> to vector<1x8x128xf32>
    %c0_8 = arith.constant 0 : index
    %c0_9 = arith.constant 0 : index
    %c0_10 = arith.constant 0 : index
    %17 = vector.load %arg5[%c0_8, %c0_9, %c0_10] : memref<1x8x128xf32, #tpu.memory_space<vmem>>, vector<1x8x128xf32>
    tpu.vector_store %arg5[%c0_8, %c0_9, %c0_10], %16 {strides = array<i32>} : memref<1x8x128xf32, #tpu.memory_space<vmem>>, vector<1x8x128xf32>,
    %c0_i32_11 = arith.constant 0 : i32
    %18 = vector.broadcast %c0_i32_11 : i32 to vector<8x128xi32>
    %19 = arith.cmpi eq, %9, %18 : vector<8x128xi32>
    %cst_12 = arith.constant 0.000000e+00 : f32
    %20 = vector.shape_cast %8 : vector<1x128xf32> to vector<1x128xf32>
    %21 = vector.broadcast %20 : vector<1x128xf32> to vector<8x128xf32>
    %22 = vector.broadcast %cst_12 : f32 to vector<8x128xf32>
    %23 = arith.select %19, %21, %22 : vector<8x128xi1>, vector<8x128xf32>
    %24 = vector.shape_cast %23 : vector<8x128xf32> to vector<1x8x128xf32>
    %c0_13 = arith.constant 0 : index
    %c0_14 = arith.constant 0 : index
    %c0_15 = arith.constant 0 : index
    %25 = vector.load %arg6[%c0_13, %c0_14, %c0_15] : memref<1x8x128xf32, #tpu.memory_space<vmem>>, vector<1x8x128xf32>
    tpu.vector_store %arg6[%c0_13, %c0_14, %c0_15], %24 {strides = array<i32>} : memref<1x8x128xf32, #tpu.memory_space<vmem>>, vector<1x8x128xf32>,
    return
  }
  func.func @transform_0(%arg0: i32, %arg1: i32) -> (i32, i32) {
    %c0_i32 = arith.constant 0 : i32
    %c0_i32_0 = arith.constant 0 : i32
    return %arg0, %c0_i32 : i32, i32
  }
  func.func @transform_1(%arg0: i32, %arg1: i32) -> (i32, i32) {
    %c0_i32 = arith.constant 0 : i32
    %c0_i32_0 = arith.constant 0 : i32
    return %c0_i32, %arg1 : i32, i32
  }
  func.func @transform_2(%arg0: i32, %arg1: i32) -> (i32, i32) {
    %c0_i32 = arith.constant 0 : i32
    return %arg0, %arg1 : i32, i32
  }
  func.func @transform_3(%arg0: i32, %arg1: i32) -> (i32, i32, i32) {
    %c0_i32 = arith.constant 0 : i32
    %c0_i32_0 = arith.constant 0 : i32
    return %arg0, %c0_i32, %arg1 : i32, i32, i32
  }
  func.func @transform_4(%arg0: i32, %arg1: i32) -> (i32, i32, i32) {
    %c0_i32 = arith.constant 0 : i32
    %c0_i32_0 = arith.constant 0 : i32
    return %arg0, %c0_i32, %arg1 : i32, i32, i32
  }
}

module attributes {stable_mosaic.version = 11 : i64} {
  func.func @_affine_lrelu_kernel(%arg0: i32, %arg1: memref<256x128xf32, #tpu.memory_space<vmem>>, %arg2: memref<1x128xf32, #tpu.memory_space<vmem>>, %arg3: memref<1x128xf32, #tpu.memory_space<vmem>>, %arg4: memref<256x128xbf16, #tpu.memory_space<vmem>>) attributes {dimension_semantics = [#tpu.dimension_semantics<parallel>], iteration_bounds = array<i64: 2>, scalar_prefetch = 0 : i64, scratch_operands = 0 : i64, tpu.core_type = #tpu.core_type<tc>, window_params = [{transform_indices = @transform_0, window_bounds = array<i64: 256, 128>}, {pipeline_mode = #tpu.pipeline_mode<synchronous>, transform_indices = @transform_1, window_bounds = array<i64: 1, 128>}, {pipeline_mode = #tpu.pipeline_mode<synchronous>, transform_indices = @transform_2, window_bounds = array<i64: 1, 128>}, {transform_indices = @transform_3, window_bounds = array<i64: 256, 128>}]} {
    %c0 = arith.constant 0 : index
    %c0_0 = arith.constant 0 : index
    %0 = vector.load %arg1[%c0, %c0_0] : memref<256x128xf32, #tpu.memory_space<vmem>>, vector<256x128xf32>
    %c0_1 = arith.constant 0 : index
    %c0_2 = arith.constant 0 : index
    %1 = vector.load %arg2[%c0_1, %c0_2] : memref<1x128xf32, #tpu.memory_space<vmem>>, vector<1x128xf32>
    %2 = vector.broadcast %1 : vector<1x128xf32> to vector<256x128xf32>
    %3 = arith.mulf %0, %2 : vector<256x128xf32>
    %c0_3 = arith.constant 0 : index
    %c0_4 = arith.constant 0 : index
    %4 = vector.load %arg3[%c0_3, %c0_4] : memref<1x128xf32, #tpu.memory_space<vmem>>, vector<1x128xf32>
    %5 = vector.broadcast %4 : vector<1x128xf32> to vector<256x128xf32>
    %6 = arith.addf %3, %5 : vector<256x128xf32>
    %cst = arith.constant 0.000000e+00 : f32
    %7 = vector.broadcast %cst : f32 to vector<256x128xf32>
    %8 = arith.cmpf oge, %6, %7 : vector<256x128xf32>
    %cst_5 = arith.constant 2.000000e-01 : f32
    %9 = vector.broadcast %cst_5 : f32 to vector<256x128xf32>
    %10 = arith.mulf %9, %6 : vector<256x128xf32>
    %11 = arith.select %8, %6, %10 : vector<256x128xi1>, vector<256x128xf32>
    %12 = arith.truncf %11 : vector<256x128xf32> to vector<256x128xbf16>
    %c0_6 = arith.constant 0 : index
    %c0_7 = arith.constant 0 : index
    %13 = vector.load %arg4[%c0_6, %c0_7] : memref<256x128xbf16, #tpu.memory_space<vmem>>, vector<256x128xbf16>
    tpu.vector_store %arg4[%c0_6, %c0_7], %12 {strides = array<i32>} : memref<256x128xbf16, #tpu.memory_space<vmem>>, vector<256x128xbf16>,
    return
  }
  func.func @transform_0(%arg0: i32) -> (i32, i32) {
    %c0_i32 = arith.constant 0 : i32
    %c0_i32_0 = arith.constant 0 : i32
    return %arg0, %c0_i32 : i32, i32
  }
  func.func @transform_1(%arg0: i32) -> (i32, i32) {
    %c0_i32 = arith.constant 0 : i32
    %c0_i32_0 = arith.constant 0 : i32
    %c0_i32_1 = arith.constant 0 : i32
    return %c0_i32, %c0_i32_0 : i32, i32
  }
  func.func @transform_2(%arg0: i32) -> (i32, i32) {
    %c0_i32 = arith.constant 0 : i32
    %c0_i32_0 = arith.constant 0 : i32
    %c0_i32_1 = arith.constant 0 : i32
    return %c0_i32, %c0_i32_0 : i32, i32
  }
  func.func @transform_3(%arg0: i32) -> (i32, i32) {
    %c0_i32 = arith.constant 0 : i32
    %c0_i32_0 = arith.constant 0 : i32
    return %arg0, %c0_i32 : i32, i32
  }
}

module attributes {stable_mosaic.version = 11 : i64} {
  func.func @_matmul_bn_kernel(%arg0: i32, %arg1: i32, %arg2: memref<64x1024xbf16, #tpu.memory_space<vmem>>, %arg3: memref<1024x128xbf16, #tpu.memory_space<vmem>>, %arg4: memref<64x128xf32, #tpu.memory_space<vmem>>, %arg5: memref<1x8x128xf32, #tpu.memory_space<vmem>>, %arg6: memref<1x8x128xf32, #tpu.memory_space<vmem>>) attributes {dimension_semantics = [#tpu.dimension_semantics<parallel>, #tpu.dimension_semantics<parallel>], iteration_bounds = array<i64: 2, 1>, scalar_prefetch = 0 : i64, scratch_operands = 0 : i64, tpu.core_type = #tpu.core_type<tc>, window_params = [{transform_indices = @transform_0, window_bounds = array<i64: 64, 1024>}, {transform_indices = @transform_1, window_bounds = array<i64: 1024, 128>}, {transform_indices = @transform_2, window_bounds = array<i64: 64, 128>}, {transform_indices = @transform_3, window_bounds = array<i64: 1, 8, 128>}, {transform_indices = @transform_4, window_bounds = array<i64: 1, 8, 128>}]} {
    %c0 = arith.constant 0 : index
    %c0_0 = arith.constant 0 : index
    %0 = vector.load %arg2[%c0, %c0_0] : memref<64x1024xbf16, #tpu.memory_space<vmem>>, vector<64x1024xbf16>
    %c0_1 = arith.constant 0 : index
    %c0_2 = arith.constant 0 : index
    %1 = vector.load %arg3[%c0_1, %c0_2] : memref<1024x128xbf16, #tpu.memory_space<vmem>>, vector<1024x128xbf16>
    %cst = arith.constant dense<0.000000e+00> : vector<64x128xf32>
    %2 = tpu.matmul %0, %1, %cst {dimension_numbers = #tpu.dot_dimension_numbers<[1], [0], [0], [1], [0, 0, 1, 1], [], []>} : vector<64x1024xbf16>, vector<1024x128xbf16>, vector<64x128xf32> -> vector<64x128xf32>
    %c0_3 = arith.constant 0 : index
    %c0_4 = arith.constant 0 : index
    %3 = vector.load %arg4[%c0_3, %c0_4] : memref<64x128xf32, #tpu.memory_space<vmem>>, vector<64x128xf32>
    tpu.vector_store %arg4[%c0_3, %c0_4], %2 {strides = array<i32>} : memref<64x128xf32, #tpu.memory_space<vmem>>, vector<64x128xf32>,
    %cst_5 = arith.constant dense<0.000000e+00> : vector<128xf32>
    %4 = vector.multi_reduction <add>, %2, %cst_5 [0] : vector<64x128xf32> to vector<128xf32>
    %5 = vector.shape_cast %4 : vector<128xf32> to vector<1x128xf32>
    %6 = arith.mulf %2, %2 : vector<64x128xf32>
    %cst_6 = arith.constant dense<0.000000e+00> : vector<128xf32>
    %7 = vector.multi_reduction <add>, %6, %cst_6 [0] : vector<64x128xf32> to vector<128xf32>
    %8 = vector.shape_cast %7 : vector<128xf32> to vector<1x128xf32>
    %9 = tpu.iota {dimensions = array<i32: 0>} : vector<8x128xi32>
    %c0_i32 = arith.constant 0 : i32
    %10 = vector.broadcast %c0_i32 : i32 to vector<8x128xi32>
    %11 = arith.cmpi eq, %9, %10 : vector<8x128xi32>
    %cst_7 = arith.constant 0.000000e+00 : f32
    %12 = vector.shape_cast %5 : vector<1x128xf32> to vector<1x128xf32>
    %13 = vector.broadcast %12 : vector<1x128xf32> to vector<8x128xf32>
    %14 = vector.broadcast %cst_7 : f32 to vector<8x128xf32>
    %15 = arith.select %11, %13, %14 : vector<8x128xi1>, vector<8x128xf32>
    %16 = vector.shape_cast %15 : vector<8x128xf32> to vector<1x8x128xf32>
    %c0_8 = arith.constant 0 : index
    %c0_9 = arith.constant 0 : index
    %c0_10 = arith.constant 0 : index
    %17 = vector.load %arg5[%c0_8, %c0_9, %c0_10] : memref<1x8x128xf32, #tpu.memory_space<vmem>>, vector<1x8x128xf32>
    tpu.vector_store %arg5[%c0_8, %c0_9, %c0_10], %16 {strides = array<i32>} : memref<1x8x128xf32, #tpu.memory_space<vmem>>, vector<1x8x128xf32>,
    %c0_i32_11 = arith.constant 0 : i32
    %18 = vector.broadcast %c0_i32_11 : i32 to vector<8x128xi32>
    %19 = arith.cmpi eq, %9, %18 : vector<8x128xi32>
    %cst_12 = arith.constant 0.000000e+00 : f32
    %20 = vector.shape_cast %8 : vector<1x128xf32> to vector<1x128xf32>
    %21 = vector.broadcast %20 : vector<1x128xf32> to vector<8x128xf32>
    %22 = vector.broadcast %cst_12 : f32 to vector<8x128xf32>
    %23 = arith.select %19, %21, %22 : vector<8x128xi1>, vector<8x128xf32>
    %24 = vector.shape_cast %23 : vector<8x128xf32> to vector<1x8x128xf32>
    %c0_13 = arith.constant 0 : index
    %c0_14 = arith.constant 0 : index
    %c0_15 = arith.constant 0 : index
    %25 = vector.load %arg6[%c0_13, %c0_14, %c0_15] : memref<1x8x128xf32, #tpu.memory_space<vmem>>, vector<1x8x128xf32>
    tpu.vector_store %arg6[%c0_13, %c0_14, %c0_15], %24 {strides = array<i32>} : memref<1x8x128xf32, #tpu.memory_space<vmem>>, vector<1x8x128xf32>,
    return
  }
  func.func @transform_0(%arg0: i32, %arg1: i32) -> (i32, i32) {
    %c0_i32 = arith.constant 0 : i32
    %c0_i32_0 = arith.constant 0 : i32
    return %arg0, %c0_i32 : i32, i32
  }
  func.func @transform_1(%arg0: i32, %arg1: i32) -> (i32, i32) {
    %c0_i32 = arith.constant 0 : i32
    %c0_i32_0 = arith.constant 0 : i32
    return %c0_i32, %arg1 : i32, i32
  }
  func.func @transform_2(%arg0: i32, %arg1: i32) -> (i32, i32) {
    %c0_i32 = arith.constant 0 : i32
    return %arg0, %arg1 : i32, i32
  }
  func.func @transform_3(%arg0: i32, %arg1: i32) -> (i32, i32, i32) {
    %c0_i32 = arith.constant 0 : i32
    %c0_i32_0 = arith.constant 0 : i32
    return %arg0, %c0_i32, %arg1 : i32, i32, i32
  }
  func.func @transform_4(%arg0: i32, %arg1: i32) -> (i32, i32, i32) {
    %c0_i32 = arith.constant 0 : i32
    %c0_i32_0 = arith.constant 0 : i32
    return %arg0, %c0_i32, %arg1 : i32, i32, i32
  }
}

module attributes {stable_mosaic.version = 11 : i64} {
  func.func @_affine_lrelu_kernel(%arg0: i32, %arg1: memref<64x128xf32, #tpu.memory_space<vmem>>, %arg2: memref<1x128xf32, #tpu.memory_space<vmem>>, %arg3: memref<1x128xf32, #tpu.memory_space<vmem>>, %arg4: memref<64x128xbf16, #tpu.memory_space<vmem>>) attributes {dimension_semantics = [#tpu.dimension_semantics<parallel>], iteration_bounds = array<i64: 2>, scalar_prefetch = 0 : i64, scratch_operands = 0 : i64, tpu.core_type = #tpu.core_type<tc>, window_params = [{transform_indices = @transform_0, window_bounds = array<i64: 64, 128>}, {pipeline_mode = #tpu.pipeline_mode<synchronous>, transform_indices = @transform_1, window_bounds = array<i64: 1, 128>}, {pipeline_mode = #tpu.pipeline_mode<synchronous>, transform_indices = @transform_2, window_bounds = array<i64: 1, 128>}, {transform_indices = @transform_3, window_bounds = array<i64: 64, 128>}]} {
    %c0 = arith.constant 0 : index
    %c0_0 = arith.constant 0 : index
    %0 = vector.load %arg1[%c0, %c0_0] : memref<64x128xf32, #tpu.memory_space<vmem>>, vector<64x128xf32>
    %c0_1 = arith.constant 0 : index
    %c0_2 = arith.constant 0 : index
    %1 = vector.load %arg2[%c0_1, %c0_2] : memref<1x128xf32, #tpu.memory_space<vmem>>, vector<1x128xf32>
    %2 = vector.broadcast %1 : vector<1x128xf32> to vector<64x128xf32>
    %3 = arith.mulf %0, %2 : vector<64x128xf32>
    %c0_3 = arith.constant 0 : index
    %c0_4 = arith.constant 0 : index
    %4 = vector.load %arg3[%c0_3, %c0_4] : memref<1x128xf32, #tpu.memory_space<vmem>>, vector<1x128xf32>
    %5 = vector.broadcast %4 : vector<1x128xf32> to vector<64x128xf32>
    %6 = arith.addf %3, %5 : vector<64x128xf32>
    %cst = arith.constant 0.000000e+00 : f32
    %7 = vector.broadcast %cst : f32 to vector<64x128xf32>
    %8 = arith.cmpf oge, %6, %7 : vector<64x128xf32>
    %cst_5 = arith.constant 2.000000e-01 : f32
    %9 = vector.broadcast %cst_5 : f32 to vector<64x128xf32>
    %10 = arith.mulf %9, %6 : vector<64x128xf32>
    %11 = arith.select %8, %6, %10 : vector<64x128xi1>, vector<64x128xf32>
    %12 = arith.truncf %11 : vector<64x128xf32> to vector<64x128xbf16>
    %c0_6 = arith.constant 0 : index
    %c0_7 = arith.constant 0 : index
    %13 = vector.load %arg4[%c0_6, %c0_7] : memref<64x128xbf16, #tpu.memory_space<vmem>>, vector<64x128xbf16>
    tpu.vector_store %arg4[%c0_6, %c0_7], %12 {strides = array<i32>} : memref<64x128xbf16, #tpu.memory_space<vmem>>, vector<64x128xbf16>,
    return
  }
  func.func @transform_0(%arg0: i32) -> (i32, i32) {
    %c0_i32 = arith.constant 0 : i32
    %c0_i32_0 = arith.constant 0 : i32
    return %arg0, %c0_i32 : i32, i32
  }
  func.func @transform_1(%arg0: i32) -> (i32, i32) {
    %c0_i32 = arith.constant 0 : i32
    %c0_i32_0 = arith.constant 0 : i32
    %c0_i32_1 = arith.constant 0 : i32
    return %c0_i32, %c0_i32_0 : i32, i32
  }
  func.func @transform_2(%arg0: i32) -> (i32, i32) {
    %c0_i32 = arith.constant 0 : i32
    %c0_i32_0 = arith.constant 0 : i32
    %c0_i32_1 = arith.constant 0 : i32
    return %c0_i32, %c0_i32_0 : i32, i32
  }
  func.func @transform_3(%arg0: i32) -> (i32, i32) {
    %c0_i32 = arith.constant 0 : i32
    %c0_i32_0 = arith.constant 0 : i32
    return %arg0, %c0_i32 : i32, i32
  }
}

module attributes {stable_mosaic.version = 11 : i64} {
  func.func @_matmul_bn_kernel(%arg0: i32, %arg1: i32, %arg2: memref<16x2048xbf16, #tpu.memory_space<vmem>>, %arg3: memref<2048x256xbf16, #tpu.memory_space<vmem>>, %arg4: memref<16x256xf32, #tpu.memory_space<vmem>>, %arg5: memref<1x8x256xf32, #tpu.memory_space<vmem>>, %arg6: memref<1x8x256xf32, #tpu.memory_space<vmem>>) attributes {dimension_semantics = [#tpu.dimension_semantics<parallel>, #tpu.dimension_semantics<parallel>], iteration_bounds = array<i64: 2, 1>, scalar_prefetch = 0 : i64, scratch_operands = 0 : i64, tpu.core_type = #tpu.core_type<tc>, window_params = [{transform_indices = @transform_0, window_bounds = array<i64: 16, 2048>}, {transform_indices = @transform_1, window_bounds = array<i64: 2048, 256>}, {transform_indices = @transform_2, window_bounds = array<i64: 16, 256>}, {transform_indices = @transform_3, window_bounds = array<i64: 1, 8, 256>}, {transform_indices = @transform_4, window_bounds = array<i64: 1, 8, 256>}]} {
    %c0 = arith.constant 0 : index
    %c0_0 = arith.constant 0 : index
    %0 = vector.load %arg2[%c0, %c0_0] : memref<16x2048xbf16, #tpu.memory_space<vmem>>, vector<16x2048xbf16>
    %c0_1 = arith.constant 0 : index
    %c0_2 = arith.constant 0 : index
    %1 = vector.load %arg3[%c0_1, %c0_2] : memref<2048x256xbf16, #tpu.memory_space<vmem>>, vector<2048x256xbf16>
    %cst = arith.constant dense<0.000000e+00> : vector<16x256xf32>
    %2 = tpu.matmul %0, %1, %cst {dimension_numbers = #tpu.dot_dimension_numbers<[1], [0], [0], [1], [0, 0, 1, 1], [], []>} : vector<16x2048xbf16>, vector<2048x256xbf16>, vector<16x256xf32> -> vector<16x256xf32>
    %c0_3 = arith.constant 0 : index
    %c0_4 = arith.constant 0 : index
    %3 = vector.load %arg4[%c0_3, %c0_4] : memref<16x256xf32, #tpu.memory_space<vmem>>, vector<16x256xf32>
    tpu.vector_store %arg4[%c0_3, %c0_4], %2 {strides = array<i32>} : memref<16x256xf32, #tpu.memory_space<vmem>>, vector<16x256xf32>,
    %cst_5 = arith.constant dense<0.000000e+00> : vector<256xf32>
    %4 = vector.multi_reduction <add>, %2, %cst_5 [0] : vector<16x256xf32> to vector<256xf32>
    %5 = vector.shape_cast %4 : vector<256xf32> to vector<1x256xf32>
    %6 = arith.mulf %2, %2 : vector<16x256xf32>
    %cst_6 = arith.constant dense<0.000000e+00> : vector<256xf32>
    %7 = vector.multi_reduction <add>, %6, %cst_6 [0] : vector<16x256xf32> to vector<256xf32>
    %8 = vector.shape_cast %7 : vector<256xf32> to vector<1x256xf32>
    %9 = tpu.iota {dimensions = array<i32: 0>} : vector<8x256xi32>
    %c0_i32 = arith.constant 0 : i32
    %10 = vector.broadcast %c0_i32 : i32 to vector<8x256xi32>
    %11 = arith.cmpi eq, %9, %10 : vector<8x256xi32>
    %cst_7 = arith.constant 0.000000e+00 : f32
    %12 = vector.shape_cast %5 : vector<1x256xf32> to vector<1x256xf32>
    %13 = vector.broadcast %12 : vector<1x256xf32> to vector<8x256xf32>
    %14 = vector.broadcast %cst_7 : f32 to vector<8x256xf32>
    %15 = arith.select %11, %13, %14 : vector<8x256xi1>, vector<8x256xf32>
    %16 = vector.shape_cast %15 : vector<8x256xf32> to vector<1x8x256xf32>
    %c0_8 = arith.constant 0 : index
    %c0_9 = arith.constant 0 : index
    %c0_10 = arith.constant 0 : index
    %17 = vector.load %arg5[%c0_8, %c0_9, %c0_10] : memref<1x8x256xf32, #tpu.memory_space<vmem>>, vector<1x8x256xf32>
    tpu.vector_store %arg5[%c0_8, %c0_9, %c0_10], %16 {strides = array<i32>} : memref<1x8x256xf32, #tpu.memory_space<vmem>>, vector<1x8x256xf32>,
    %c0_i32_11 = arith.constant 0 : i32
    %18 = vector.broadcast %c0_i32_11 : i32 to vector<8x256xi32>
    %19 = arith.cmpi eq, %9, %18 : vector<8x256xi32>
    %cst_12 = arith.constant 0.000000e+00 : f32
    %20 = vector.shape_cast %8 : vector<1x256xf32> to vector<1x256xf32>
    %21 = vector.broadcast %20 : vector<1x256xf32> to vector<8x256xf32>
    %22 = vector.broadcast %cst_12 : f32 to vector<8x256xf32>
    %23 = arith.select %19, %21, %22 : vector<8x256xi1>, vector<8x256xf32>
    %24 = vector.shape_cast %23 : vector<8x256xf32> to vector<1x8x256xf32>
    %c0_13 = arith.constant 0 : index
    %c0_14 = arith.constant 0 : index
    %c0_15 = arith.constant 0 : index
    %25 = vector.load %arg6[%c0_13, %c0_14, %c0_15] : memref<1x8x256xf32, #tpu.memory_space<vmem>>, vector<1x8x256xf32>
    tpu.vector_store %arg6[%c0_13, %c0_14, %c0_15], %24 {strides = array<i32>} : memref<1x8x256xf32, #tpu.memory_space<vmem>>, vector<1x8x256xf32>,
    return
  }
  func.func @transform_0(%arg0: i32, %arg1: i32) -> (i32, i32) {
    %c0_i32 = arith.constant 0 : i32
    %c0_i32_0 = arith.constant 0 : i32
    return %arg0, %c0_i32 : i32, i32
  }
  func.func @transform_1(%arg0: i32, %arg1: i32) -> (i32, i32) {
    %c0_i32 = arith.constant 0 : i32
    %c0_i32_0 = arith.constant 0 : i32
    return %c0_i32, %arg1 : i32, i32
  }
  func.func @transform_2(%arg0: i32, %arg1: i32) -> (i32, i32) {
    %c0_i32 = arith.constant 0 : i32
    return %arg0, %arg1 : i32, i32
  }
  func.func @transform_3(%arg0: i32, %arg1: i32) -> (i32, i32, i32) {
    %c0_i32 = arith.constant 0 : i32
    %c0_i32_0 = arith.constant 0 : i32
    return %arg0, %c0_i32, %arg1 : i32, i32, i32
  }
  func.func @transform_4(%arg0: i32, %arg1: i32) -> (i32, i32, i32) {
    %c0_i32 = arith.constant 0 : i32
    %c0_i32_0 = arith.constant 0 : i32
    return %arg0, %c0_i32, %arg1 : i32, i32, i32
  }
}

module attributes {stable_mosaic.version = 11 : i64} {
  func.func @_affine_lrelu_kernel(%arg0: i32, %arg1: memref<16x256xf32, #tpu.memory_space<vmem>>, %arg2: memref<1x256xf32, #tpu.memory_space<vmem>>, %arg3: memref<1x256xf32, #tpu.memory_space<vmem>>, %arg4: memref<16x256xf32, #tpu.memory_space<vmem>>) attributes {dimension_semantics = [#tpu.dimension_semantics<parallel>], iteration_bounds = array<i64: 2>, scalar_prefetch = 0 : i64, scratch_operands = 0 : i64, tpu.core_type = #tpu.core_type<tc>, window_params = [{transform_indices = @transform_0, window_bounds = array<i64: 16, 256>}, {pipeline_mode = #tpu.pipeline_mode<synchronous>, transform_indices = @transform_1, window_bounds = array<i64: 1, 256>}, {pipeline_mode = #tpu.pipeline_mode<synchronous>, transform_indices = @transform_2, window_bounds = array<i64: 1, 256>}, {transform_indices = @transform_3, window_bounds = array<i64: 16, 256>}]} {
    %c0 = arith.constant 0 : index
    %c0_0 = arith.constant 0 : index
    %0 = vector.load %arg1[%c0, %c0_0] : memref<16x256xf32, #tpu.memory_space<vmem>>, vector<16x256xf32>
    %c0_1 = arith.constant 0 : index
    %c0_2 = arith.constant 0 : index
    %1 = vector.load %arg2[%c0_1, %c0_2] : memref<1x256xf32, #tpu.memory_space<vmem>>, vector<1x256xf32>
    %2 = vector.broadcast %1 : vector<1x256xf32> to vector<16x256xf32>
    %3 = arith.mulf %0, %2 : vector<16x256xf32>
    %c0_3 = arith.constant 0 : index
    %c0_4 = arith.constant 0 : index
    %4 = vector.load %arg3[%c0_3, %c0_4] : memref<1x256xf32, #tpu.memory_space<vmem>>, vector<1x256xf32>
    %5 = vector.broadcast %4 : vector<1x256xf32> to vector<16x256xf32>
    %6 = arith.addf %3, %5 : vector<16x256xf32>
    %cst = arith.constant 0.000000e+00 : f32
    %7 = vector.broadcast %cst : f32 to vector<16x256xf32>
    %8 = arith.cmpf oge, %6, %7 : vector<16x256xf32>
    %cst_5 = arith.constant 2.000000e-01 : f32
    %9 = vector.broadcast %cst_5 : f32 to vector<16x256xf32>
    %10 = arith.mulf %9, %6 : vector<16x256xf32>
    %11 = arith.select %8, %6, %10 : vector<16x256xi1>, vector<16x256xf32>
    %c0_6 = arith.constant 0 : index
    %c0_7 = arith.constant 0 : index
    %12 = vector.load %arg4[%c0_6, %c0_7] : memref<16x256xf32, #tpu.memory_space<vmem>>, vector<16x256xf32>
    tpu.vector_store %arg4[%c0_6, %c0_7], %11 {strides = array<i32>} : memref<16x256xf32, #tpu.memory_space<vmem>>, vector<16x256xf32>,
    return
  }
  func.func @transform_0(%arg0: i32) -> (i32, i32) {
    %c0_i32 = arith.constant 0 : i32
    %c0_i32_0 = arith.constant 0 : i32
    return %arg0, %c0_i32 : i32, i32
  }
  func.func @transform_1(%arg0: i32) -> (i32, i32) {
    %c0_i32 = arith.constant 0 : i32
    %c0_i32_0 = arith.constant 0 : i32
    %c0_i32_1 = arith.constant 0 : i32
    return %c0_i32, %c0_i32_0 : i32, i32
  }
  func.func @transform_2(%arg0: i32) -> (i32, i32) {
    %c0_i32 = arith.constant 0 : i32
    %c0_i32_0 = arith.constant 0 : i32
    %c0_i32_1 = arith.constant 0 : i32
    return %c0_i32, %c0_i32_0 : i32, i32
  }
  func.func @transform_3(%arg0: i32) -> (i32, i32) {
    %c0_i32 = arith.constant 0 : i32
    %c0_i32_0 = arith.constant 0 : i32
    return %arg0, %c0_i32 : i32, i32
  }
}

module attributes {stable_mosaic.version = 11 : i64} {
  func.func @_head_kernel(%arg0: memref<2x4096xf32, #tpu.memory_space<vmem>>, %arg1: memref<2x1xf32, #tpu.memory_space<vmem>>, %arg2: memref<1x4096xf32, #tpu.memory_space<vmem>>, %arg3: memref<1x1xf32, #tpu.memory_space<smem>>, %arg4: memref<1x1xf32, #tpu.memory_space<smem>>, %arg5: memref<2x1xf32, #tpu.memory_space<vmem>>) attributes {dimension_semantics = [], scalar_prefetch = 0 : i64, scratch_operands = 0 : i64, tpu.core_type = #tpu.core_type<tc>} {
    %c0 = arith.constant 0 : index
    %c0_0 = arith.constant 0 : index
    %0 = vector.load %arg0[%c0, %c0_0] : memref<2x4096xf32, #tpu.memory_space<vmem>>, vector<2x4096xf32>
    %c0_1 = arith.constant 0 : index
    %c0_2 = arith.constant 0 : index
    %1 = vector.load %arg2[%c0_1, %c0_2] : memref<1x4096xf32, #tpu.memory_space<vmem>>, vector<1x4096xf32>
    %2 = vector.broadcast %1 : vector<1x4096xf32> to vector<2x4096xf32>
    %3 = arith.mulf %0, %2 : vector<2x4096xf32>
    %cst = arith.constant dense<0.000000e+00> : vector<2xf32>
    %4 = vector.multi_reduction <add>, %3, %cst [1] : vector<2x4096xf32> to vector<2xf32>
    %5 = vector.shape_cast %4 : vector<2xf32> to vector<2x1xf32>
    %c0_3 = arith.constant 0 : index
    %c0_4 = arith.constant 0 : index
    %6 = vector.load %arg1[%c0_3, %c0_4] : memref<2x1xf32, #tpu.memory_space<vmem>>, vector<2x1xf32>
    %c0_5 = arith.constant 0 : index
    %c0_6 = arith.constant 0 : index
    %7 = memref.load %arg3[%c0_5, %c0_6] : memref<1x1xf32, #tpu.memory_space<smem>>
    %8 = vector.broadcast %7 : f32 to vector<2x1xf32>
    %9 = arith.mulf %6, %8 : vector<2x1xf32>
    %10 = arith.addf %5, %9 : vector<2x1xf32>
    %c0_7 = arith.constant 0 : index
    %c0_8 = arith.constant 0 : index
    %11 = memref.load %arg4[%c0_7, %c0_8] : memref<1x1xf32, #tpu.memory_space<smem>>
    %12 = vector.broadcast %11 : f32 to vector<2x1xf32>
    %13 = arith.addf %10, %12 : vector<2x1xf32>
    %cst_9 = arith.constant 0.000000e+00 : f32
    %14 = vector.broadcast %cst_9 : f32 to vector<2x1xf32>
    %15 = arith.subf %14, %13 : vector<2x1xf32>
    %16 = math.exp %15 : vector<2x1xf32>
    %cst_10 = arith.constant 1.000000e+00 : f32
    %17 = vector.broadcast %cst_10 : f32 to vector<2x1xf32>
    %18 = arith.addf %17, %16 : vector<2x1xf32>
    %cst_11 = arith.constant 1.000000e+00 : f32
    %19 = vector.broadcast %cst_11 : f32 to vector<2x1xf32>
    %20 = arith.divf %19, %18 : vector<2x1xf32>
    %c0_12 = arith.constant 0 : index
    %c0_13 = arith.constant 0 : index
    %21 = vector.load %arg5[%c0_12, %c0_13] : memref<2x1xf32, #tpu.memory_space<vmem>>, vector<2x1xf32>
    tpu.vector_store %arg5[%c0_12, %c0_13], %20 {strides = array<i32>} : memref<2x1xf32, #tpu.memory_space<vmem>>, vector<2x1xf32>,
    return
  }
}

</mosaic_0001>

<bundles_post_ra>
// kernel: cond_cnn_discriminator_forward.10
= control target key start
LH: loop header
LB: loop body
LE: loop exit
PB: predicated region body
PF: predicated region fallthrough
CT: control target
= control target key end

     0   :  { %s1316_s12 = smov 0   ;;  %s1576_s0 = inlined_call_operand.vmem [shape: f32[2048,128], index: 0, kind: input, shape index: {}]   ;;  %s1577_s1 = inlined_call_operand.vmem [shape: f32[1,128], index: 1, kind: input, shape index: {}]   ;;  %s1578_s2 = inlined_call_operand.vmem [shape: f32[1,128], index: 2, kind: input, shape index: {}]   ;;  %s1579_s3 = inlined_call_operand.vmem [shape: bf16[2048,128], index: 3, kind: output, shape index: {}]  }
   0x1 LB: > { %s948_s13 = sadd.s32 4294967295, %s1294_s12   ;;  %p952_p0 = scmp.ge.s32.totalorder %s1294_s12, 1  ;;  %s1294_s12 = sphi %s1316_s12, %s13_s12  }
   0x2   : > { %p138_p1 = scmp.lt.s32.totalorder %s1294_s12, 5 }
   0x4   : > { %p139_p2 = pnand %p952_p0, %p138_p1 }
   0x5   : > { %s953_s14 = sshll.u32 (!%p139_p2), %s948_s13, 6  ;;  %v1330_v0 = vld [vmem:[%s1577_s1] ss:$0 sm:$0xff] (!%p139_p2) }
   0x6   : > { %142 = sbr.rel (%p139_p2) target bundleno = 111 (0x6f), region = 32  ;;  %p163_p3 = scmp.lt.s32.totalorder (!%p139_p2), %s953_s14, 255  ;;  %v1340_v1 = vld [vmem:[%s1578_s2] ss:$0 sm:$0xff] (!%p139_p2) }
   0xd   : > { %s1581_s14 = smov (!%p163_p3, %s953_s14), 255 }
   0xe   : > { %s954_s15 = sshll.u32 %s1581_s14, 3  ;;  %s956_s23 = sshll.u32 %s1581_s14, 2 }
   0xf   : > { %s1335_s20 = scalar_lea.vmem %s1576_s0, %s954_s15  ;;  %s1368_s26 = scalar_lea.vmem %s1579_s3, %s956_s23 }
  0x10   : > { %v174_v2 = vld [vmem:[%s1335_s20] sm:$0xff]  ;;  %v175_v3 = vld [vmem:[%s1335_s20 + $0x8] sm:$0xff]  ;;  %v176_v4 = vld [vmem:[%s1335_s20 + $0x10] sm:$0xff] }
  0x11   : > { %v245_v5 = vmul.f32 %v1330_v0, %v174_v2  ;;  %v246_v6 = vmul.f32 %v1330_v0, %v175_v3  ;;  %v177_v7 = vld [vmem:[%s1335_s20 + $0x18] sm:$0xff]  ;;  %v247_v8 = vmul.f32 %v1330_v0, %v176_v4  ;;  %v178_v9 = vld [vmem:[%s1335_s20 + $0x20] sm:$0xff]  ;;  %v179_v10 = vld [vmem:[%s1335_s20 + $0x28] sm:$0xff] }
  0x12   : > { %v248_v11 = vmul.f32 %v1330_v0, %v177_v7  ;;  %v249_v12 = vmul.f32 %v1330_v0, %v178_v9  ;;  %v250_v13 = vmul.f32 %v1330_v0, %v179_v10  ;;  %v180_v14 = vld [vmem:[%s1335_s20 + $0x30] sm:$0xff]  ;;  %v181_v15 = vld [vmem:[%s1335_s20 + $0x38] sm:$0xff]  ;;  %v182_v30 = vld [vmem:[%s1335_s20 + $0x40] sm:$0xff] }
  0x13   : > { %v316_v16 = vadd.f32 %v1340_v1, %v245_v5  ;;  %v317_v17 = vadd.f32 %v1340_v1, %v246_v6  ;;  %v318_v18 = vadd.f32 %v1340_v1, %v247_v8  ;;  %v251_v19 = vmul.f32 %v1330_v0, %v180_v14  ;;  %v183_v31 = vld [vmem:[%s1335_s20 + $0x48] sm:$0xff]  ;;  %v184_v32 = vld [vmem:[%s1335_s20 + $0x50] sm:$0xff]  ;;  %v185_v44 = vld [vmem:[%s1335_s20 + $0x58] sm:$0xff] }
  0x14   : > { %v319_v20 = vadd.f32 %v1340_v1, %v248_v11  ;;  %v320_v21 = vadd.f32 %v1340_v1, %v249_v12  ;;  %v321_v22 = vadd.f32 %v1340_v1, %v250_v13  ;;  %v252_v23 = vmul.f32 %v1330_v0, %v181_v15  ;;  %v186_v46 = vld [vmem:[%s1335_s20 + $0x60] sm:$0xff]  ;;  %v187_v56 = vld [vmem:[%s1335_s20 + $0x68] sm:$0xff]  ;;  %v188_v60 = vld [vmem:[%s1335_s20 + $0x70] sm:$0xff] }
  0x15   : > { %vm380_vm0 = vcmp.ge.f32.partialorder %v316_v16, 0.0  ;;  %vm381_vm1 = vcmp.ge.f32.partialorder %v317_v17, 0.0  ;;  %v444_v24 = vmul.f32 0.2, %v316_v16  ;;  %v445_v25 = vmul.f32 0.2, %v317_v17 }
  0x16   : > { %vm382_vm2 = vcmp.ge.f32.partialorder %v318_v18, 0.0  ;;  %vm383_vm3 = vcmp.ge.f32.partialorder %v319_v20, 0.0  ;;  %v446_v26 = vmul.f32 0.2, %v318_v18  ;;  %v447_v27 = vmul.f32 0.2, %v319_v20 }
  0x17   : > { %v508_v28 = vsel %vm380_vm0, %v316_v16, %v444_v24  ;;  %v509_v29 = vsel %vm381_vm1, %v317_v17, %v445_v25  ;;  %vm384_vm4 = vcmp.ge.f32.partialorder %v320_v21, 0.0  ;;  %vm385_vm5 = vcmp.ge.f32.partialorder %v321_v22, 0.0  ;;  %v189_v6 = vld [vmem:[%s1335_s20 + $0x78] sm:$0xff]  ;;  %v190_v10 = vld [vmem:[%s1335_s20 + $0x80] sm:$0xff] }
  0x18   : > { %v1092_v33 = vpack.c.bf16 %v509_v29, %v508_v28  ;;  %v510_v34 = vsel %vm382_vm2, %v318_v18, %v446_v26  ;;  %v511_v35 = vsel %vm383_vm3, %v319_v20, %v447_v27  ;;  %v448_v36 = vmul.f32 0.2, %v320_v21  ;;  %v191_v18 = vld [vmem:[%s1335_s20 + $0x88] sm:$0xff]  ;;  %v193_v26 = vld [vmem:[%s1335_s20 + $0x98] sm:$0xff] }
  0x19   : > { %v1097_v37 = vpack.c.bf16 %v511_v35, %v510_v34  ;;  %v449_v38 = vmul.f32 0.2, %v321_v22  ;;  %v322_v39 = vadd.f32 %v1340_v1, %v251_v19  ;;  %v323_v40 = vadd.f32 %v1340_v1, %v252_v23  ;;  %v192_v19 = vld [vmem:[%s1335_s20 + $0x90] sm:$0xff] }
  0x1a   : > { %1093 = vst [vmem:[%s1368_s26] sm:$0xff] %v1092_v33   ;;  %v512_v41 = vsel %vm384_vm4, %v320_v21, %v448_v36  ;;  %v253_v42 = vmul.f32 %v1330_v0, %v182_v30  ;;  %v254_v43 = vmul.f32 %v1330_v0, %v183_v31  ;;  %v255_v45 = vmul.f32 %v1330_v0, %v184_v32  ;;  %v194_v31 = vld [vmem:[%s1335_s20 + $0xa0] sm:$0xff]  ;;  %v195_v32 = vld [vmem:[%s1335_s20 + $0xa8] sm:$0xff] }
  0x1b   : > { %1249 = vst [vmem:[%s1368_s26 + $0x8] sm:$0xff] %v1097_v37   ;;  %v513_v47 = vsel %vm385_vm5, %v321_v22, %v449_v38  ;;  %vm386_vm6 = vcmp.ge.f32.partialorder %v322_v39, 0.0  ;;  %vm387_vm7 = vcmp.ge.f32.partialorder %v323_v40, 0.0  ;;  %v450_v48 = vmul.f32 0.2, %v322_v39 }
  0x1c   : > { %v1102_v49 = vpack.c.bf16 %v513_v47, %v512_v41  ;;  %v451_v50 = vmul.f32 0.2, %v323_v40  ;;  %v324_v51 = vadd.f32 %v1340_v1, %v253_v42  ;;  %v325_v52 = vadd.f32 %v1340_v1, %v254_v43  ;;  %v196_v43 = vld [vmem:[%s1335_s20 + $0xb0] sm:$0xff] }
  0x1d   : > { %v514_v53 = vsel %vm386_vm6, %v322_v39, %v450_v48  ;;  %v256_v54 = vmul.f32 %v1330_v0, %v185_v44  ;;  %v326_v55 = vadd.f32 %v1340_v1, %v255_v45  ;;  %v257_v57 = vmul.f32 %v1330_v0, %v186_v46  ;;  %v197_v44 = vld [vmem:[%s1335_s20 + $0xb8] sm:$0xff] }
  0x1e   : > { %1250 = vst [vmem:[%s1368_s26 + $0x10] sm:$0xff] %v1102_v49   ;;  %v515_v58 = vsel %vm387_vm7, %v323_v40, %v451_v50  ;;  %vm388_vm8 = vcmp.ge.f32.partialorder %v324_v51, 0.0  ;;  %vm389_vm9 = vcmp.ge.f32.partialorder %v325_v52, 0.0  ;;  %v452_v59 = vmul.f32 0.2, %v324_v51 }
  0x1f   : > { %v1107_v61 = vpack.c.bf16 %v515_v58, %v514_v53  ;;  %v453_v62 = vmul.f32 0.2, %v325_v52  ;;  %v327_v63 = vadd.f32 %v1340_v1, %v256_v54  ;;  %vm390_vm10 = vcmp.ge.f32.partialorder %v326_v55, 0.0 }
  0x20   : > { %v516_v2 = vsel %vm388_vm8, %v324_v51, %v452_v59  ;;  %v454_v3 = vmul.f32 0.2, %v326_v55  ;;  %v258_v4 = vmul.f32 %v1330_v0, %v187_v56  ;;  %v328_v5 = vadd.f32 %v1340_v1, %v257_v57  ;;  %v199_v59 = vld [vmem:[%s1335_s20 + $0xc8] sm:$0xff] }
  0x21   : > { %1251 = vst [vmem:[%s1368_s26 + $0x18] sm:$0xff] %v1107_v61   ;;  %v517_v7 = vsel %vm389_vm9, %v325_v52, %v453_v62  ;;  %vm391_vm11 = vcmp.ge.f32.partialorder %v327_v63, 0.0  ;;  %v455_v8 = vmul.f32 0.2, %v327_v63  ;;  %v259_v9 = vmul.f32 %v1330_v0, %v188_v60 }
  0x22   : > { %v1112_v11 = vpack.c.bf16 %v517_v7, %v516_v2  ;;  %v518_v12 = vsel %vm390_vm10, %v326_v55, %v454_v3  ;;  %v329_v13 = vadd.f32 %v1340_v1, %v258_v4  ;;  %vm392_vm12 = vcmp.ge.f32.partialorder %v328_v5, 0.0  ;;  %v198_v55 = vld [vmem:[%s1335_s20 + $0xc0] sm:$0xff]  ;;  %v200_v4 = vld [vmem:[%s1335_s20 + $0xd0] sm:$0xff] }
  0x23   : > { %v519_v14 = vsel %vm391_vm11, %v327_v63, %v455_v8  ;;  %v456_v15 = vmul.f32 0.2, %v328_v5  ;;  %v260_v16 = vmul.f32 %v1330_v0, %v189_v6  ;;  %v330_v17 = vadd.f32 %v1340_v1, %v259_v9  ;;  %v201_v9 = vld [vmem:[%s1335_s20 + $0xd8] sm:$0xff] }
  0x24   : > { %1252 = vst [vmem:[%s1368_s26 + $0x20] sm:$0xff] %v1112_v11   ;;  %v1117_v20 = vpack.c.bf16 %v519_v14, %v518_v12  ;;  %vm393_vm13 = vcmp.ge.f32.partialorder %v329_v13, 0.0  ;;  %v457_v21 = vmul.f32 0.2, %v329_v13  ;;  %v261_v22 = vmul.f32 %v1330_v0, %v190_v10  ;;  %v202_v10 = vld [vmem:[%s1335_s20 + $0xe0] sm:$0xff]  ;;  %v203_v11 = vld [vmem:[%s1335_s20 + $0xe8] sm:$0xff] }
  0x25   : > { %v520_v23 = vsel %vm392_vm12, %v328_v5, %v456_v15  ;;  %v331_v24 = vadd.f32 %v1340_v1, %v260_v16  ;;  %vm394_vm14 = vcmp.ge.f32.partialorder %v330_v17, 0.0  ;;  %v458_v25 = vmul.f32 0.2, %v330_v17 }
  0x26   : > { %1253 = vst [vmem:[%s1368_s26 + $0x28] sm:$0xff] %v1117_v20   ;;  %v521_v27 = vsel %vm393_vm13, %v329_v13, %v457_v21  ;;  %v262_v28 = vmul.f32 %v1330_v0, %v191_v18  ;;  %v332_v29 = vadd.f32 %v1340_v1, %v261_v22  ;;  %v263_v30 = vmul.f32 %v1330_v0, %v192_v19  ;;  %v204_v22 = vld [vmem:[%s1335_s20 + $0xf0] sm:$0xff] }
  0x27   : > { %v1122_v33 = vpack.c.bf16 %v521_v27, %v520_v23  ;;  %vm395_vm15 = vcmp.ge.f32.partialorder %v331_v24, 0.0  ;;  %v459_v34 = vmul.f32 0.2, %v331_v24  ;;  %v522_v35 = vsel %vm394_vm14, %v330_v17, %v458_v25 }
  0x28   : > { %v333_v36 = vadd.f32 %v1340_v1, %v262_v28  ;;  %vm396_vm0 = vcmp.ge.f32.partialorder %v332_v29, 0.0  ;;  %v460_v37 = vmul.f32 0.2, %v332_v29  ;;  %v264_v38 = vmul.f32 %v1330_v0, %v193_v26 }
  0x29   : > { %1254 = vst [vmem:[%s1368_s26 + $0x30] sm:$0xff] %v1122_v33   ;;  %v523_v39 = vsel %vm395_vm15, %v331_v24, %v459_v34  ;;  %v334_v40 = vadd.f32 %v1340_v1, %v263_v30  ;;  %v265_v41 = vmul.f32 %v1330_v0, %v194_v31  ;;  %v266_v42 = vmul.f32 %v1330_v0, %v195_v32  ;;  %v205_v32 = vld [vmem:[%s1335_s20 + $0xf8] sm:$0xff] }
  0x2a   : > { %v1127_v45 = vpack.c.bf16 %v523_v39, %v522_v35  ;;  %vm397_vm1 = vcmp.ge.f32.partialorder %v333_v36, 0.0  ;;  %v461_v46 = vmul.f32 0.2, %v333_v36  ;;  %v524_v47 = vsel %vm396_vm0, %v332_v29, %v460_v37  ;;  %v207_v37 = vld [vmem:[%s1335_s20 + $0x108] sm:$0xff] }
  0x2b   : > { %v335_v48 = vadd.f32 %v1340_v1, %v264_v38  ;;  %vm398_vm2 = vcmp.ge.f32.partialorder %v334_v40, 0.0  ;;  %v462_v49 = vmul.f32 0.2, %v334_v40  ;;  %v336_v50 = vadd.f32 %v1340_v1, %v265_v41 }
  0x2c   : > { %1255 = vst [vmem:[%s1368_s26 + $0x38] sm:$0xff] %v1127_v45   ;;  %v525_v51 = vsel %vm397_vm1, %v333_v36, %v461_v46  ;;  %v337_v52 = vadd.f32 %v1340_v1, %v266_v42  ;;  %v267_v53 = vmul.f32 %v1330_v0, %v196_v43  ;;  %v268_v54 = vmul.f32 %v1330_v0, %v197_v44  ;;  %v206_v36 = vld [vmem:[%s1335_s20 + $0x100] sm:$0xff] }
  0x2d   : > { %v1132_v56 = vpack.c.bf16 %v525_v51, %v524_v47  ;;  %vm399_vm3 = vcmp.ge.f32.partialorder %v335_v48, 0.0  ;;  %v463_v57 = vmul.f32 0.2, %v335_v48  ;;  %v526_v58 = vsel %vm398_vm2, %v334_v40, %v462_v49 }
  0x2e   : > { %vm400_vm4 = vcmp.ge.f32.partialorder %v336_v50, 0.0  ;;  %vm401_vm5 = vcmp.ge.f32.partialorder %v337_v52, 0.0  ;;  %v464_v60 = vmul.f32 0.2, %v336_v50  ;;  %v465_v61 = vmul.f32 0.2, %v337_v52 }
  0x2f   : > { %1256 = vst [vmem:[%s1368_s26 + $0x40] sm:$0xff] %v1132_v56   ;;  %v527_v62 = vsel %vm399_vm3, %v335_v48, %v463_v57  ;;  %v338_v63 = vadd.f32 %v1340_v1, %v267_v53  ;;  %v339_v2 = vadd.f32 %v1340_v1, %v268_v54  ;;  %v269_v3 = vmul.f32 %v1330_v0, %v198_v55  ;;  %v208_v48 = vld [vmem:[%s1335_s20 + $0x110] sm:$0xff]  ;;  %v209_v53 = vld [vmem:[%s1335_s20 + $0x118] sm:$0xff] }
  0x30   : > { %v1137_v5 = vpack.c.bf16 %v527_v62, %v526_v58  ;;  %v528_v6 = vsel %vm400_vm4, %v336_v50, %v464_v60  ;;  %v529_v7 = vsel %vm401_vm5, %v337_v52, %v465_v61  ;;  %v270_v8 = vmul.f32 %v1330_v0, %v199_v59  ;;  %v210_v60 = vld [vmem:[%s1335_s20 + $0x120] sm:$0xff] }
  0x31   : > { %v1142_v12 = vpack.c.bf16 %v529_v7, %v528_v6  ;;  %vm402_vm6 = vcmp.ge.f32.partialorder %v338_v63, 0.0  ;;  %vm403_vm7 = vcmp.ge.f32.partialorder %v339_v2, 0.0  ;;  %v466_v13 = vmul.f32 0.2, %v338_v63 }
  0x32   : > { %1257 = vst [vmem:[%s1368_s26 + $0x48] sm:$0xff] %v1137_v5   ;;  %v467_v14 = vmul.f32 0.2, %v339_v2  ;;  %v340_v15 = vadd.f32 %v1340_v1, %v269_v3  ;;  %v341_v16 = vadd.f32 %v1340_v1, %v270_v8  ;;  %v271_v17 = vmul.f32 %v1330_v0, %v200_v4 }
  0x33   : > { %1258 = vst [vmem:[%s1368_s26 + $0x50] sm:$0xff] %v1142_v12   ;;  %v530_v18 = vsel %vm402_vm6, %v338_v63, %v466_v13  ;;  %v272_v19 = vmul.f32 %v1330_v0, %v201_v9  ;;  %v273_v20 = vmul.f32 %v1330_v0, %v202_v10  ;;  %v274_v21 = vmul.f32 %v1330_v0, %v203_v11  ;;  %v212_v10 = vld [vmem:[%s1335_s20 + $0x130] sm:$0xff]  ;;  %v213_v11 = vld [vmem:[%s1335_s20 + $0x138] sm:$0xff] }
  0x34   : > { %v531_v23 = vsel %vm403_vm7, %v339_v2, %v467_v14  ;;  %vm404_vm8 = vcmp.ge.f32.partialorder %v340_v15, 0.0  ;;  %vm405_vm9 = vcmp.ge.f32.partialorder %v341_v16, 0.0  ;;  %v468_v24 = vmul.f32 0.2, %v340_v15  ;;  %v211_v2 = vld [vmem:[%s1335_s20 + $0x128] sm:$0xff] }
  0x35   : > { %v1147_v25 = vpack.c.bf16 %v531_v23, %v530_v18  ;;  %v469_v26 = vmul.f32 0.2, %v341_v16  ;;  %v342_v27 = vadd.f32 %v1340_v1, %v271_v17  ;;  %v343_v28 = vadd.f32 %v1340_v1, %v272_v19  ;;  %v215_v23 = vld [vmem:[%s1335_s20 + $0x148] sm:$0xff] }
  0x36   : > { %v532_v29 = vsel %vm404_vm8, %v340_v15, %v468_v24  ;;  %v344_v30 = vadd.f32 %v1340_v1, %v273_v20  ;;  %v345_v31 = vadd.f32 %v1340_v1, %v274_v21  ;;  %v275_v33 = vmul.f32 %v1330_v0, %v204_v22  ;;  %v214_v15 = vld [vmem:[%s1335_s20 + $0x140] sm:$0xff] }
  0x37   : > { %1259 = vst [vmem:[%s1368_s26 + $0x58] sm:$0xff] %v1147_v25   ;;  %v533_v34 = vsel %vm405_vm9, %v341_v16, %v469_v26  ;;  %vm406_vm10 = vcmp.ge.f32.partialorder %v342_v27, 0.0  ;;  %vm407_vm11 = vcmp.ge.f32.partialorder %v343_v28, 0.0  ;;  %v470_v35 = vmul.f32 0.2, %v342_v27 }
  0x38   : > { %v1152_v38 = vpack.c.bf16 %v533_v34, %v532_v29  ;;  %v471_v39 = vmul.f32 0.2, %v343_v28  ;;  %vm408_vm12 = vcmp.ge.f32.partialorder %v344_v30, 0.0  ;;  %vm409_vm13 = vcmp.ge.f32.partialorder %v345_v31, 0.0 }
  0x39   : > { %v534_v40 = vsel %vm406_vm10, %v342_v27, %v470_v35  ;;  %v472_v41 = vmul.f32 0.2, %v344_v30  ;;  %v473_v42 = vmul.f32 0.2, %v345_v31  ;;  %v276_v43 = vmul.f32 %v1330_v0, %v205_v32  ;;  %v216_v27 = vld [vmem:[%s1335_s20 + $0x150] sm:$0xff]  ;;  %v217_v35 = vld [vmem:[%s1335_s20 + $0x158] sm:$0xff] }
  0x3a   : > { %1260 = vst [vmem:[%s1368_s26 + $0x60] sm:$0xff] %v1152_v38   ;;  %v535_v44 = vsel %vm407_vm11, %v343_v28, %v471_v39  ;;  %v346_v45 = vadd.f32 %v1340_v1, %v275_v33  ;;  %v277_v46 = vmul.f32 %v1330_v0, %v206_v36  ;;  %v278_v47 = vmul.f32 %v1330_v0, %v207_v37 }
  0x3b   : > { %v1157_v49 = vpack.c.bf16 %v535_v44, %v534_v40  ;;  %v536_v50 = vsel %vm408_vm12, %v344_v30, %v472_v41  ;;  %v537_v51 = vsel %vm409_vm13, %v345_v31, %v473_v42  ;;  %v347_v52 = vadd.f32 %v1340_v1, %v276_v43  ;;  %v218_v42 = vld [vmem:[%s1335_s20 + $0x160] sm:$0xff] }
  0x3c   : > { %v1162_v54 = vpack.c.bf16 %v537_v51, %v536_v50  ;;  %vm410_vm14 = vcmp.ge.f32.partialorder %v346_v45, 0.0  ;;  %v474_v55 = vmul.f32 0.2, %v346_v45  ;;  %v348_v56 = vadd.f32 %v1340_v1, %v277_v46  ;;  %v219_v46 = vld [vmem:[%s1335_s20 + $0x168] sm:$0xff] }
  0x3d   : > { %1261 = vst [vmem:[%s1368_s26 + $0x68] sm:$0xff] %v1157_v49   ;;  %vm411_vm15 = vcmp.ge.f32.partialorder %v347_v52, 0.0  ;;  %v475_v57 = vmul.f32 0.2, %v347_v52  ;;  %v349_v58 = vadd.f32 %v1340_v1, %v278_v47  ;;  %v279_v59 = vmul.f32 %v1330_v0, %v208_v48 }
  0x3e   : > { %1262 = vst [vmem:[%s1368_s26 + $0x70] sm:$0xff] %v1162_v54   ;;  %v538_v61 = vsel %vm410_vm14, %v346_v45, %v474_v55  ;;  %vm412_vm0 = vcmp.ge.f32.partialorder %v348_v56, 0.0  ;;  %v476_v62 = vmul.f32 0.2, %v348_v56  ;;  %v280_v63 = vmul.f32 %v1330_v0, %v209_v53  ;;  %v220_v54 = vld [vmem:[%s1335_s20 + $0x170] sm:$0xff]  ;;  %v221_v55 = vld [vmem:[%s1335_s20 + $0x178] sm:$0xff] }
  0x3f   : > { %v539_v3 = vsel %vm411_vm15, %v347_v52, %v475_v57  ;;  %vm413_vm1 = vcmp.ge.f32.partialorder %v349_v58, 0.0  ;;  %v477_v4 = vmul.f32 0.2, %v349_v58  ;;  %v350_v5 = vadd.f32 %v1340_v1, %v279_v59  ;;  %v222_v59 = vld [vmem:[%s1335_s20 + $0x180] sm:$0xff] }
  0x40   : > { %v1167_v6 = vpack.c.bf16 %v539_v3, %v538_v61  ;;  %v540_v7 = vsel %vm412_vm0, %v348_v56, %v476_v62  ;;  %v351_v8 = vadd.f32 %v1340_v1, %v280_v63  ;;  %v281_v9 = vmul.f32 %v1330_v0, %v210_v60 }
  0x41   : > { %v541_v12 = vsel %vm413_vm1, %v349_v58, %v477_v4  ;;  %vm414_vm2 = vcmp.ge.f32.partialorder %v350_v5, 0.0  ;;  %v478_v13 = vmul.f32 0.2, %v350_v5  ;;  %v282_v14 = vmul.f32 %v1330_v0, %v211_v2 }
  0x42   : > { %1263 = vst [vmem:[%s1368_s26 + $0x78] sm:$0xff] %v1167_v6   ;;  %v1172_v16 = vpack.c.bf16 %v541_v12, %v540_v7  ;;  %vm415_vm3 = vcmp.ge.f32.partialorder %v351_v8, 0.0  ;;  %v479_v17 = vmul.f32 0.2, %v351_v8  ;;  %v352_v18 = vadd.f32 %v1340_v1, %v281_v9  ;;  %v224_v9 = vld [vmem:[%s1335_s20 + $0x190] sm:$0xff] }
  0x43   : > { %v542_v19 = vsel %vm414_vm2, %v350_v5, %v478_v13  ;;  %v353_v20 = vadd.f32 %v1340_v1, %v282_v14  ;;  %v283_v21 = vmul.f32 %v1330_v0, %v212_v10  ;;  %v284_v22 = vmul.f32 %v1330_v0, %v213_v11  ;;  %v223_v5 = vld [vmem:[%s1335_s20 + $0x188] sm:$0xff] }
  0x44   : > { %1264 = vst [vmem:[%s1368_s26 + $0x80] sm:$0xff] %v1172_v16   ;;  %v543_v24 = vsel %vm415_vm3, %v351_v8, %v479_v17  ;;  %vm416_vm4 = vcmp.ge.f32.partialorder %v352_v18, 0.0  ;;  %v480_v25 = vmul.f32 0.2, %v352_v18  ;;  %v285_v26 = vmul.f32 %v1330_v0, %v214_v15  ;;  %v225_v17 = vld [vmem:[%s1335_s20 + $0x198] sm:$0xff] }
  0x45   : > { %v1177_v28 = vpack.c.bf16 %v543_v24, %v542_v19  ;;  %vm417_vm5 = vcmp.ge.f32.partialorder %v353_v20, 0.0  ;;  %v481_v29 = vmul.f32 0.2, %v353_v20  ;;  %v354_v30 = vadd.f32 %v1340_v1, %v283_v21  ;;  %v226_v24 = vld [vmem:[%s1335_s20 + $0x1a0] sm:$0xff] }
  0x46   : > { %v544_v31 = vsel %vm416_vm4, %v352_v18, %v480_v25  ;;  %v355_v32 = vadd.f32 %v1340_v1, %v284_v22  ;;  %v286_v33 = vmul.f32 %v1330_v0, %v215_v23  ;;  %v356_v34 = vadd.f32 %v1340_v1, %v285_v26 }
  0x47   : > { %1265 = vst [vmem:[%s1368_s26 + $0x88] sm:$0xff] %v1177_v28   ;;  %v545_v36 = vsel %vm417_vm5, %v353_v20, %v481_v29  ;;  %vm418_vm6 = vcmp.ge.f32.partialorder %v354_v30, 0.0  ;;  %v482_v37 = vmul.f32 0.2, %v354_v30  ;;  %v287_v38 = vmul.f32 %v1330_v0, %v216_v27  ;;  %v227_v28 = vld [vmem:[%s1335_s20 + $0x1a8] sm:$0xff] }
  0x48   : > { %v1182_v39 = vpack.c.bf16 %v545_v36, %v544_v31  ;;  %vm419_vm7 = vcmp.ge.f32.partialorder %v355_v32, 0.0  ;;  %v483_v40 = vmul.f32 0.2, %v355_v32  ;;  %v357_v41 = vadd.f32 %v1340_v1, %v286_v33  ;;  %v228_v36 = vld [vmem:[%s1335_s20 + $0x1b0] sm:$0xff] }
  0x49   : > { %v546_v43 = vsel %vm418_vm6, %v354_v30, %v482_v37  ;;  %vm420_vm8 = vcmp.ge.f32.partialorder %v356_v34, 0.0  ;;  %v484_v44 = vmul.f32 0.2, %v356_v34  ;;  %v288_v45 = vmul.f32 %v1330_v0, %v217_v35  ;;  %v229_v37 = vld [vmem:[%s1335_s20 + $0x1b8] sm:$0xff] }
  0x4a   : > { %1266 = vst [vmem:[%s1368_s26 + $0x90] sm:$0xff] %v1182_v39   ;;  %v547_v47 = vsel %vm419_vm7, %v355_v32, %v483_v40  ;;  %vm421_vm9 = vcmp.ge.f32.partialorder %v357_v41, 0.0  ;;  %v485_v48 = vmul.f32 0.2, %v357_v41  ;;  %v358_v49 = vadd.f32 %v1340_v1, %v287_v38 }
  0x4b   : > { %v1187_v50 = vpack.c.bf16 %v547_v47, %v546_v43  ;;  %v548_v51 = vsel %vm420_vm8, %v356_v34, %v484_v44  ;;  %v359_v52 = vadd.f32 %v1340_v1, %v288_v45  ;;  %v289_v53 = vmul.f32 %v1330_v0, %v218_v42 }
  0x4c   : > { %v549_v56 = vsel %vm421_vm9, %v357_v41, %v485_v48  ;;  %vm422_vm10 = vcmp.ge.f32.partialorder %v358_v49, 0.0  ;;  %v486_v57 = vmul.f32 0.2, %v358_v49  ;;  %v290_v58 = vmul.f32 %v1330_v0, %v219_v46  ;;  %v230_v41 = vld [vmem:[%s1335_s20 + $0x1c0] sm:$0xff] }
  0x4d   : > { %1267 = vst [vmem:[%s1368_s26 + $0x98] sm:$0xff] %v1187_v50   ;;  %v1192_v60 = vpack.c.bf16 %v549_v56, %v548_v51  ;;  %vm423_vm11 = vcmp.ge.f32.partialorder %v359_v52, 0.0  ;;  %v487_v61 = vmul.f32 0.2, %v359_v52  ;;  %v360_v62 = vadd.f32 %v1340_v1, %v289_v53  ;;  %v232_v53 = vld [vmem:[%s1335_s20 + $0x1d0] sm:$0xff] }
  0x4e   : > { %v550_v63 = vsel %vm422_vm10, %v358_v49, %v486_v57  ;;  %v361_v2 = vadd.f32 %v1340_v1, %v290_v58  ;;  %v291_v3 = vmul.f32 %v1330_v0, %v220_v54  ;;  %v292_v4 = vmul.f32 %v1330_v0, %v221_v55  ;;  %v231_v49 = vld [vmem:[%s1335_s20 + $0x1c8] sm:$0xff] }
  0x4f   : > { %1268 = vst [vmem:[%s1368_s26 + $0xa0] sm:$0xff] %v1192_v60   ;;  %v551_v6 = vsel %vm423_vm11, %v359_v52, %v487_v61  ;;  %vm424_vm12 = vcmp.ge.f32.partialorder %v360_v62, 0.0  ;;  %v488_v7 = vmul.f32 0.2, %v360_v62  ;;  %v293_v8 = vmul.f32 %v1330_v0, %v222_v59  ;;  %v233_v61 = vld [vmem:[%s1335_s20 + $0x1d8] sm:$0xff] }
  0x50   : > { %v1197_v10 = vpack.c.bf16 %v551_v6, %v550_v63  ;;  %vm425_vm13 = vcmp.ge.f32.partialorder %v361_v2, 0.0  ;;  %v489_v11 = vmul.f32 0.2, %v361_v2  ;;  %v362_v12 = vadd.f32 %v1340_v1, %v291_v3  ;;  %v234_v6 = vld [vmem:[%s1335_s20 + $0x1e0] sm:$0xff] }
  0x51   : > { %v552_v13 = vsel %vm424_vm12, %v360_v62, %v488_v7  ;;  %v363_v14 = vadd.f32 %v1340_v1, %v292_v4  ;;  %v294_v15 = vmul.f32 %v1330_v0, %v223_v5  ;;  %v364_v16 = vadd.f32 %v1340_v1, %v293_v8 }
  0x52   : > { %1269 = vst [vmem:[%s1368_s26 + $0xa8] sm:$0xff] %v1197_v10   ;;  %v553_v18 = vsel %vm425_vm13, %v361_v2, %v489_v11  ;;  %vm426_vm14 = vcmp.ge.f32.partialorder %v362_v12, 0.0  ;;  %v490_v19 = vmul.f32 0.2, %v362_v12  ;;  %v295_v20 = vmul.f32 %v1330_v0, %v224_v9  ;;  %v235_v10 = vld [vmem:[%s1335_s20 + $0x1e8] sm:$0xff] }
  0x53   : > { %v1202_v21 = vpack.c.bf16 %v553_v18, %v552_v13  ;;  %vm427_vm15 = vcmp.ge.f32.partialorder %v363_v14, 0.0  ;;  %v491_v22 = vmul.f32 0.2, %v363_v14  ;;  %v365_v23 = vadd.f32 %v1340_v1, %v294_v15  ;;  %v236_v18 = vld [vmem:[%s1335_s20 + $0x1f0] sm:$0xff] }
  0x54   : > { %v554_v25 = vsel %vm426_vm14, %v362_v12, %v490_v19  ;;  %vm428_vm0 = vcmp.ge.f32.partialorder %v364_v16, 0.0  ;;  %v492_v26 = vmul.f32 0.2, %v364_v16  ;;  %v296_v27 = vmul.f32 %v1330_v0, %v225_v17  ;;  %v237_v19 = vld [vmem:[%s1335_s20 + $0x1f8] sm:$0xff] }
  0x55   : > { %1270 = vst [vmem:[%s1368_s26 + $0xb0] sm:$0xff] %v1202_v21   ;;  %v555_v29 = vsel %vm427_vm15, %v363_v14, %v491_v22  ;;  %vm429_vm1 = vcmp.ge.f32.partialorder %v365_v23, 0.0  ;;  %v493_v30 = vmul.f32 0.2, %v365_v23  ;;  %v366_v31 = vadd.f32 %v1340_v1, %v295_v20 }
  0x56   : > { %v1207_v32 = vpack.c.bf16 %v555_v29, %v554_v25  ;;  %v556_v33 = vsel %vm428_vm0, %v364_v16, %v492_v26  ;;  %v367_v34 = vadd.f32 %v1340_v1, %v296_v27  ;;  %v297_v35 = vmul.f32 %v1330_v0, %v226_v24 }
  0x57   : > { %v557_v38 = vsel %vm429_vm1, %v365_v23, %v493_v30  ;;  %vm430_vm2 = vcmp.ge.f32.partialorder %v366_v31, 0.0  ;;  %v494_v39 = vmul.f32 0.2, %v366_v31  ;;  %v298_v40 = vmul.f32 %v1330_v0, %v227_v28 }
  0x58   : > { %1271 = vst [vmem:[%s1368_s26 + $0xb8] sm:$0xff] %v1207_v32   ;;  %v1212_v42 = vpack.c.bf16 %v557_v38, %v556_v33  ;;  %vm431_vm3 = vcmp.ge.f32.partialorder %v367_v34, 0.0  ;;  %v495_v43 = vmul.f32 0.2, %v367_v34  ;;  %v368_v44 = vadd.f32 %v1340_v1, %v297_v35 }
  0x59   : > { %v558_v45 = vsel %vm430_vm2, %v366_v31, %v494_v39  ;;  %v369_v46 = vadd.f32 %v1340_v1, %v298_v40  ;;  %v299_v47 = vmul.f32 %v1330_v0, %v228_v36  ;;  %v300_v48 = vmul.f32 %v1330_v0, %v229_v37 }
  0x5a   : > { %1272 = vst [vmem:[%s1368_s26 + $0xc0] sm:$0xff] %v1212_v42   ;;  %v559_v50 = vsel %vm431_vm3, %v367_v34, %v495_v43  ;;  %vm432_vm4 = vcmp.ge.f32.partialorder %v368_v44, 0.0  ;;  %v496_v51 = vmul.f32 0.2, %v368_v44  ;;  %v301_v52 = vmul.f32 %v1330_v0, %v230_v41 }
  0x5b   : > { %v1217_v54 = vpack.c.bf16 %v559_v50, %v558_v45  ;;  %vm433_vm5 = vcmp.ge.f32.partialorder %v369_v46, 0.0  ;;  %v497_v55 = vmul.f32 0.2, %v369_v46  ;;  %v370_v56 = vadd.f32 %v1340_v1, %v299_v47 }
  0x5c   : > { %v560_v57 = vsel %vm432_vm4, %v368_v44, %v496_v51  ;;  %v371_v58 = vadd.f32 %v1340_v1, %v300_v48  ;;  %v302_v59 = vmul.f32 %v1330_v0, %v231_v49  ;;  %v372_v60 = vadd.f32 %v1340_v1, %v301_v52 }
  0x5d   : > { %1273 = vst [vmem:[%s1368_s26 + $0xc8] sm:$0xff] %v1217_v54   ;;  %v561_v62 = vsel %vm433_vm5, %v369_v46, %v497_v55  ;;  %vm434_vm6 = vcmp.ge.f32.partialorder %v370_v56, 0.0  ;;  %v498_v63 = vmul.f32 0.2, %v370_v56  ;;  %v303_v2 = vmul.f32 %v1330_v0, %v232_v53 }
  0x5e   : > { %v1222_v3 = vpack.c.bf16 %v561_v62, %v560_v57  ;;  %vm435_vm7 = vcmp.ge.f32.partialorder %v371_v58, 0.0  ;;  %v499_v4 = vmul.f32 0.2, %v371_v58  ;;  %v373_v5 = vadd.f32 %v1340_v1, %v302_v59 }
  0x5f   : > { %v562_v7 = vsel %vm434_vm6, %v370_v56, %v498_v63  ;;  %vm436_vm8 = vcmp.ge.f32.partialorder %v372_v60, 0.0  ;;  %v500_v8 = vmul.f32 0.2, %v372_v60  ;;  %v304_v9 = vmul.f32 %v1330_v0, %v233_v61 }
  0x60   : > { %1274 = vst [vmem:[%s1368_s26 + $0xd0] sm:$0xff] %v1222_v3   ;;  %v563_v11 = vsel %vm435_vm7, %v371_v58, %v499_v4  ;;  %vm437_vm9 = vcmp.ge.f32.partialorder %v373_v5, 0.0  ;;  %v501_v12 = vmul.f32 0.2, %v373_v5  ;;  %v374_v13 = vadd.f32 %v1340_v1, %v303_v2 }
  0x61   : > { %v1227_v14 = vpack.c.bf16 %v563_v11, %v562_v7  ;;  %v564_v15 = vsel %vm436_vm8, %v372_v60, %v500_v8  ;;  %v375_v16 = vadd.f32 %v1340_v1, %v304_v9  ;;  %v305_v17 = vmul.f32 %v1330_v0, %v234_v6 }
  0x62   : > { %v565_v20 = vsel %vm437_vm9, %v373_v5, %v501_v12  ;;  %vm438_vm10 = vcmp.ge.f32.partialorder %v374_v13, 0.0  ;;  %v502_v21 = vmul.f32 0.2, %v374_v13  ;;  %v306_v22 = vmul.f32 %v1330_v0, %v235_v10 }
  0x63   : > { %1275 = vst [vmem:[%s1368_s26 + $0xd8] sm:$0xff] %v1227_v14   ;;  %v1232_v23 = vpack.c.bf16 %v565_v20, %v564_v15  ;;  %vm439_vm11 = vcmp.ge.f32.partialorder %v375_v16, 0.0  ;;  %v503_v24 = vmul.f32 0.2, %v375_v16  ;;  %v376_v25 = vadd.f32 %v1340_v1, %v305_v17 }
  0x64   : > { %v566_v26 = vsel %vm438_vm10, %v374_v13, %v502_v21  ;;  %v377_v27 = vadd.f32 %v1340_v1, %v306_v22  ;;  %v307_v28 = vmul.f32 %v1330_v0, %v236_v18  ;;  %v308_v29 = vmul.f32 %v1330_v0, %v237_v19 }
  0x65   : > { %1276 = vst [vmem:[%s1368_s26 + $0xe0] sm:$0xff] %v1232_v23   ;;  %v567_v30 = vsel %vm439_vm11, %v375_v16, %v503_v24  ;;  %vm440_vm12 = vcmp.ge.f32.partialorder %v376_v25, 0.0  ;;  %v504_v31 = vmul.f32 0.2, %v376_v25 }
  0x66   : > { %v1237_v32 = vpack.c.bf16 %v567_v30, %v566_v26  ;;  %vm441_vm13 = vcmp.ge.f32.partialorder %v377_v27, 0.0  ;;  %v505_v33 = vmul.f32 0.2, %v377_v27  ;;  %v378_v34 = vadd.f32 %v1340_v1, %v307_v28 }
  0x67   : > { %v568_v35 = vsel %vm440_vm12, %v376_v25, %v504_v31  ;;  %v379_v36 = vadd.f32 %v1340_v1, %v308_v29 }
  0x68   : > { %1277 = vst [vmem:[%s1368_s26 + $0xe8] sm:$0xff] %v1237_v32   ;;  %v569_v37 = vsel %vm441_vm13, %v377_v27, %v505_v33  ;;  %vm442_vm14 = vcmp.ge.f32.partialorder %v378_v34, 0.0  ;;  %v506_v38 = vmul.f32 0.2, %v378_v34 }
  0x69   : > { %v1242_v39 = vpack.c.bf16 %v569_v37, %v568_v35  ;;  %vm443_vm15 = vcmp.ge.f32.partialorder %v379_v36, 0.0  ;;  %v507_v0 = vmul.f32 0.2, %v379_v36 }
  0x6a   : > { %v570_v40 = vsel %vm442_vm14, %v378_v34, %v506_v38 }
  0x6b   : > { %1278 = vst [vmem:[%s1368_s26 + $0xf0] sm:$0xff] %v1242_v39   ;;  %v571_v41 = vsel %vm443_vm15, %v379_v36, %v507_v0 }
  0x6c   : > { %v1247_v42 = vpack.c.bf16 %v571_v41, %v570_v40 }
  0x6e   : > { %1279 = vst [vmem:[%s1368_s26 + $0xf8] sm:$0xff] %v1247_v42  }
  0x6f PF: > { %s13_s12 = sadd.s32 1, %s1294_s12  }
  0x70   : > { %p10_p4 = scmp.ge.s32.totalorder %s13_s12, 6  }
  0x72   :  { %12 = sbr.rel (!%p10_p4) target bundleno = 1 (0x1), region = 62 }

// kernel: cond_cnn_discriminator_forward.9
= control target key start
LH: loop header
LB: loop body
LE: loop exit
PB: predicated region body
PF: predicated region fallthrough
CT: control target
= control target key end

     0   :  { %s1625_s15 = smov 0   ;;  %s1627_s16 = smov 0   ;;  %s2000_s0 = inlined_call_operand.vmem [shape: bf16[2048,16], index: 0, kind: input, shape index: {}]   ;;  %s2001_s1 = inlined_call_operand.vmem [shape: bf16[16,128], index: 1, kind: input, shape index: {}]   ;;  %s2002_s2 = inlined_call_operand.vmem [shape: f32[2048,128], index: 2, kind: output, shape index: {0}]   ;;  %s2003_s3 = inlined_call_operand.vmem [shape: f32[4,8,128], index: 3, kind: output, shape index: {1}]   ;;  %s2004_s4 = inlined_call_operand.vmem [shape: f32[4,8,128], index: 4, kind: output, shape index: {2}]  }
   0x1   :  { %s1629_s17 = smov 0  }
   0x2 LB: > { %s27_s18 = sadd.s32 1, %s1594_s16  ;;  %p1344_p0 = scmp.ge.s32.totalorder %s1598_s17, 1  ;;  %s1598_s17 = sphi %s1629_s17, %s15_s17   ;;  %s1594_s16 = sphi %s1627_s16, %s2006_s16   ;;  %s1590_s15 = sphi %s1625_s15, %s2005_s15  }
   0x3   : > { %p29_p1 = scmp.ge.s32.totalorder %s27_s18, 4  ;;  %p195_p2 = scmp.lt.s32.totalorder %s1598_s17, 5 }
   0x5   : > { %s2008_s18 = smov (%p29_p1, %s27_s18), 0  ;;  %p196_p3 = pnand %p1344_p0, %p195_p2 }
   0x6   : > { %v1543_v0 = vld [vmem:[%s2001_s1] sm:$0xff] (!%p196_p3)   ;;  %s1345_s21 = sshll.u32 (!%p196_p3), %s1590_s15, 6  ;;  %vm508_vm0 = vcmask (!%p196_p3), 130048   ;;  %p261_p5 = scmp.lt.s32.totalorder (!%p196_p3), %s1590_s15, 3 }
   0x7   : > { %199 = sbr.rel (%p196_p3) target bundleno = 376 (0x178), region = 28  ;;  %p243_p4 = scmp.lt.s32.totalorder (!%p196_p3), %s1345_s21, 255  ;;  %1451 = vmatprep.subr.bf16.mxu0 (!%p196_p3), %v1543_v0  ;;  %1517 = vmatprep.subr.bf16.mxu1 (!%p196_p3), %v1543_v0 }
   0x8   : > { %1452 = vmatpush3.bf16.msra.mxu0 (!%p196_p3), %v1543_v0  ;;  %1518 = vmatpush3.bf16.msra.mxu1 (!%p196_p3), %v1543_v0 }
   0xe   : > { %s2010_s21 = smov (!%p243_p4, %s1345_s21), 255  ;;  %s2012_s15 = smov (!%p261_p5, %s1590_s15), 3 }
   0xf   : > { %s1346_s22 = sshll.u32 %s2010_s21, 2  ;;  %s1348_s26 = sshll.u32 %s2010_s21, 3 }
  0x10   : > { %s1655_s25 = scalar_lea.vmem %s2000_s0, %s1346_s22  ;;  %s1725_s29 = scalar_lea.vmem %s2002_s2, %s1348_s26 }
  0x11   : > { %v1544_v1 = vld [vmem:[%s1655_s25] sm:$0xff]   ;;  %v1545_v2 = vld [vmem:[%s1655_s25 + $0x8] sm:$0xff]   ;;  %v1546_v3 = vld [vmem:[%s1655_s25 + $0x10] sm:$0xff]   ;;  %s1349_s30 = sshll.u32 %s2012_s15, 3 }
  0x12   : > { %1453 = vmatprep.mubr.msk.bf16.mxu0 %vm508_vm0, %v1544_v1  ;;  %v1547_v4 = vld [vmem:[%s1655_s25 + $0x18] sm:$0xff]   ;;  %v1548_v5 = vld [vmem:[%s1655_s25 + $0x20] sm:$0xff]   ;;  %v1549_v6 = vld [vmem:[%s1655_s25 + $0x28] sm:$0xff]   ;;  %s267_s7 = scalar_lea.vmem %s2003_s3, %s1349_s30  ;;  %s274_s10 = scalar_lea.vmem %s2004_s4, %s1349_s30 }
  0x13   : > { %1454 = vmatmul.mubr.msk.bf16.vlgmr.msra.gmra.mrb[0].mxu0 %vm508_vm0, %v1545_v2  ;;  %v1550_v7 = vld [vmem:[%s1655_s25 + $0x30] sm:$0xff]   ;;  %v1560_v8 = vld [vmem:[%s1655_s25 + $0x80] sm:$0xff]   ;;  %v1561_v9 = vld [vmem:[%s1655_s25 + $0x88] sm:$0xff]  }
  0x14   : > { %1457 = vmatprep.mubr.msk.bf16.mxu0 %vm508_vm0, %v1546_v3  ;;  %1485 = vmatprep.mubr.msk.bf16.mxu1 %vm508_vm0, %v1560_v8  ;;  %v1562_v10 = vld [vmem:[%s1655_s25 + $0x90] sm:$0xff]   ;;  %v1551_v11 = vld [vmem:[%s1655_s25 + $0x38] sm:$0xff]   ;;  %v1552_v12 = vld [vmem:[%s1655_s25 + $0x40] sm:$0xff]  }
  0x15   : > { %1486 = vmatmul.mubr.msk.bf16.vlgmr.msra.gmra.mrb[0].mxu1 %vm508_vm0, %v1561_v9  ;;  %v1563_v13 = vld [vmem:[%s1655_s25 + $0x98] sm:$0xff]   ;;  %v1564_v14 = vld [vmem:[%s1655_s25 + $0xa0] sm:$0xff]   ;;  %v1553_v15 = vld [vmem:[%s1655_s25 + $0x48] sm:$0xff]  }
  0x16   : > { %1489 = vmatprep.mubr.msk.bf16.mxu1 %vm508_vm0, %v1562_v10  ;;  %v1565_v16 = vld [vmem:[%s1655_s25 + $0xa8] sm:$0xff]   ;;  %v1554_v17 = vld [vmem:[%s1655_s25 + $0x50] sm:$0xff]   ;;  %v1555_v19 = vld [vmem:[%s1655_s25 + $0x58] sm:$0xff]  }
  0x17   : > { %v1566_v18 = vld [vmem:[%s1655_s25 + $0xb0] sm:$0xff]   ;;  %v1567_v20 = vld [vmem:[%s1655_s25 + $0xb8] sm:$0xff]   ;;  %v1556_v21 = vld [vmem:[%s1655_s25 + $0x60] sm:$0xff]  }
  0x18   : > { %v1568_v22 = vld [vmem:[%s1655_s25 + $0xc0] sm:$0xff]   ;;  %v1557_v23 = vld [vmem:[%s1655_s25 + $0x68] sm:$0xff]   ;;  %v1558_v25 = vld [vmem:[%s1655_s25 + $0x70] sm:$0xff]  }
  0x19   : > { %v1569_v24 = vld [vmem:[%s1655_s25 + $0xc8] sm:$0xff]   ;;  %v1570_v26 = vld [vmem:[%s1655_s25 + $0xd0] sm:$0xff]   ;;  %v1559_v27 = vld [vmem:[%s1655_s25 + $0x78] sm:$0xff]  }
  0x1a   : > { %v1571_v28 = vld [vmem:[%s1655_s25 + $0xd8] sm:$0xff]   ;;  %v1572_v29 = vld [vmem:[%s1655_s25 + $0xe0] sm:$0xff]   ;;  %v1573_v30 = vld [vmem:[%s1655_s25 + $0xe8] sm:$0xff]  }
  0x1b   : > { %1458 = vmatmul.mubr.msk.bf16.gmra.mrb[4].mxu0 %vm508_vm0, %v1547_v4  ;;  %v1574_v31 = vld [vmem:[%s1655_s25 + $0xf0] sm:$0xff]   ;;  %v1575_v32 = vld [vmem:[%s1655_s25 + $0xf8] sm:$0xff]  }
  0x1c   : > { %1461 = vmatprep.mubr.msk.bf16.mxu0 %vm508_vm0, %v1548_v5 }
  0x1d   : > { %1490 = vmatmul.mubr.msk.bf16.gmra.mrb[4].mxu1 %vm508_vm0, %v1563_v13 }
  0x1e   : > { %1493 = vmatprep.mubr.msk.bf16.mxu1 %vm508_vm0, %v1564_v14 }
  0x23   : > { %1462 = vmatmul.mubr.msk.bf16.gmra.mrb[8].mxu0 %vm508_vm0, %v1549_v6 }
  0x24   : > { %1465 = vmatprep.mubr.msk.bf16.mxu0 %vm508_vm0, %v1550_v7 }
  0x25   : > { %1494 = vmatmul.mubr.msk.bf16.gmra.mrb[8].mxu1 %vm508_vm0, %v1565_v16 }
  0x26   : > { %1497 = vmatprep.mubr.msk.bf16.mxu1 %vm508_vm0, %v1566_v18 }
  0x2b   : > { %1466 = vmatmul.mubr.msk.bf16.gmra.mrb[12].mxu0 %vm508_vm0, %v1551_v11 }
  0x2c   : > { %1469 = vmatprep.mubr.msk.bf16.mxu0 %vm508_vm0, %v1552_v12 }
  0x2d   : > { %1498 = vmatmul.mubr.msk.bf16.gmra.mrb[12].mxu1 %vm508_vm0, %v1567_v20 }
  0x2e   : > { %1501 = vmatprep.mubr.msk.bf16.mxu1 %vm508_vm0, %v1568_v22 }
  0x33   : > { %1470 = vmatmul.mubr.msk.bf16.gmra.mrb[16].mxu0 %vm508_vm0, %v1553_v15 }
  0x34   : > { %1473 = vmatprep.mubr.msk.bf16.mxu0 %vm508_vm0, %v1554_v17 }
  0x35   : > { %1502 = vmatmul.mubr.msk.bf16.gmra.mrb[16].mxu1 %vm508_vm0, %v1569_v24 }
  0x36   : > { %1505 = vmatprep.mubr.msk.bf16.mxu1 %vm508_vm0, %v1570_v26 }
  0x3b   : > { %1474 = vmatmul.mubr.msk.bf16.gmra.mrb[20].mxu0 %vm508_vm0, %v1555_v19 }
  0x3c   : > { %1477 = vmatprep.mubr.msk.bf16.mxu0 %vm508_vm0, %v1556_v21 }
  0x3d   : > { %1506 = vmatmul.mubr.msk.bf16.gmra.mrb[20].mxu1 %vm508_vm0, %v1571_v28 }
  0x3e   : > { %1509 = vmatprep.mubr.msk.bf16.mxu1 %vm508_vm0, %v1572_v29 }
  0x43   : > { %1478 = vmatmul.mubr.msk.bf16.gmra.mrb[24].mxu0 %vm508_vm0, %v1557_v23 }
  0x44   : > { %1481 = vmatprep.mubr.msk.bf16.mxu0 %vm508_vm0, %v1558_v25 }
  0x45   : > { %1510 = vmatmul.mubr.msk.bf16.gmra.mrb[24].mxu1 %vm508_vm0, %v1573_v30 }
  0x46   : > { %1513 = vmatprep.mubr.msk.bf16.mxu1 %vm508_vm0, %v1574_v31 }
  0x4b   : > { %1482 = vmatmul.mubr.msk.bf16.gmra.mrb[28].mxu0 %vm508_vm0, %v1559_v27 }
  0x4d   : > { %1514 = vmatmul.mubr.msk.bf16.gmra.mrb[28].mxu1 %vm508_vm0, %v1575_v32 }
  0xe6   : > { %v1455_v33 = vpop.f32.mrb[0].mxu0 }
  0xe7   : > { %896 = vst [vmem:[%s1725_s29 + $0x10] sm:$0xff] %v1455_v33  ;;  %v639_v34 = vpop.f32.mrb[1].mxu0  ;;  %v1029_v40 = vmul.f32 %v1455_v33, %v1455_v33 }
  0xe8   : > { %894 = vst [vmem:[%s1725_s29] sm:$0xff] %v639_v34  ;;  %v1456_v35 = vpop.f32.mrb[2].mxu0  ;;  %v1027_v37 = vmul.f32 %v639_v34, %v639_v34  ;;  %v1735_v63 = vpop.f32.mrb[0].mxu1 }
  0xe9   : > { %897 = vst [vmem:[%s1725_s29 + $0x18] sm:$0xff] %v1456_v35  ;;  %v642_v36 = vpop.f32.mrb[3].mxu0  ;;  %v1030_v43 = vmul.f32 %v1456_v35, %v1456_v35  ;;  %928 = vst [vmem:[%s1725_s29 + $0x110] sm:$0xff] %v1735_v63  ;;  %v1740_v1 = vpop.f32.mrb[1].mxu1 }
  0xea   : > { %895 = vst [vmem:[%s1725_s29 + $0x8] sm:$0xff] %v642_v36  ;;  %v958_v38 = vadd.f32 %v642_v36, %v639_v34  ;;  %v1028_v39 = vmul.f32 %v642_v36, %v642_v36  ;;  %926 = vst [vmem:[%s1725_s29 + $0x100] sm:$0xff] %v1740_v1  ;;  %v1745_v6 = vpop.f32.mrb[2].mxu1 }
  0xeb   : > { %929 = vst [vmem:[%s1725_s29 + $0x118] sm:$0xff] %v1745_v6  ;;  %v1750_v8 = vpop.f32.mrb[3].mxu1 }
  0xec   : > { %v959_v41 = vadd.f32 %v1455_v33, %v958_v38  ;;  %v1091_v42 = vadd.f32 %v1028_v39, %v1027_v37  ;;  %927 = vst [vmem:[%s1725_s29 + $0x108] sm:$0xff] %v1750_v8 }
  0xee   : > { %v1092_v44 = vadd.f32 %v1091_v42, %v1029_v40  ;;  %v1459_v45 = vpop.f32.mrb[4].mxu0  ;;  %v960_v46 = vadd.f32 %v1456_v35, %v959_v41 }
  0xef   : > { %900 = vst [vmem:[%s1725_s29 + $0x30] sm:$0xff] %v1459_v45  ;;  %v655_v47 = vpop.f32.mrb[5].mxu0  ;;  %v1033_v56 = vmul.f32 %v1459_v45, %v1459_v45 }
  0xf0   : > { %898 = vst [vmem:[%s1725_s29 + $0x20] sm:$0xff] %v655_v47  ;;  %v961_v48 = vadd.f32 %v960_v46, %v655_v47  ;;  %v1031_v49 = vmul.f32 %v655_v47, %v655_v47  ;;  %v1093_v50 = vadd.f32 %v1092_v44, %v1030_v43  ;;  %v1460_v51 = vpop.f32.mrb[6].mxu0  ;;  %v1755_v19 = vpop.f32.mrb[4].mxu1 }
  0xf1   : > { %901 = vst [vmem:[%s1725_s29 + $0x38] sm:$0xff] %v1460_v51  ;;  %v658_v52 = vpop.f32.mrb[7].mxu0  ;;  %v1034_v59 = vmul.f32 %v1460_v51, %v1460_v51  ;;  %932 = vst [vmem:[%s1725_s29 + $0x130] sm:$0xff] %v1755_v19  ;;  %v1760_v21 = vpop.f32.mrb[5].mxu1 }
  0xf2   : > { %v1094_v53 = vadd.f32 %v1093_v50, %v1031_v49  ;;  %899 = vst [vmem:[%s1725_s29 + $0x28] sm:$0xff] %v658_v52  ;;  %v962_v54 = vadd.f32 %v961_v48, %v658_v52  ;;  %v1032_v55 = vmul.f32 %v658_v52, %v658_v52  ;;  %930 = vst [vmem:[%s1725_s29 + $0x120] sm:$0xff] %v1760_v21  ;;  %v1765_v26 = vpop.f32.mrb[6].mxu1 }
  0xf3   : > { %933 = vst [vmem:[%s1725_s29 + $0x138] sm:$0xff] %v1765_v26  ;;  %v1770_v28 = vpop.f32.mrb[7].mxu1 }
  0xf4   : > { %v963_v57 = vadd.f32 %v1459_v45, %v962_v54  ;;  %v1095_v58 = vadd.f32 %v1094_v53, %v1032_v55  ;;  %931 = vst [vmem:[%s1725_s29 + $0x128] sm:$0xff] %v1770_v28 }
  0xf6   : > { %v1096_v60 = vadd.f32 %v1095_v58, %v1033_v56  ;;  %v1463_v61 = vpop.f32.mrb[8].mxu0  ;;  %v964_v62 = vadd.f32 %v1460_v51, %v963_v57 }
  0xf7   : > { %904 = vst [vmem:[%s1725_s29 + $0x50] sm:$0xff] %v1463_v61  ;;  %v671_v0 = vpop.f32.mrb[9].mxu0  ;;  %v1037_v12 = vmul.f32 %v1463_v61, %v1463_v61 }
  0xf8   : > { %902 = vst [vmem:[%s1725_s29 + $0x40] sm:$0xff] %v671_v0  ;;  %v965_v2 = vadd.f32 %v964_v62, %v671_v0  ;;  %v1035_v3 = vmul.f32 %v671_v0, %v671_v0  ;;  %v1097_v4 = vadd.f32 %v1096_v60, %v1034_v59  ;;  %v1464_v5 = vpop.f32.mrb[10].mxu0  ;;  %v1775_v39 = vpop.f32.mrb[8].mxu1 }
  0xf9   : > { %905 = vst [vmem:[%s1725_s29 + $0x58] sm:$0xff] %v1464_v5  ;;  %v674_v7 = vpop.f32.mrb[11].mxu0  ;;  %v1038_v15 = vmul.f32 %v1464_v5, %v1464_v5  ;;  %936 = vst [vmem:[%s1725_s29 + $0x150] sm:$0xff] %v1775_v39  ;;  %v1780_v41 = vpop.f32.mrb[9].mxu1 }
  0xfa   : > { %v1098_v9 = vadd.f32 %v1097_v4, %v1035_v3  ;;  %903 = vst [vmem:[%s1725_s29 + $0x48] sm:$0xff] %v674_v7  ;;  %v966_v10 = vadd.f32 %v965_v2, %v674_v7  ;;  %v1036_v11 = vmul.f32 %v674_v7, %v674_v7  ;;  %934 = vst [vmem:[%s1725_s29 + $0x140] sm:$0xff] %v1780_v41  ;;  %v1785_v46 = vpop.f32.mrb[10].mxu1 }
  0xfb   : > { %937 = vst [vmem:[%s1725_s29 + $0x158] sm:$0xff] %v1785_v46  ;;  %v1790_v48 = vpop.f32.mrb[11].mxu1 }
  0xfc   : > { %v967_v13 = vadd.f32 %v1463_v61, %v966_v10  ;;  %v1099_v14 = vadd.f32 %v1098_v9, %v1036_v11  ;;  %935 = vst [vmem:[%s1725_s29 + $0x148] sm:$0xff] %v1790_v48 }
  0xfe   : > { %v1100_v16 = vadd.f32 %v1099_v14, %v1037_v12  ;;  %v1467_v17 = vpop.f32.mrb[12].mxu0  ;;  %v968_v18 = vadd.f32 %v1464_v5, %v967_v13 }
  0xff   : > { %908 = vst [vmem:[%s1725_s29 + $0x70] sm:$0xff] %v1467_v17  ;;  %v687_v20 = vpop.f32.mrb[13].mxu0  ;;  %v1041_v32 = vmul.f32 %v1467_v17, %v1467_v17 }
 0x100   : > { %906 = vst [vmem:[%s1725_s29 + $0x60] sm:$0xff] %v687_v20  ;;  %v969_v22 = vadd.f32 %v968_v18, %v687_v20  ;;  %v1039_v23 = vmul.f32 %v687_v20, %v687_v20  ;;  %v1101_v24 = vadd.f32 %v1100_v16, %v1038_v15  ;;  %v1468_v25 = vpop.f32.mrb[14].mxu0  ;;  %v1795_v59 = vpop.f32.mrb[12].mxu1 }
 0x101   : > { %909 = vst [vmem:[%s1725_s29 + $0x78] sm:$0xff] %v1468_v25  ;;  %v690_v27 = vpop.f32.mrb[15].mxu0  ;;  %v1042_v35 = vmul.f32 %v1468_v25, %v1468_v25  ;;  %940 = vst [vmem:[%s1725_s29 + $0x170] sm:$0xff] %v1795_v59  ;;  %v1800_v61 = vpop.f32.mrb[13].mxu1 }
 0x102   : > { %v1102_v29 = vadd.f32 %v1101_v24, %v1039_v23  ;;  %907 = vst [vmem:[%s1725_s29 + $0x68] sm:$0xff] %v690_v27  ;;  %v970_v30 = vadd.f32 %v969_v22, %v690_v27  ;;  %v1040_v31 = vmul.f32 %v690_v27, %v690_v27  ;;  %938 = vst [vmem:[%s1725_s29 + $0x160] sm:$0xff] %v1800_v61  ;;  %v1805_v4 = vpop.f32.mrb[14].mxu1 }
 0x103   : > { %941 = vst [vmem:[%s1725_s29 + $0x178] sm:$0xff] %v1805_v4  ;;  %v1810_v7 = vpop.f32.mrb[15].mxu1 }
 0x104   : > { %v971_v33 = vadd.f32 %v1467_v17, %v970_v30  ;;  %v1103_v34 = vadd.f32 %v1102_v29, %v1040_v31  ;;  %939 = vst [vmem:[%s1725_s29 + $0x168] sm:$0xff] %v1810_v7 }
 0x106   : > { %v1104_v36 = vadd.f32 %v1103_v34, %v1041_v32  ;;  %v1471_v37 = vpop.f32.mrb[16].mxu0  ;;  %v972_v38 = vadd.f32 %v1468_v25, %v971_v33 }
 0x107   : > { %912 = vst [vmem:[%s1725_s29 + $0x90] sm:$0xff] %v1471_v37  ;;  %v703_v40 = vpop.f32.mrb[17].mxu0  ;;  %v1045_v52 = vmul.f32 %v1471_v37, %v1471_v37 }
 0x108   : > { %910 = vst [vmem:[%s1725_s29 + $0x80] sm:$0xff] %v703_v40  ;;  %v973_v42 = vadd.f32 %v972_v38, %v703_v40  ;;  %v1043_v43 = vmul.f32 %v703_v40, %v703_v40  ;;  %v1105_v44 = vadd.f32 %v1104_v36, %v1042_v35  ;;  %v1472_v45 = vpop.f32.mrb[18].mxu0  ;;  %v1815_v20 = vpop.f32.mrb[16].mxu1 }
 0x109   : > { %913 = vst [vmem:[%s1725_s29 + $0x98] sm:$0xff] %v1472_v45  ;;  %v706_v47 = vpop.f32.mrb[19].mxu0  ;;  %v1046_v55 = vmul.f32 %v1472_v45, %v1472_v45  ;;  %944 = vst [vmem:[%s1725_s29 + $0x190] sm:$0xff] %v1815_v20  ;;  %v1820_v23 = vpop.f32.mrb[17].mxu1 }
 0x10a   : > { %v1106_v49 = vadd.f32 %v1105_v44, %v1043_v43  ;;  %911 = vst [vmem:[%s1725_s29 + $0x88] sm:$0xff] %v706_v47  ;;  %v974_v50 = vadd.f32 %v973_v42, %v706_v47  ;;  %v1044_v51 = vmul.f32 %v706_v47, %v706_v47  ;;  %942 = vst [vmem:[%s1725_s29 + $0x180] sm:$0xff] %v1820_v23  ;;  %v1825_v30 = vpop.f32.mrb[18].mxu1 }
 0x10b   : > { %945 = vst [vmem:[%s1725_s29 + $0x198] sm:$0xff] %v1825_v30  ;;  %v1830_v32 = vpop.f32.mrb[19].mxu1 }
 0x10c   : > { %v975_v53 = vadd.f32 %v1471_v37, %v974_v50  ;;  %v1107_v54 = vadd.f32 %v1106_v49, %v1044_v51  ;;  %943 = vst [vmem:[%s1725_s29 + $0x188] sm:$0xff] %v1830_v32 }
 0x10e   : > { %v1108_v56 = vadd.f32 %v1107_v54, %v1045_v52  ;;  %v1475_v57 = vpop.f32.mrb[20].mxu0  ;;  %v976_v58 = vadd.f32 %v1472_v45, %v975_v53 }
 0x10f   : > { %916 = vst [vmem:[%s1725_s29 + $0xb0] sm:$0xff] %v1475_v57  ;;  %v719_v60 = vpop.f32.mrb[21].mxu0  ;;  %v1049_v12 = vmul.f32 %v1475_v57, %v1475_v57 }
 0x110   : > { %914 = vst [vmem:[%s1725_s29 + $0xa0] sm:$0xff] %v719_v60  ;;  %v977_v62 = vadd.f32 %v976_v58, %v719_v60  ;;  %v1047_v0 = vmul.f32 %v719_v60, %v719_v60  ;;  %v1109_v2 = vadd.f32 %v1108_v56, %v1046_v55  ;;  %v1476_v3 = vpop.f32.mrb[22].mxu0  ;;  %v1835_v45 = vpop.f32.mrb[20].mxu1 }
 0x111   : > { %917 = vst [vmem:[%s1725_s29 + $0xb8] sm:$0xff] %v1476_v3  ;;  %v722_v5 = vpop.f32.mrb[23].mxu0  ;;  %v1050_v15 = vmul.f32 %v1476_v3, %v1476_v3  ;;  %948 = vst [vmem:[%s1725_s29 + $0x1b0] sm:$0xff] %v1835_v45  ;;  %v1840_v49 = vpop.f32.mrb[21].mxu1 }
 0x112   : > { %v1110_v9 = vadd.f32 %v1109_v2, %v1047_v0  ;;  %915 = vst [vmem:[%s1725_s29 + $0xa8] sm:$0xff] %v722_v5  ;;  %v978_v10 = vadd.f32 %v977_v62, %v722_v5  ;;  %v1048_v11 = vmul.f32 %v722_v5, %v722_v5  ;;  %946 = vst [vmem:[%s1725_s29 + $0x1a0] sm:$0xff] %v1840_v49  ;;  %v1845_v54 = vpop.f32.mrb[22].mxu1 }
 0x113   : > { %949 = vst [vmem:[%s1725_s29 + $0x1b8] sm:$0xff] %v1845_v54  ;;  %v1850_v56 = vpop.f32.mrb[23].mxu1 }
 0x114   : > { %v979_v13 = vadd.f32 %v1475_v57, %v978_v10  ;;  %v1111_v14 = vadd.f32 %v1110_v9, %v1048_v11  ;;  %947 = vst [vmem:[%s1725_s29 + $0x1a8] sm:$0xff] %v1850_v56  ;;  %v1059_v10 = vmul.f32 %v1740_v1, %v1740_v1 }
 0x116   : > { %v1112_v16 = vadd.f32 %v1111_v14, %v1049_v12  ;;  %v1479_v17 = vpop.f32.mrb[24].mxu0  ;;  %v980_v18 = vadd.f32 %v1476_v3, %v979_v13 }
 0x117   : > { %920 = vst [vmem:[%s1725_s29 + $0xd0] sm:$0xff] %v1479_v17  ;;  %v735_v22 = vpop.f32.mrb[25].mxu0  ;;  %v1053_v36 = vmul.f32 %v1479_v17, %v1479_v17 }
 0x118   : > { %918 = vst [vmem:[%s1725_s29 + $0xc0] sm:$0xff] %v735_v22  ;;  %v981_v24 = vadd.f32 %v980_v18, %v735_v22  ;;  %v1051_v25 = vmul.f32 %v735_v22, %v735_v22  ;;  %v1113_v27 = vadd.f32 %v1112_v16, %v1050_v15  ;;  %v1480_v29 = vpop.f32.mrb[26].mxu0  ;;  %v1857_v11 = vpop.f32.mrb[24].mxu1  ;;  %v1060_v22 = vmul.f32 %v1750_v8, %v1750_v8 }
 0x119   : > { %921 = vst [vmem:[%s1725_s29 + $0xd8] sm:$0xff] %v1480_v29  ;;  %v738_v31 = vpop.f32.mrb[27].mxu0  ;;  %v1054_v40 = vmul.f32 %v1480_v29, %v1480_v29  ;;  %952 = vst [vmem:[%s1725_s29 + $0x1d0] sm:$0xff] %v1857_v11  ;;  %v1861_v12 = vpop.f32.mrb[25].mxu1 }
 0x11a   : > { %v1114_v33 = vadd.f32 %v1113_v27, %v1051_v25  ;;  %919 = vst [vmem:[%s1725_s29 + $0xc8] sm:$0xff] %v738_v31  ;;  %v982_v34 = vadd.f32 %v981_v24, %v738_v31  ;;  %v1052_v35 = vmul.f32 %v738_v31, %v738_v31  ;;  %950 = vst [vmem:[%s1725_s29 + $0x1c0] sm:$0xff] %v1861_v12  ;;  %v1866_v15 = vpop.f32.mrb[26].mxu1 }
 0x11b   : > { %953 = vst [vmem:[%s1725_s29 + $0x1d8] sm:$0xff] %v1866_v15  ;;  %v1870_v16 = vpop.f32.mrb[27].mxu1  ;;  %v1062_v27 = vmul.f32 %v1745_v6, %v1745_v6 }
 0x11c   : > { %v983_v37 = vadd.f32 %v1479_v17, %v982_v34  ;;  %v1115_v38 = vadd.f32 %v1114_v33, %v1052_v35  ;;  %951 = vst [vmem:[%s1725_s29 + $0x1c8] sm:$0xff] %v1870_v16  ;;  %v1063_v33 = vmul.f32 %v1760_v21, %v1760_v21 }
 0x11e   : > { %v1116_v42 = vadd.f32 %v1115_v38, %v1053_v36  ;;  %v1483_v43 = vpop.f32.mrb[28].mxu0  ;;  %v984_v44 = vadd.f32 %v1480_v29, %v983_v37 }
 0x11f   : > { %924 = vst [vmem:[%s1725_s29 + $0xf0] sm:$0xff] %v1483_v43  ;;  %v751_v47 = vpop.f32.mrb[29].mxu0  ;;  %v1057_v62 = vmul.f32 %v1483_v43, %v1483_v43 }
 0x120   : > { %922 = vst [vmem:[%s1725_s29 + $0xe0] sm:$0xff] %v751_v47  ;;  %v985_v50 = vadd.f32 %v984_v44, %v751_v47  ;;  %v1055_v51 = vmul.f32 %v751_v47, %v751_v47  ;;  %v1117_v52 = vadd.f32 %v1116_v42, %v1054_v40  ;;  %v1484_v53 = vpop.f32.mrb[30].mxu0  ;;  %v1064_v40 = vmul.f32 %v1770_v28, %v1770_v28 }
 0x121   : > { %925 = vst [vmem:[%s1725_s29 + $0xf8] sm:$0xff] %v1484_v53  ;;  %v754_v55 = vpop.f32.mrb[31].mxu0  ;;  %v1058_v3 = vmul.f32 %v1484_v53, %v1484_v53  ;;  %v1066_v44 = vmul.f32 %v1765_v26, %v1765_v26 }
 0x122   : > { %v1118_v57 = vadd.f32 %v1117_v52, %v1055_v51  ;;  %923 = vst [vmem:[%s1725_s29 + $0xe8] sm:$0xff] %v754_v55  ;;  %v986_v58 = vadd.f32 %v985_v50, %v754_v55  ;;  %v1056_v60 = vmul.f32 %v754_v55, %v754_v55  ;;  %v1067_v51 = vmul.f32 %v1780_v41, %v1780_v41 }
 0x124   : > { %v987_v0 = vadd.f32 %v1483_v43, %v986_v58  ;;  %v1119_v2 = vadd.f32 %v1118_v57, %v1056_v60  ;;  %v1068_v57 = vmul.f32 %v1790_v48, %v1790_v48 }
 0x126   : > { %v1120_v5 = vadd.f32 %v1119_v2, %v1057_v62  ;;  %v988_v9 = vadd.f32 %v1484_v53, %v987_v0 }
 0x128   : > { %v989_v13 = vadd.f32 %v988_v9, %v1740_v1  ;;  %v1121_v14 = vadd.f32 %v1120_v5, %v1058_v3  ;;  %v1061_v1 = vmul.f32 %v1735_v63, %v1735_v63  ;;  %v1072_v9 = vmul.f32 %v1810_v7, %v1810_v7 }
 0x12a   : > { %v1122_v17 = vadd.f32 %v1121_v14, %v1059_v10  ;;  %v990_v18 = vadd.f32 %v989_v13, %v1750_v8  ;;  %v1885_v8 = vpop.f32.mrb[28].mxu1 }
 0x12b   : > { %956 = vst [vmem:[%s1725_s29 + $0x1f0] sm:$0xff] %v1885_v8  ;;  %v1889_v34 = vpop.f32.mrb[29].mxu1 }
 0x12c   : > { %v991_v24 = vadd.f32 %v1735_v63, %v990_v18  ;;  %v1123_v25 = vadd.f32 %v1122_v17, %v1060_v22  ;;  %954 = vst [vmem:[%s1725_s29 + $0x1e0] sm:$0xff] %v1889_v34  ;;  %v1894_v36 = vpop.f32.mrb[30].mxu1 }
 0x12d   : > { %957 = vst [vmem:[%s1725_s29 + $0x1f8] sm:$0xff] %v1894_v36  ;;  %v1898_v37 = vpop.f32.mrb[31].mxu1 }
 0x12e   : > { %v1124_v29 = vadd.f32 %v1123_v25, %v1061_v1  ;;  %v992_v31 = vadd.f32 %v1745_v6, %v991_v24  ;;  %955 = vst [vmem:[%s1725_s29 + $0x1e8] sm:$0xff] %v1898_v37  ;;  %v1076_v24 = vmul.f32 %v1830_v32, %v1830_v32 }
 0x130   : > { %v993_v35 = vadd.f32 %v992_v31, %v1760_v21  ;;  %v1125_v63 = vadd.f32 %v1124_v29, %v1062_v27  ;;  %v1065_v21 = vmul.f32 %v1755_v19, %v1755_v19 }
 0x132   : > { %v1126_v6 = vadd.f32 %v1125_v63, %v1063_v33  ;;  %v994_v38 = vadd.f32 %v993_v35, %v1770_v28 }
 0x134   : > { %v995_v42 = vadd.f32 %v1755_v19, %v994_v38  ;;  %v1127_v43 = vadd.f32 %v1126_v6, %v1064_v40  ;;  %v1069_v19 = vmul.f32 %v1775_v39, %v1775_v39  ;;  %v1080_v6 = vmul.f32 %v1850_v56, %v1850_v56 }
 0x136   : > { %v1128_v47 = vadd.f32 %v1127_v43, %v1065_v21  ;;  %v996_v50 = vadd.f32 %v1765_v26, %v995_v42  ;;  %v1070_v26 = vmul.f32 %v1785_v46, %v1785_v46 }
 0x138   : > { %v997_v52 = vadd.f32 %v996_v50, %v1780_v41  ;;  %v1129_v28 = vadd.f32 %v1128_v47, %v1066_v44  ;;  %v1071_v41 = vmul.f32 %v1800_v61, %v1800_v61  ;;  %v1084_v50 = vmul.f32 %v1870_v16, %v1870_v16 }
 0x13a   : > { %v1130_v53 = vadd.f32 %v1129_v28, %v1067_v51  ;;  %v998_v55 = vadd.f32 %v997_v52, %v1790_v48 }
 0x13c   : > { %v999_v58 = vadd.f32 %v1775_v39, %v998_v55  ;;  %v1131_v60 = vadd.f32 %v1130_v53, %v1068_v57  ;;  %v1073_v39 = vmul.f32 %v1795_v59, %v1795_v59  ;;  %v1087_v53 = vmul.f32 %v1889_v34, %v1889_v34 }
 0x13e   : > { %v1132_v62 = vadd.f32 %v1131_v60, %v1069_v19  ;;  %v1000_v0 = vadd.f32 %v1785_v46, %v999_v58  ;;  %v1074_v46 = vmul.f32 %v1805_v4, %v1805_v4  ;;  %v1089_v58 = vmul.f32 %v1885_v8, %v1885_v8 }
 0x140   : > { %v1001_v2 = vadd.f32 %v1000_v0, %v1800_v61  ;;  %v1133_v3 = vadd.f32 %v1132_v62, %v1070_v26  ;;  %v1075_v61 = vmul.f32 %v1820_v23, %v1820_v23 }
 0x142   : > { %v1134_v5 = vadd.f32 %v1133_v3, %v1071_v41  ;;  %v1002_v48 = vadd.f32 %v1001_v2, %v1810_v7  ;;  %v1160_v2 = vlaneseq }
 0x144   : > { %v1003_v10 = vadd.f32 %v1795_v59, %v1002_v48  ;;  %v1135_v13 = vadd.f32 %v1134_v5, %v1072_v9  ;;  %v1077_v59 = vmul.f32 %v1815_v20, %v1815_v20  ;;  %v1161_v9 = vshrl.u32 %v1160_v2, 7 }
 0x146   : > { %v1136_v14 = vadd.f32 %v1135_v13, %v1073_v39  ;;  %v1004_v17 = vadd.f32 %v1805_v4, %v1003_v10  ;;  %v1078_v4 = vmul.f32 %v1825_v30, %v1825_v30  ;;  %vm1162_vm1 = vcmp.eq.s32.totalorder %v1161_v9, 0 }
 0x148   : > { %v1005_v18 = vadd.f32 %v1004_v17, %v1820_v23  ;;  %v1137_v22 = vadd.f32 %v1136_v14, %v1074_v46  ;;  %v1079_v23 = vmul.f32 %v1840_v49, %v1840_v49 }
 0x14a   : > { %v1138_v1 = vadd.f32 %v1137_v22, %v1075_v61  ;;  %v1006_v7 = vadd.f32 %v1005_v18, %v1830_v32 }
 0x14c   : > { %v1007_v25 = vadd.f32 %v1815_v20, %v1006_v7  ;;  %v1139_v27 = vadd.f32 %v1138_v1, %v1076_v24  ;;  %v1081_v20 = vmul.f32 %v1835_v45, %v1835_v45 }
 0x14e   : > { %v1140_v29 = vadd.f32 %v1139_v27, %v1077_v59  ;;  %v1008_v31 = vadd.f32 %v1825_v30, %v1007_v25  ;;  %v1082_v30 = vmul.f32 %v1845_v54, %v1845_v54 }
 0x150   : > { %v1009_v33 = vadd.f32 %v1008_v31, %v1840_v49  ;;  %v1141_v35 = vadd.f32 %v1140_v29, %v1078_v4  ;;  %v1083_v49 = vmul.f32 %v1861_v12, %v1861_v12 }
 0x152   : > { %v1142_v63 = vadd.f32 %v1141_v35, %v1079_v23  ;;  %v1010_v32 = vadd.f32 %v1009_v33, %v1850_v56 }
 0x154   : > { %v1011_v38 = vadd.f32 %v1835_v45, %v1010_v32  ;;  %v1143_v40 = vadd.f32 %v1142_v63, %v1080_v6  ;;  %v1085_v45 = vmul.f32 %v1857_v11, %v1857_v11 }
 0x156   : > { %v1144_v21 = vadd.f32 %v1143_v40, %v1081_v20  ;;  %v1012_v42 = vadd.f32 %v1845_v54, %v1011_v38  ;;  %v1086_v54 = vmul.f32 %v1866_v15, %v1866_v15 }
 0x158   : > { %v1013_v43 = vadd.f32 %v1012_v42, %v1861_v12  ;;  %v1145_v44 = vadd.f32 %v1144_v21, %v1082_v30 }
 0x15a   : > { %v1146_v47 = vadd.f32 %v1145_v44, %v1083_v49  ;;  %v1014_v56 = vadd.f32 %v1013_v43, %v1870_v16 }
 0x15c   : > { %v1015_v51 = vadd.f32 %v1857_v11, %v1014_v56  ;;  %v1147_v52 = vadd.f32 %v1146_v47, %v1084_v50  ;;  %v1088_v11 = vmul.f32 %v1898_v37, %v1898_v37 }
 0x15e   : > { %v1148_v28 = vadd.f32 %v1147_v52, %v1085_v45  ;;  %v1016_v12 = vadd.f32 %v1866_v15, %v1015_v51  ;;  %v1090_v15 = vmul.f32 %v1894_v36, %v1894_v36 }
 0x160   : > { %v1017_v55 = vadd.f32 %v1016_v12, %v1889_v34  ;;  %v1149_v57 = vadd.f32 %v1148_v28, %v1086_v54 }
 0x162   : > { %v1150_v16 = vadd.f32 %v1149_v57, %v1087_v53  ;;  %v1018_v19 = vadd.f32 %v1017_v55, %v1898_v37 }
 0x164   : > { %v1019_v60 = vadd.f32 %v1885_v8, %v1018_v19  ;;  %v1151_v26 = vadd.f32 %v1150_v16, %v1088_v11 }
 0x166   : > { %v1020_v62 = vadd.f32 %v1894_v36, %v1019_v60  ;;  %v1152_v34 = vadd.f32 %v1151_v26, %v1089_v58 }
 0x168   : > { %v1021_v0 = vrot.slane %v1020_v62, 4  ;;  %v1153_v41 = vadd.f32 %v1152_v34, %v1090_v15 }
 0x16a   : > { %v1022_v3 = vadd.f32 %v1021_v0, %v1020_v62  ;;  %v1154_v5 = vrot.slane %v1153_v41, 4 }
 0x16c   : > { %v1023_v37 = vrot.slane %v1022_v3, 2  ;;  %v1155_v48 = vadd.f32 %v1154_v5, %v1153_v41 }
 0x16e   : > { %v1024_v39 = vadd.f32 %v1023_v37, %v1022_v3  ;;  %v1156_v10 = vrot.slane %v1155_v48, 2 }
 0x170   : > { %v1025_v8 = vrot.slane %v1024_v39, 1  ;;  %v1157_v13 = vadd.f32 %v1156_v10, %v1155_v48 }
 0x172   : > { %v1026_v36 = vadd.f32 %v1025_v8, %v1024_v39  ;;  %v1158_v46 = vrot.slane %v1157_v13, 1 }
 0x174   : > { %v1159_v14 = vadd.f32 %v1158_v46, %v1157_v13  ;;  %v1163_v17 = vsel %vm1162_vm1, %v1026_v36, 0.0 }
 0x175   : > { %1164 = vst [vmem:[%s267_s7] sm:$0xff] %v1163_v17 }
 0x176   : > { %v1165_v61 = vsel %vm1162_vm1, %v1159_v14, 0.0 }
 0x177   : > { %1166 = vst [vmem:[%s274_s10] sm:$0xff] %v1165_v61 }
 0x178 PF: > { %s15_s17 = sadd.s32 1, %s1598_s17   ;;  %s2005_s15 = smov %s1594_s16 }
 0x179   : > { %p12_p6 = scmp.ge.s32.totalorder %s15_s17, 6   ;;  %s2006_s16 = smov %s2008_s18 }
 0x17b   :  { %14 = sbr.rel (!%p12_p6) target bundleno = 2 (0x2), region = 85 }

// kernel: cond_cnn_discriminator_forward.11
= control target key start
LH: loop header
LB: loop body
LE: loop exit
PB: predicated region body
PF: predicated region fallthrough
CT: control target
= control target key end

     0   :  { %s2095_s15 = smov 0   ;;  %s2097_s16 = smov 0   ;;  %s2339_s0 = inlined_call_operand.vmem [shape: bf16[512,512], index: 0, kind: input, shape index: {}]   ;;  %s2340_s1 = inlined_call_operand.vmem [shape: bf16[512,128], index: 1, kind: input, shape index: {}]   ;;  %s2341_s2 = inlined_call_operand.vmem [shape: f32[512,128], index: 2, kind: output, shape index: {0}]   ;;  %s2342_s3 = inlined_call_operand.vmem [shape: f32[2,8,128], index: 3, kind: output, shape index: {1}]   ;;  %s2343_s4 = inlined_call_operand.vmem [shape: f32[2,8,128], index: 4, kind: output, shape index: {2}]  }
   0x1   :  { %s2099_s17 = smov 0  }
   0x2 LB: > { %s27_s18 = sadd.s32 1, %s2064_s16  ;;  %p1563_p0 = scmp.ge.s32.totalorder %s2068_s17, 1  ;;  %s2068_s17 = sphi %s2099_s17, %s15_s17   ;;  %s2064_s16 = sphi %s2097_s16, %s2345_s16   ;;  %s2060_s15 = sphi %s2095_s15, %s2344_s15  }
   0x3   : > { %p29_p1 = scmp.ge.s32.totalorder %s27_s18, 2  ;;  %p196_p2 = scmp.lt.s32.totalorder %s2068_s17, 3 }
   0x5   : > { %s2347_s18 = smov (%p29_p1, %s27_s18), 0  ;;  %p197_p3 = pnand %p1563_p0, %p196_p2 }
   0x6   : > { %v1918_v0 = vld [vmem:[%s2340_s1 + $0x40] sm:$0xff] (!%p197_p3)   ;;  %v1922_v4 = vld [vmem:[%s2340_s1 + $0x48] sm:$0xff] (!%p197_p3)   ;;  %v1926_v8 = vld [vmem:[%s2340_s1 + $0x50] sm:$0xff] (!%p197_p3)   ;;  %s1564_s29 = sshll.u32 (!%p197_p3), %s2060_s15, 5  ;;  %p264_p5 = scmp.lt.s32.totalorder (!%p197_p3), %s2060_s15, 1 }
   0x7   : > { %200 = sbr.rel (%p197_p3) target bundleno = 398 (0x18e), region = 28  ;;  %v1919_v1 = vld [vmem:[%s2340_s1 + $0xc0] sm:$0xff] (!%p197_p3)   ;;  %1670 = vmatprep.subr.bf16.mxu0 (!%p197_p3), %v1918_v0  ;;  %v1923_v5 = vld [vmem:[%s2340_s1 + $0xc8] sm:$0xff] (!%p197_p3)   ;;  %v1927_v9 = vld [vmem:[%s2340_s1 + $0xd0] sm:$0xff] (!%p197_p3)   ;;  %p245_p4 = scmp.lt.s32.totalorder (!%p197_p3), %s1564_s29, 63 }
   0x8   : > { %v1920_v2 = vld [vmem:[%s2340_s1] sm:$0xff] (!%p197_p3)   ;;  %1782 = vmatprep.subr.bf16.mxu1 (!%p197_p3), %v1919_v1  ;;  %v1924_v6 = vld [vmem:[%s2340_s1 + $0x8] sm:$0xff] (!%p197_p3)   ;;  %v1928_v10 = vld [vmem:[%s2340_s1 + $0x10] sm:$0xff] (!%p197_p3)  }
   0x9   : > { %v1921_v3 = vld [vmem:[%s2340_s1 + $0x80] sm:$0xff] (!%p197_p3)   ;;  %1671 = vmatpush3.bf16.msra.mxu0 (!%p197_p3), %v1920_v2  ;;  %v1925_v7 = vld [vmem:[%s2340_s1 + $0x88] sm:$0xff] (!%p197_p3)   ;;  %v1929_v11 = vld [vmem:[%s2340_s1 + $0x90] sm:$0xff] (!%p197_p3)  }
   0xa   : > { %1783 = vmatpush3.bf16.msra.mxu1 (!%p197_p3), %v1921_v3  ;;  %1672 = vmatprep.subr.bf16.mxu0 (!%p197_p3), %v1922_v4  ;;  %v1930_v12 = vld [vmem:[%s2340_s1 + $0x58] sm:$0xff] (!%p197_p3)   ;;  %v1934_v16 = vld [vmem:[%s2340_s1 + $0x60] sm:$0xff] (!%p197_p3)   ;;  %v1938_v20 = vld [vmem:[%s2340_s1 + $0x68] sm:$0xff] (!%p197_p3)  }
   0xb   : > { %1784 = vmatprep.subr.bf16.mxu1 (!%p197_p3), %v1923_v5  ;;  %v1931_v13 = vld [vmem:[%s2340_s1 + $0xd8] sm:$0xff] (!%p197_p3)   ;;  %v1935_v17 = vld [vmem:[%s2340_s1 + $0xe0] sm:$0xff] (!%p197_p3)   ;;  %v1939_v21 = vld [vmem:[%s2340_s1 + $0xe8] sm:$0xff] (!%p197_p3)  }
   0xc   : > { %v1932_v14 = vld [vmem:[%s2340_s1 + $0x18] sm:$0xff] (!%p197_p3)   ;;  %v1936_v18 = vld [vmem:[%s2340_s1 + $0x20] sm:$0xff] (!%p197_p3)   ;;  %v1940_v22 = vld [vmem:[%s2340_s1 + $0x28] sm:$0xff] (!%p197_p3)  }
   0xd   : > { %1673 = vmatpush3.bf16.msra.mxu0 (!%p197_p3), %v1924_v6  ;;  %v1933_v15 = vld [vmem:[%s2340_s1 + $0x98] sm:$0xff] (!%p197_p3)   ;;  %v1937_v19 = vld [vmem:[%s2340_s1 + $0xa0] sm:$0xff] (!%p197_p3)   ;;  %v1941_v23 = vld [vmem:[%s2340_s1 + $0xa8] sm:$0xff] (!%p197_p3)  }
   0xe   : > { %1785 = vmatpush3.bf16.msra.mxu1 %v1925_v7  ;;  %1674 = vmatprep.subr.bf16.mxu0 %v1926_v8  ;;  %s2349_s29 = smov (!%p245_p4, %s1564_s29), 63  ;;  %v1942_v24 = vld [vmem:[%s2340_s1 + $0x70] sm:$0xff]   ;;  %v1946_v28 = vld [vmem:[%s2340_s1 + $0x78] sm:$0xff]   ;;  %s2351_s15 = smov (!%p264_p5, %s2060_s15), 1 }
   0xf   : > { %1786 = vmatprep.subr.bf16.mxu1 %v1927_v9  ;;  %v1943_v25 = vld [vmem:[%s2340_s1 + $0xf0] sm:$0xff]   ;;  %s1669_s5 = sshll.u32 %s2349_s29, 4  ;;  %v1947_v29 = vld [vmem:[%s2340_s1 + $0xf8] sm:$0xff]   ;;  %s1568_s23 = sshll.u32 %s2349_s29, 3 }
  0x10   : > { %v1944_v26 = vld [vmem:[%s2340_s1 + $0x30] sm:$0xff]   ;;  %s2212_s14 = scalar_lea.vmem %s2339_s0, %s1669_s5  ;;  %v1948_v30 = vld [vmem:[%s2340_s1 + $0x38] sm:$0xff]   ;;  %s2288_s26 = scalar_lea.vmem %s2341_s2, %s1568_s23 }
  0x11   : > { %1675 = vmatpush3.bf16.msra.mxu0 %v1928_v10  ;;  %v1945_v27 = vld [vmem:[%s2340_s1 + $0xb0] sm:$0xff]   ;;  %v1949_v31 = vld [vmem:[%s2340_s1 + $0xb8] sm:$0xff]   ;;  %s1569_s29 = sshll.u32 %s2351_s15, 3 }
  0x12   : > { %1787 = vmatpush3.bf16.msra.mxu1 %v1929_v11  ;;  %1676 = vmatprep.subr.bf16.mxu0 %v1930_v12  ;;  %v1950_v32 = vld [vmem:[%s2212_s14] ss:$16 sps:$4 sm:$0xff]   ;;  %v1952_v33 = vld [vmem:[%s2212_s14 + $0x4] ss:$16 sps:$4 sm:$0xff]   ;;  %v1953_v34 = vld [vmem:[%s2212_s14 + $0x8] ss:$16 sps:$4 sm:$0xff]   ;;  %s270_s30 = scalar_lea.vmem %s2342_s3, %s1569_s29  ;;  %s277_s7 = scalar_lea.vmem %s2343_s4, %s1569_s29 }
  0x13   : > { %1788 = vmatprep.subr.bf16.mxu1 %v1931_v13  ;;  %v1955_v35 = vld [vmem:[%s2212_s14 + $0xc] ss:$16 sps:$4 sm:$0xff]   ;;  %951 = vmatprep.mubr.bf16.mxu0 %v1952_v33  ;;  %v1956_v36 = vld [vmem:[%s2212_s14 + $0x24] ss:$16 sps:$4 sm:$0xff]   ;;  %v1960_v38 = vld [vmem:[%s2212_s14 + $0x20] ss:$16 sps:$4 sm:$0xff]  }
  0x14   : > { %1112 = vmatprep.mubr.bf16.mxu1 %v1955_v35  ;;  %v1958_v37 = vld [vmem:[%s2212_s14 + $0x2c] ss:$16 sps:$4 sm:$0xff]   ;;  %v1961_v39 = vld [vmem:[%s2212_s14 + $0x28] ss:$16 sps:$4 sm:$0xff]   ;;  %v1962_v40 = vld [vmem:[%s2212_s14 + $0x44] ss:$16 sps:$4 sm:$0xff]  }
  0x15   : > { %1677 = vmatpush3.bf16.msra.mxu0 %v1932_v14  ;;  %v1964_v41 = vld [vmem:[%s2212_s14 + $0x4c] ss:$16 sps:$4 sm:$0xff]   ;;  %v1966_v42 = vld [vmem:[%s2212_s14 + $0x40] ss:$16 sps:$4 sm:$0xff]   ;;  %v1967_v43 = vld [vmem:[%s2212_s14 + $0x48] ss:$16 sps:$4 sm:$0xff]  }
  0x16   : > { %1789 = vmatpush3.bf16.msra.mxu1 %v1933_v15  ;;  %1678 = vmatprep.subr.bf16.mxu0 %v1934_v16  ;;  %v1968_v44 = vld [vmem:[%s2212_s14 + $0x64] ss:$16 sps:$4 sm:$0xff]   ;;  %v1970_v45 = vld [vmem:[%s2212_s14 + $0x6c] ss:$16 sps:$4 sm:$0xff]   ;;  %v1972_v46 = vld [vmem:[%s2212_s14 + $0x60] ss:$16 sps:$4 sm:$0xff]  }
  0x17   : > { %1790 = vmatprep.subr.bf16.mxu1 %v1935_v17  ;;  %v1973_v47 = vld [vmem:[%s2212_s14 + $0x68] ss:$16 sps:$4 sm:$0xff]   ;;  %v1974_v48 = vld [vmem:[%s2212_s14 + $0x84] ss:$16 sps:$4 sm:$0xff]   ;;  %v1976_v49 = vld [vmem:[%s2212_s14 + $0x8c] ss:$16 sps:$4 sm:$0xff]  }
  0x18   : > { %v1978_v50 = vld [vmem:[%s2212_s14 + $0x80] ss:$16 sps:$4 sm:$0xff]   ;;  %v1979_v51 = vld [vmem:[%s2212_s14 + $0x88] ss:$16 sps:$4 sm:$0xff]   ;;  %v1980_v52 = vld [vmem:[%s2212_s14 + $0xa4] ss:$16 sps:$4 sm:$0xff]  }
  0x19   : > { %1679 = vmatpush3.bf16.msra.mxu0 %v1936_v18  ;;  %v1982_v53 = vld [vmem:[%s2212_s14 + $0xac] ss:$16 sps:$4 sm:$0xff]   ;;  %v1984_v54 = vld [vmem:[%s2212_s14 + $0xa0] ss:$16 sps:$4 sm:$0xff]   ;;  %v1985_v55 = vld [vmem:[%s2212_s14 + $0xa8] ss:$16 sps:$4 sm:$0xff]  }
  0x1a   : > { %1791 = vmatpush3.bf16.msra.mxu1 %v1937_v19  ;;  %1680 = vmatprep.subr.bf16.mxu0 %v1938_v20  ;;  %v1986_v56 = vld [vmem:[%s2212_s14 + $0xc4] ss:$16 sps:$4 sm:$0xff]   ;;  %v1988_v57 = vld [vmem:[%s2212_s14 + $0xcc] ss:$16 sps:$4 sm:$0xff]   ;;  %v1990_v58 = vld [vmem:[%s2212_s14 + $0xc0] ss:$16 sps:$4 sm:$0xff]  }
  0x1b   : > { %1792 = vmatprep.subr.bf16.mxu1 %v1939_v21  ;;  %v1991_v59 = vld [vmem:[%s2212_s14 + $0xc8] ss:$16 sps:$4 sm:$0xff]   ;;  %v1992_v60 = vld [vmem:[%s2212_s14 + $0xe4] ss:$16 sps:$4 sm:$0xff]   ;;  %v1994_v61 = vld [vmem:[%s2212_s14 + $0xec] ss:$16 sps:$4 sm:$0xff]  }
  0x1c   : > { %v1996_v62 = vld [vmem:[%s2212_s14 + $0xe0] ss:$16 sps:$4 sm:$0xff]   ;;  %v1997_v63 = vld [vmem:[%s2212_s14 + $0xe8] ss:$16 sps:$4 sm:$0xff]   ;;  %v1998_v0 = vld [vmem:[%s2212_s14 + $0x104] ss:$16 sps:$4 sm:$0xff]  }
  0x1d   : > { %1681 = vmatpush3.bf16.msra.mxu0 %v1940_v22  ;;  %v2000_v1 = vld [vmem:[%s2212_s14 + $0x10c] ss:$16 sps:$4 sm:$0xff]   ;;  %v2002_v2 = vld [vmem:[%s2212_s14 + $0x100] ss:$16 sps:$4 sm:$0xff]   ;;  %v2003_v3 = vld [vmem:[%s2212_s14 + $0x108] ss:$16 sps:$4 sm:$0xff]  }
  0x1e   : > { %1793 = vmatpush3.bf16.msra.mxu1 %v1941_v23  ;;  %1682 = vmatprep.subr.bf16.mxu0 %v1942_v24  ;;  %v2004_v4 = vld [vmem:[%s2212_s14 + $0x124] ss:$16 sps:$4 sm:$0xff]   ;;  %v2006_v5 = vld [vmem:[%s2212_s14 + $0x12c] ss:$16 sps:$4 sm:$0xff]   ;;  %v2008_v6 = vld [vmem:[%s2212_s14 + $0x120] ss:$16 sps:$4 sm:$0xff]  }
  0x1f   : > { %1794 = vmatprep.subr.bf16.mxu1 %v1943_v25  ;;  %v2009_v7 = vld [vmem:[%s2212_s14 + $0x128] ss:$16 sps:$4 sm:$0xff]   ;;  %v2010_v8 = vld [vmem:[%s2212_s14 + $0x144] ss:$16 sps:$4 sm:$0xff]   ;;  %v2012_v9 = vld [vmem:[%s2212_s14 + $0x14c] ss:$16 sps:$4 sm:$0xff]  }
  0x20   : > { %v2014_v10 = vld [vmem:[%s2212_s14 + $0x140] ss:$16 sps:$4 sm:$0xff]   ;;  %v2015_v11 = vld [vmem:[%s2212_s14 + $0x148] ss:$16 sps:$4 sm:$0xff]   ;;  %v2016_v12 = vld [vmem:[%s2212_s14 + $0x164] ss:$16 sps:$4 sm:$0xff]  }
  0x21   : > { %1683 = vmatpush3.bf16.msra.mxu0 %v1944_v26  ;;  %v2018_v13 = vld [vmem:[%s2212_s14 + $0x16c] ss:$16 sps:$4 sm:$0xff]   ;;  %v2020_v14 = vld [vmem:[%s2212_s14 + $0x160] ss:$16 sps:$4 sm:$0xff]   ;;  %v2021_v15 = vld [vmem:[%s2212_s14 + $0x168] ss:$16 sps:$4 sm:$0xff]  }
  0x22   : > { %1795 = vmatpush3.bf16.msra.mxu1 %v1945_v27  ;;  %1684 = vmatprep.subr.bf16.mxu0 %v1946_v28  ;;  %v2022_v16 = vld [vmem:[%s2212_s14 + $0x184] ss:$16 sps:$4 sm:$0xff]   ;;  %v2024_v17 = vld [vmem:[%s2212_s14 + $0x18c] ss:$16 sps:$4 sm:$0xff]   ;;  %v2026_v18 = vld [vmem:[%s2212_s14 + $0x180] ss:$16 sps:$4 sm:$0xff]  }
  0x23   : > { %1796 = vmatprep.subr.bf16.mxu1 %v1947_v29  ;;  %v2027_v19 = vld [vmem:[%s2212_s14 + $0x188] ss:$16 sps:$4 sm:$0xff]   ;;  %v2028_v20 = vld [vmem:[%s2212_s14 + $0x1a4] ss:$16 sps:$4 sm:$0xff]   ;;  %v2030_v21 = vld [vmem:[%s2212_s14 + $0x1ac] ss:$16 sps:$4 sm:$0xff]  }
  0x24   : > { %v2032_v22 = vld [vmem:[%s2212_s14 + $0x1a0] ss:$16 sps:$4 sm:$0xff]   ;;  %v2033_v23 = vld [vmem:[%s2212_s14 + $0x1a8] ss:$16 sps:$4 sm:$0xff]   ;;  %v2034_v24 = vld [vmem:[%s2212_s14 + $0x1c4] ss:$16 sps:$4 sm:$0xff]  }
  0x25   : > { %1685 = vmatpush3.bf16.msra.mxu0 %v1948_v30  ;;  %v2036_v25 = vld [vmem:[%s2212_s14 + $0x1cc] ss:$16 sps:$4 sm:$0xff]   ;;  %v2038_v26 = vld [vmem:[%s2212_s14 + $0x1c0] ss:$16 sps:$4 sm:$0xff]   ;;  %v2039_v27 = vld [vmem:[%s2212_s14 + $0x1c8] ss:$16 sps:$4 sm:$0xff]  }
  0x26   : > { %1797 = vmatpush3.bf16.msra.mxu1 %v1949_v31  ;;  %v2040_v28 = vld [vmem:[%s2212_s14 + $0x1e4] ss:$16 sps:$4 sm:$0xff]   ;;  %v2042_v29 = vld [vmem:[%s2212_s14 + $0x1ec] ss:$16 sps:$4 sm:$0xff]   ;;  %v2044_v30 = vld [vmem:[%s2212_s14 + $0x1e0] ss:$16 sps:$4 sm:$0xff]  }
  0x27   : > { %v2045_v31 = vld [vmem:[%s2212_s14 + $0x1e8] ss:$16 sps:$4 sm:$0xff]  }
  0x28   : > { %952 = vmatmul.mubr.bf16.vlgmr.msra.gmra.mrb[0].mxu0 %v1950_v32 }
  0x29   : > { %1113 = vmatmul.mubr.bf16.vlgmr.msra.gmra.mrb[0].mxu1 %v1953_v34  ;;  %959 = vmatprep.mubr.bf16.mxu0 %v1956_v36 }
  0x2a   : > { %1120 = vmatprep.mubr.bf16.mxu1 %v1958_v37 }
  0x30   : > { %960 = vmatmul.mubr.bf16.gmra.mrb[4].mxu0 %v1960_v38 }
  0x31   : > { %1121 = vmatmul.mubr.bf16.gmra.mrb[4].mxu1 %v1961_v39  ;;  %967 = vmatprep.mubr.bf16.mxu0 %v1962_v40 }
  0x32   : > { %1128 = vmatprep.mubr.bf16.mxu1 %v1964_v41 }
  0x38   : > { %968 = vmatmul.mubr.bf16.gmra.mrb[8].mxu0 %v1966_v42 }
  0x39   : > { %1129 = vmatmul.mubr.bf16.gmra.mrb[8].mxu1 %v1967_v43  ;;  %975 = vmatprep.mubr.bf16.mxu0 %v1968_v44 }
  0x3a   : > { %1136 = vmatprep.mubr.bf16.mxu1 %v1970_v45 }
  0x40   : > { %976 = vmatmul.mubr.bf16.gmra.mrb[12].mxu0 %v1972_v46 }
  0x41   : > { %1137 = vmatmul.mubr.bf16.gmra.mrb[12].mxu1 %v1973_v47  ;;  %983 = vmatprep.mubr.bf16.mxu0 %v1974_v48 }
  0x42   : > { %1144 = vmatprep.mubr.bf16.mxu1 %v1976_v49 }
  0x48   : > { %984 = vmatmul.mubr.bf16.gmra.mrb[16].mxu0 %v1978_v50 }
  0x49   : > { %1145 = vmatmul.mubr.bf16.gmra.mrb[16].mxu1 %v1979_v51  ;;  %991 = vmatprep.mubr.bf16.mxu0 %v1980_v52 }
  0x4a   : > { %1152 = vmatprep.mubr.bf16.mxu1 %v1982_v53 }
  0x50   : > { %992 = vmatmul.mubr.bf16.gmra.mrb[20].mxu0 %v1984_v54 }
  0x51   : > { %1153 = vmatmul.mubr.bf16.gmra.mrb[20].mxu1 %v1985_v55  ;;  %999 = vmatprep.mubr.bf16.mxu0 %v1986_v56 }
  0x52   : > { %1160 = vmatprep.mubr.bf16.mxu1 %v1988_v57 }
  0x58   : > { %1000 = vmatmul.mubr.bf16.gmra.mrb[24].mxu0 %v1990_v58 }
  0x59   : > { %1161 = vmatmul.mubr.bf16.gmra.mrb[24].mxu1 %v1991_v59  ;;  %1007 = vmatprep.mubr.bf16.mxu0 %v1992_v60 }
  0x5a   : > { %1168 = vmatprep.mubr.bf16.mxu1 %v1994_v61 }
  0x60   : > { %1008 = vmatmul.mubr.bf16.gmra.mrb[28].mxu0 %v1996_v62 }
  0x61   : > { %1169 = vmatmul.mubr.bf16.gmra.mrb[28].mxu1 %v1997_v63  ;;  %1015 = vmatprep.mubr.bf16.mxu0 %v1998_v0 }
  0x62   : > { %1176 = vmatprep.mubr.bf16.mxu1 %v2000_v1 }
  0x68   : > { %1016 = vmatmul.mubr.bf16.gmra.mrb[32].mxu0 %v2002_v2 }
  0x69   : > { %1177 = vmatmul.mubr.bf16.gmra.mrb[32].mxu1 %v2003_v3  ;;  %1023 = vmatprep.mubr.bf16.mxu0 %v2004_v4 }
  0x6a   : > { %1184 = vmatprep.mubr.bf16.mxu1 %v2006_v5 }
  0x70   : > { %1024 = vmatmul.mubr.bf16.gmra.mrb[36].mxu0 %v2008_v6 }
  0x71   : > { %1185 = vmatmul.mubr.bf16.gmra.mrb[36].mxu1 %v2009_v7  ;;  %1031 = vmatprep.mubr.bf16.mxu0 %v2010_v8 }
  0x72   : > { %1192 = vmatprep.mubr.bf16.mxu1 %v2012_v9 }
  0x78   : > { %1032 = vmatmul.mubr.bf16.gmra.mrb[40].mxu0 %v2014_v10 }
  0x79   : > { %1193 = vmatmul.mubr.bf16.gmra.mrb[40].mxu1 %v2015_v11  ;;  %1039 = vmatprep.mubr.bf16.mxu0 %v2016_v12 }
  0x7a   : > { %1200 = vmatprep.mubr.bf16.mxu1 %v2018_v13 }
  0x80   : > { %1040 = vmatmul.mubr.bf16.gmra.mrb[44].mxu0 %v2020_v14 }
  0x81   : > { %1201 = vmatmul.mubr.bf16.gmra.mrb[44].mxu1 %v2021_v15  ;;  %1047 = vmatprep.mubr.bf16.mxu0 %v2022_v16 }
  0x82   : > { %1208 = vmatprep.mubr.bf16.mxu1 %v2024_v17 }
  0x88   : > { %1048 = vmatmul.mubr.bf16.gmra.mrb[48].mxu0 %v2026_v18 }
  0x89   : > { %1209 = vmatmul.mubr.bf16.gmra.mrb[48].mxu1 %v2027_v19  ;;  %1055 = vmatprep.mubr.bf16.mxu0 %v2028_v20 }
  0x8a   : > { %1216 = vmatprep.mubr.bf16.mxu1 %v2030_v21 }
  0x90   : > { %1056 = vmatmul.mubr.bf16.gmra.mrb[52].mxu0 %v2032_v22 }
  0x91   : > { %1217 = vmatmul.mubr.bf16.gmra.mrb[52].mxu1 %v2033_v23  ;;  %1063 = vmatprep.mubr.bf16.mxu0 %v2034_v24 }
  0x92   : > { %1224 = vmatprep.mubr.bf16.mxu1 %v2036_v25 }
  0x98   : > { %1064 = vmatmul.mubr.bf16.gmra.mrb[56].mxu0 %v2038_v26 }
  0x99   : > { %1225 = vmatmul.mubr.bf16.gmra.mrb[56].mxu1 %v2039_v27  ;;  %1071 = vmatprep.mubr.bf16.mxu0 %v2040_v28 }
  0x9a   : > { %1232 = vmatprep.mubr.bf16.mxu1 %v2042_v29 }
  0xa0   : > { %1072 = vmatmul.mubr.bf16.gmra.mrb[60].mxu0 %v2044_v30 }
  0xa1   : > { %1233 = vmatmul.mubr.bf16.gmra.mrb[60].mxu1 %v2045_v31 }
  0xfb   : > { %v1686_v32 = vpop.f32.mrb[0].mxu0 }
  0xfc   : > { %v1798_v33 = vpop.f32.mrb[0].mxu1  ;;  %v1687_v34 = vpop.f32.mrb[1].mxu0 }
  0xfd   : > { %v1688_v35 = vadd.f32 %v1687_v34, %v1686_v32  ;;  %v1799_v36 = vpop.f32.mrb[1].mxu1  ;;  %v1689_v37 = vpop.f32.mrb[2].mxu0 }
  0xfe   : > { %v1800_v38 = vadd.f32 %v1799_v36, %v1798_v33  ;;  %v1801_v39 = vpop.f32.mrb[2].mxu1  ;;  %v1690_v40 = vpop.f32.mrb[3].mxu0 }
  0xff   : > { %v1691_v41 = vadd.f32 %v1690_v40, %v1689_v37  ;;  %v1802_v42 = vpop.f32.mrb[3].mxu1 }
 0x100   : > { %v1115_v43 = vadd.f32 %v1800_v38, %v1688_v35  ;;  %v1803_v44 = vadd.f32 %v1802_v42, %v1801_v39 }
 0x102   : > { %1241 = vst [vmem:[%s2288_s26] sm:$0xff] %v1115_v43  ;;  %v1118_v45 = vadd.f32 %v1803_v44, %v1691_v41  ;;  %v1310_v47 = vmul.f32 %v1115_v43, %v1115_v43 }
 0x103   : > { %v1692_v46 = vpop.f32.mrb[4].mxu0 }
 0x104   : > { %1242 = vst [vmem:[%s2288_s26 + $0x8] sm:$0xff] %v1118_v45  ;;  %v1273_v48 = vadd.f32 %v1118_v45, %v1115_v43  ;;  %v1311_v49 = vmul.f32 %v1118_v45, %v1118_v45  ;;  %v1804_v50 = vpop.f32.mrb[4].mxu1  ;;  %v1693_v51 = vpop.f32.mrb[5].mxu0 }
 0x105   : > { %v1694_v52 = vadd.f32 %v1693_v51, %v1692_v46  ;;  %v1805_v53 = vpop.f32.mrb[5].mxu1  ;;  %v1695_v54 = vpop.f32.mrb[6].mxu0 }
 0x106   : > { %v1342_v55 = vadd.f32 %v1311_v49, %v1310_v47  ;;  %v1806_v56 = vadd.f32 %v1805_v53, %v1804_v50  ;;  %v1807_v57 = vpop.f32.mrb[6].mxu1  ;;  %v1696_v58 = vpop.f32.mrb[7].mxu0 }
 0x107   : > { %v1697_v59 = vadd.f32 %v1696_v58, %v1695_v54  ;;  %v1808_v60 = vpop.f32.mrb[7].mxu1 }
 0x108   : > { %v1123_v61 = vadd.f32 %v1806_v56, %v1694_v52  ;;  %v1809_v62 = vadd.f32 %v1808_v60, %v1807_v57 }
 0x10a   : > { %1243 = vst [vmem:[%s2288_s26 + $0x10] sm:$0xff] %v1123_v61  ;;  %v1274_v63 = vadd.f32 %v1273_v48, %v1123_v61  ;;  %v1312_v0 = vmul.f32 %v1123_v61, %v1123_v61  ;;  %v1126_v1 = vadd.f32 %v1809_v62, %v1697_v59 }
 0x10b   : > { %v1698_v2 = vpop.f32.mrb[8].mxu0 }
 0x10c   : > { %v1343_v3 = vadd.f32 %v1342_v55, %v1312_v0  ;;  %1244 = vst [vmem:[%s2288_s26 + $0x18] sm:$0xff] %v1126_v1  ;;  %v1275_v4 = vadd.f32 %v1274_v63, %v1126_v1  ;;  %v1313_v5 = vmul.f32 %v1126_v1, %v1126_v1  ;;  %v1810_v6 = vpop.f32.mrb[8].mxu1  ;;  %v1699_v7 = vpop.f32.mrb[9].mxu0 }
 0x10d   : > { %v1700_v8 = vadd.f32 %v1699_v7, %v1698_v2  ;;  %v1811_v9 = vpop.f32.mrb[9].mxu1  ;;  %v1701_v10 = vpop.f32.mrb[10].mxu0 }
 0x10e   : > { %v1344_v11 = vadd.f32 %v1343_v3, %v1313_v5  ;;  %v1812_v12 = vadd.f32 %v1811_v9, %v1810_v6  ;;  %v1813_v13 = vpop.f32.mrb[10].mxu1  ;;  %v1702_v14 = vpop.f32.mrb[11].mxu0 }
 0x10f   : > { %v1703_v15 = vadd.f32 %v1702_v14, %v1701_v10  ;;  %v1814_v16 = vpop.f32.mrb[11].mxu1 }
 0x110   : > { %v1131_v17 = vadd.f32 %v1812_v12, %v1700_v8  ;;  %v1815_v18 = vadd.f32 %v1814_v16, %v1813_v13 }
 0x112   : > { %1245 = vst [vmem:[%s2288_s26 + $0x20] sm:$0xff] %v1131_v17  ;;  %v1276_v19 = vadd.f32 %v1275_v4, %v1131_v17  ;;  %v1314_v20 = vmul.f32 %v1131_v17, %v1131_v17  ;;  %v1134_v21 = vadd.f32 %v1815_v18, %v1703_v15 }
 0x113   : > { %v1704_v22 = vpop.f32.mrb[12].mxu0 }
 0x114   : > { %v1345_v23 = vadd.f32 %v1344_v11, %v1314_v20  ;;  %1246 = vst [vmem:[%s2288_s26 + $0x28] sm:$0xff] %v1134_v21  ;;  %v1277_v24 = vadd.f32 %v1276_v19, %v1134_v21  ;;  %v1315_v25 = vmul.f32 %v1134_v21, %v1134_v21  ;;  %v1816_v26 = vpop.f32.mrb[12].mxu1  ;;  %v1705_v27 = vpop.f32.mrb[13].mxu0 }
 0x115   : > { %v1706_v28 = vadd.f32 %v1705_v27, %v1704_v22  ;;  %v1817_v29 = vpop.f32.mrb[13].mxu1  ;;  %v1707_v30 = vpop.f32.mrb[14].mxu0 }
 0x116   : > { %v1346_v31 = vadd.f32 %v1345_v23, %v1315_v25  ;;  %v1818_v32 = vadd.f32 %v1817_v29, %v1816_v26  ;;  %v1819_v33 = vpop.f32.mrb[14].mxu1  ;;  %v1708_v34 = vpop.f32.mrb[15].mxu0 }
 0x117   : > { %v1709_v35 = vadd.f32 %v1708_v34, %v1707_v30  ;;  %v1820_v36 = vpop.f32.mrb[15].mxu1 }
 0x118   : > { %v1139_v37 = vadd.f32 %v1818_v32, %v1706_v28  ;;  %v1821_v38 = vadd.f32 %v1820_v36, %v1819_v33 }
 0x11a   : > { %1247 = vst [vmem:[%s2288_s26 + $0x30] sm:$0xff] %v1139_v37  ;;  %v1278_v39 = vadd.f32 %v1277_v24, %v1139_v37  ;;  %v1316_v40 = vmul.f32 %v1139_v37, %v1139_v37  ;;  %v1142_v41 = vadd.f32 %v1821_v38, %v1709_v35 }
 0x11b   : > { %v1710_v42 = vpop.f32.mrb[16].mxu0 }
 0x11c   : > { %v1347_v43 = vadd.f32 %v1346_v31, %v1316_v40  ;;  %1248 = vst [vmem:[%s2288_s26 + $0x38] sm:$0xff] %v1142_v41  ;;  %v1279_v44 = vadd.f32 %v1278_v39, %v1142_v41  ;;  %v1317_v45 = vmul.f32 %v1142_v41, %v1142_v41  ;;  %v1822_v46 = vpop.f32.mrb[16].mxu1  ;;  %v1711_v47 = vpop.f32.mrb[17].mxu0 }
 0x11d   : > { %v1712_v48 = vadd.f32 %v1711_v47, %v1710_v42  ;;  %v1823_v49 = vpop.f32.mrb[17].mxu1  ;;  %v1713_v50 = vpop.f32.mrb[18].mxu0 }
 0x11e   : > { %v1348_v51 = vadd.f32 %v1347_v43, %v1317_v45  ;;  %v1824_v52 = vadd.f32 %v1823_v49, %v1822_v46  ;;  %v1825_v53 = vpop.f32.mrb[18].mxu1  ;;  %v1714_v54 = vpop.f32.mrb[19].mxu0 }
 0x11f   : > { %v1715_v55 = vadd.f32 %v1714_v54, %v1713_v50  ;;  %v1826_v56 = vpop.f32.mrb[19].mxu1 }
 0x120   : > { %v1147_v57 = vadd.f32 %v1824_v52, %v1712_v48  ;;  %v1827_v58 = vadd.f32 %v1826_v56, %v1825_v53 }
 0x122   : > { %1249 = vst [vmem:[%s2288_s26 + $0x40] sm:$0xff] %v1147_v57  ;;  %v1280_v59 = vadd.f32 %v1279_v44, %v1147_v57  ;;  %v1318_v60 = vmul.f32 %v1147_v57, %v1147_v57  ;;  %v1150_v61 = vadd.f32 %v1827_v58, %v1715_v55 }
 0x123   : > { %v1716_v62 = vpop.f32.mrb[20].mxu0 }
 0x124   : > { %v1349_v63 = vadd.f32 %v1348_v51, %v1318_v60  ;;  %1250 = vst [vmem:[%s2288_s26 + $0x48] sm:$0xff] %v1150_v61  ;;  %v1281_v0 = vadd.f32 %v1280_v59, %v1150_v61  ;;  %v1319_v1 = vmul.f32 %v1150_v61, %v1150_v61  ;;  %v1828_v2 = vpop.f32.mrb[20].mxu1  ;;  %v1717_v3 = vpop.f32.mrb[21].mxu0 }
 0x125   : > { %v1718_v4 = vadd.f32 %v1717_v3, %v1716_v62  ;;  %v1829_v5 = vpop.f32.mrb[21].mxu1  ;;  %v1719_v6 = vpop.f32.mrb[22].mxu0 }
 0x126   : > { %v1350_v7 = vadd.f32 %v1349_v63, %v1319_v1  ;;  %v1830_v8 = vadd.f32 %v1829_v5, %v1828_v2  ;;  %v1831_v9 = vpop.f32.mrb[22].mxu1  ;;  %v1720_v10 = vpop.f32.mrb[23].mxu0 }
 0x127   : > { %v1721_v11 = vadd.f32 %v1720_v10, %v1719_v6  ;;  %v1832_v12 = vpop.f32.mrb[23].mxu1 }
 0x128   : > { %v1155_v13 = vadd.f32 %v1830_v8, %v1718_v4  ;;  %v1833_v14 = vadd.f32 %v1832_v12, %v1831_v9 }
 0x12a   : > { %1251 = vst [vmem:[%s2288_s26 + $0x50] sm:$0xff] %v1155_v13  ;;  %v1282_v15 = vadd.f32 %v1281_v0, %v1155_v13  ;;  %v1320_v16 = vmul.f32 %v1155_v13, %v1155_v13  ;;  %v1158_v17 = vadd.f32 %v1833_v14, %v1721_v11 }
 0x12b   : > { %v1722_v18 = vpop.f32.mrb[24].mxu0 }
 0x12c   : > { %v1351_v19 = vadd.f32 %v1350_v7, %v1320_v16  ;;  %1252 = vst [vmem:[%s2288_s26 + $0x58] sm:$0xff] %v1158_v17  ;;  %v1283_v20 = vadd.f32 %v1282_v15, %v1158_v17  ;;  %v1321_v21 = vmul.f32 %v1158_v17, %v1158_v17  ;;  %v1834_v22 = vpop.f32.mrb[24].mxu1  ;;  %v1723_v23 = vpop.f32.mrb[25].mxu0 }
 0x12d   : > { %v1724_v24 = vadd.f32 %v1723_v23, %v1722_v18  ;;  %v1835_v25 = vpop.f32.mrb[25].mxu1  ;;  %v1725_v26 = vpop.f32.mrb[26].mxu0 }
 0x12e   : > { %v1352_v27 = vadd.f32 %v1351_v19, %v1321_v21  ;;  %v1836_v28 = vadd.f32 %v1835_v25, %v1834_v22  ;;  %v1837_v29 = vpop.f32.mrb[26].mxu1  ;;  %v1726_v30 = vpop.f32.mrb[27].mxu0 }
 0x12f   : > { %v1727_v31 = vadd.f32 %v1726_v30, %v1725_v26  ;;  %v1838_v32 = vpop.f32.mrb[27].mxu1 }
 0x130   : > { %v1163_v33 = vadd.f32 %v1836_v28, %v1724_v24  ;;  %v1839_v34 = vadd.f32 %v1838_v32, %v1837_v29 }
 0x132   : > { %1253 = vst [vmem:[%s2288_s26 + $0x60] sm:$0xff] %v1163_v33  ;;  %v1284_v35 = vadd.f32 %v1283_v20, %v1163_v33  ;;  %v1322_v36 = vmul.f32 %v1163_v33, %v1163_v33  ;;  %v1166_v37 = vadd.f32 %v1839_v34, %v1727_v31 }
 0x133   : > { %v1728_v38 = vpop.f32.mrb[28].mxu0 }
 0x134   : > { %v1353_v39 = vadd.f32 %v1352_v27, %v1322_v36  ;;  %1254 = vst [vmem:[%s2288_s26 + $0x68] sm:$0xff] %v1166_v37  ;;  %v1285_v40 = vadd.f32 %v1284_v35, %v1166_v37  ;;  %v1323_v41 = vmul.f32 %v1166_v37, %v1166_v37  ;;  %v1840_v42 = vpop.f32.mrb[28].mxu1  ;;  %v1729_v43 = vpop.f32.mrb[29].mxu0 }
 0x135   : > { %v1730_v44 = vadd.f32 %v1729_v43, %v1728_v38  ;;  %v1841_v45 = vpop.f32.mrb[29].mxu1  ;;  %v1731_v46 = vpop.f32.mrb[30].mxu0 }
 0x136   : > { %v1354_v47 = vadd.f32 %v1353_v39, %v1323_v41  ;;  %v1842_v48 = vadd.f32 %v1841_v45, %v1840_v42  ;;  %v1843_v49 = vpop.f32.mrb[30].mxu1  ;;  %v1732_v50 = vpop.f32.mrb[31].mxu0 }
 0x137   : > { %v1733_v51 = vadd.f32 %v1732_v50, %v1731_v46  ;;  %v1844_v52 = vpop.f32.mrb[31].mxu1 }
 0x138   : > { %v1171_v53 = vadd.f32 %v1842_v48, %v1730_v44  ;;  %v1845_v54 = vadd.f32 %v1844_v52, %v1843_v49 }
 0x13a   : > { %1255 = vst [vmem:[%s2288_s26 + $0x70] sm:$0xff] %v1171_v53  ;;  %v1286_v55 = vadd.f32 %v1285_v40, %v1171_v53  ;;  %v1324_v56 = vmul.f32 %v1171_v53, %v1171_v53  ;;  %v1174_v57 = vadd.f32 %v1845_v54, %v1733_v51 }
 0x13b   : > { %v1734_v58 = vpop.f32.mrb[32].mxu0 }
 0x13c   : > { %v1355_v59 = vadd.f32 %v1354_v47, %v1324_v56  ;;  %1256 = vst [vmem:[%s2288_s26 + $0x78] sm:$0xff] %v1174_v57  ;;  %v1287_v60 = vadd.f32 %v1286_v55, %v1174_v57  ;;  %v1325_v61 = vmul.f32 %v1174_v57, %v1174_v57  ;;  %v1846_v62 = vpop.f32.mrb[32].mxu1  ;;  %v1735_v63 = vpop.f32.mrb[33].mxu0 }
 0x13d   : > { %v1736_v0 = vadd.f32 %v1735_v63, %v1734_v58  ;;  %v1847_v1 = vpop.f32.mrb[33].mxu1  ;;  %v1737_v2 = vpop.f32.mrb[34].mxu0 }
 0x13e   : > { %v1356_v3 = vadd.f32 %v1355_v59, %v1325_v61  ;;  %v1848_v4 = vadd.f32 %v1847_v1, %v1846_v62  ;;  %v1849_v5 = vpop.f32.mrb[34].mxu1  ;;  %v1738_v6 = vpop.f32.mrb[35].mxu0 }
 0x13f   : > { %v1739_v7 = vadd.f32 %v1738_v6, %v1737_v2  ;;  %v1850_v8 = vpop.f32.mrb[35].mxu1 }
 0x140   : > { %v1179_v9 = vadd.f32 %v1848_v4, %v1736_v0  ;;  %v1851_v10 = vadd.f32 %v1850_v8, %v1849_v5 }
 0x142   : > { %1257 = vst [vmem:[%s2288_s26 + $0x80] sm:$0xff] %v1179_v9  ;;  %v1288_v11 = vadd.f32 %v1287_v60, %v1179_v9  ;;  %v1326_v12 = vmul.f32 %v1179_v9, %v1179_v9  ;;  %v1182_v13 = vadd.f32 %v1851_v10, %v1739_v7 }
 0x143   : > { %v1740_v14 = vpop.f32.mrb[36].mxu0 }
 0x144   : > { %v1357_v15 = vadd.f32 %v1356_v3, %v1326_v12  ;;  %1258 = vst [vmem:[%s2288_s26 + $0x88] sm:$0xff] %v1182_v13  ;;  %v1289_v16 = vadd.f32 %v1288_v11, %v1182_v13  ;;  %v1327_v17 = vmul.f32 %v1182_v13, %v1182_v13  ;;  %v1852_v18 = vpop.f32.mrb[36].mxu1  ;;  %v1741_v19 = vpop.f32.mrb[37].mxu0 }
 0x145   : > { %v1742_v20 = vadd.f32 %v1741_v19, %v1740_v14  ;;  %v1853_v21 = vpop.f32.mrb[37].mxu1  ;;  %v1743_v22 = vpop.f32.mrb[38].mxu0 }
 0x146   : > { %v1358_v23 = vadd.f32 %v1357_v15, %v1327_v17  ;;  %v1854_v24 = vadd.f32 %v1853_v21, %v1852_v18  ;;  %v1855_v25 = vpop.f32.mrb[38].mxu1  ;;  %v1744_v26 = vpop.f32.mrb[39].mxu0 }
 0x147   : > { %v1745_v27 = vadd.f32 %v1744_v26, %v1743_v22  ;;  %v1856_v28 = vpop.f32.mrb[39].mxu1 }
 0x148   : > { %v1187_v29 = vadd.f32 %v1854_v24, %v1742_v20  ;;  %v1857_v30 = vadd.f32 %v1856_v28, %v1855_v25 }
 0x14a   : > { %1259 = vst [vmem:[%s2288_s26 + $0x90] sm:$0xff] %v1187_v29  ;;  %v1290_v31 = vadd.f32 %v1289_v16, %v1187_v29  ;;  %v1328_v32 = vmul.f32 %v1187_v29, %v1187_v29  ;;  %v1190_v33 = vadd.f32 %v1857_v30, %v1745_v27 }
 0x14b   : > { %v1746_v34 = vpop.f32.mrb[40].mxu0 }
 0x14c   : > { %v1359_v35 = vadd.f32 %v1358_v23, %v1328_v32  ;;  %1260 = vst [vmem:[%s2288_s26 + $0x98] sm:$0xff] %v1190_v33  ;;  %v1291_v36 = vadd.f32 %v1290_v31, %v1190_v33  ;;  %v1329_v37 = vmul.f32 %v1190_v33, %v1190_v33  ;;  %v1858_v38 = vpop.f32.mrb[40].mxu1  ;;  %v1747_v39 = vpop.f32.mrb[41].mxu0 }
 0x14d   : > { %v1748_v40 = vadd.f32 %v1747_v39, %v1746_v34  ;;  %v1859_v41 = vpop.f32.mrb[41].mxu1  ;;  %v1749_v42 = vpop.f32.mrb[42].mxu0 }
 0x14e   : > { %v1360_v43 = vadd.f32 %v1359_v35, %v1329_v37  ;;  %v1860_v44 = vadd.f32 %v1859_v41, %v1858_v38  ;;  %v1861_v45 = vpop.f32.mrb[42].mxu1  ;;  %v1750_v46 = vpop.f32.mrb[43].mxu0 }
 0x14f   : > { %v1751_v47 = vadd.f32 %v1750_v46, %v1749_v42  ;;  %v1862_v48 = vpop.f32.mrb[43].mxu1 }
 0x150   : > { %v1195_v49 = vadd.f32 %v1860_v44, %v1748_v40  ;;  %v1863_v50 = vadd.f32 %v1862_v48, %v1861_v45 }
 0x152   : > { %1261 = vst [vmem:[%s2288_s26 + $0xa0] sm:$0xff] %v1195_v49  ;;  %v1292_v51 = vadd.f32 %v1291_v36, %v1195_v49  ;;  %v1330_v52 = vmul.f32 %v1195_v49, %v1195_v49  ;;  %v1198_v53 = vadd.f32 %v1863_v50, %v1751_v47 }
 0x153   : > { %v1752_v54 = vpop.f32.mrb[44].mxu0 }
 0x154   : > { %v1361_v55 = vadd.f32 %v1360_v43, %v1330_v52  ;;  %1262 = vst [vmem:[%s2288_s26 + $0xa8] sm:$0xff] %v1198_v53  ;;  %v1293_v56 = vadd.f32 %v1292_v51, %v1198_v53  ;;  %v1331_v57 = vmul.f32 %v1198_v53, %v1198_v53  ;;  %v1864_v58 = vpop.f32.mrb[44].mxu1  ;;  %v1753_v59 = vpop.f32.mrb[45].mxu0 }
 0x155   : > { %v1754_v60 = vadd.f32 %v1753_v59, %v1752_v54  ;;  %v1865_v61 = vpop.f32.mrb[45].mxu1  ;;  %v1755_v62 = vpop.f32.mrb[46].mxu0 }
 0x156   : > { %v1362_v63 = vadd.f32 %v1361_v55, %v1331_v57  ;;  %v1866_v0 = vadd.f32 %v1865_v61, %v1864_v58  ;;  %v1867_v1 = vpop.f32.mrb[46].mxu1  ;;  %v1756_v2 = vpop.f32.mrb[47].mxu0 }
 0x157   : > { %v1757_v3 = vadd.f32 %v1756_v2, %v1755_v62  ;;  %v1868_v4 = vpop.f32.mrb[47].mxu1 }
 0x158   : > { %v1203_v5 = vadd.f32 %v1866_v0, %v1754_v60  ;;  %v1869_v6 = vadd.f32 %v1868_v4, %v1867_v1 }
 0x15a   : > { %1263 = vst [vmem:[%s2288_s26 + $0xb0] sm:$0xff] %v1203_v5  ;;  %v1294_v7 = vadd.f32 %v1293_v56, %v1203_v5  ;;  %v1332_v8 = vmul.f32 %v1203_v5, %v1203_v5  ;;  %v1206_v9 = vadd.f32 %v1869_v6, %v1757_v3 }
 0x15b   : > { %v1758_v10 = vpop.f32.mrb[48].mxu0 }
 0x15c   : > { %v1363_v11 = vadd.f32 %v1362_v63, %v1332_v8  ;;  %1264 = vst [vmem:[%s2288_s26 + $0xb8] sm:$0xff] %v1206_v9  ;;  %v1295_v12 = vadd.f32 %v1294_v7, %v1206_v9  ;;  %v1333_v13 = vmul.f32 %v1206_v9, %v1206_v9  ;;  %v1870_v14 = vpop.f32.mrb[48].mxu1  ;;  %v1759_v15 = vpop.f32.mrb[49].mxu0 }
 0x15d   : > { %v1760_v16 = vadd.f32 %v1759_v15, %v1758_v10  ;;  %v1871_v17 = vpop.f32.mrb[49].mxu1  ;;  %v1761_v18 = vpop.f32.mrb[50].mxu0 }
 0x15e   : > { %v1364_v19 = vadd.f32 %v1363_v11, %v1333_v13  ;;  %v1872_v20 = vadd.f32 %v1871_v17, %v1870_v14  ;;  %v1873_v21 = vpop.f32.mrb[50].mxu1  ;;  %v1762_v22 = vpop.f32.mrb[51].mxu0 }
 0x15f   : > { %v1763_v23 = vadd.f32 %v1762_v22, %v1761_v18  ;;  %v1874_v24 = vpop.f32.mrb[51].mxu1 }
 0x160   : > { %v1211_v25 = vadd.f32 %v1872_v20, %v1760_v16  ;;  %v1875_v26 = vadd.f32 %v1874_v24, %v1873_v21 }
 0x162   : > { %1265 = vst [vmem:[%s2288_s26 + $0xc0] sm:$0xff] %v1211_v25  ;;  %v1296_v27 = vadd.f32 %v1295_v12, %v1211_v25  ;;  %v1334_v28 = vmul.f32 %v1211_v25, %v1211_v25  ;;  %v1214_v29 = vadd.f32 %v1875_v26, %v1763_v23 }
 0x163   : > { %v1764_v30 = vpop.f32.mrb[52].mxu0 }
 0x164   : > { %v1365_v31 = vadd.f32 %v1364_v19, %v1334_v28  ;;  %1266 = vst [vmem:[%s2288_s26 + $0xc8] sm:$0xff] %v1214_v29  ;;  %v1297_v32 = vadd.f32 %v1296_v27, %v1214_v29  ;;  %v1335_v33 = vmul.f32 %v1214_v29, %v1214_v29  ;;  %v1876_v34 = vpop.f32.mrb[52].mxu1  ;;  %v1765_v35 = vpop.f32.mrb[53].mxu0 }
 0x165   : > { %v1766_v36 = vadd.f32 %v1765_v35, %v1764_v30  ;;  %v1877_v37 = vpop.f32.mrb[53].mxu1  ;;  %v1767_v38 = vpop.f32.mrb[54].mxu0 }
 0x166   : > { %v1366_v39 = vadd.f32 %v1365_v31, %v1335_v33  ;;  %v1878_v40 = vadd.f32 %v1877_v37, %v1876_v34  ;;  %v1879_v41 = vpop.f32.mrb[54].mxu1  ;;  %v1768_v42 = vpop.f32.mrb[55].mxu0  ;;  %v1379_v31 = vlaneseq }
 0x167   : > { %v1769_v43 = vadd.f32 %v1768_v42, %v1767_v38  ;;  %v1880_v44 = vpop.f32.mrb[55].mxu1 }
 0x168   : > { %v1219_v45 = vadd.f32 %v1878_v40, %v1766_v36  ;;  %v1881_v46 = vadd.f32 %v1880_v44, %v1879_v41  ;;  %v1380_v36 = vshrl.u32 %v1379_v31, 7 }
 0x16a   : > { %1267 = vst [vmem:[%s2288_s26 + $0xd0] sm:$0xff] %v1219_v45  ;;  %v1298_v47 = vadd.f32 %v1297_v32, %v1219_v45  ;;  %v1336_v48 = vmul.f32 %v1219_v45, %v1219_v45  ;;  %v1222_v49 = vadd.f32 %v1881_v46, %v1769_v43  ;;  %vm1381_vm0 = vcmp.eq.s32.totalorder %v1380_v36, 0 }
 0x16b   : > { %v1770_v50 = vpop.f32.mrb[56].mxu0 }
 0x16c   : > { %v1367_v51 = vadd.f32 %v1366_v39, %v1336_v48  ;;  %1268 = vst [vmem:[%s2288_s26 + $0xd8] sm:$0xff] %v1222_v49  ;;  %v1299_v52 = vadd.f32 %v1298_v47, %v1222_v49  ;;  %v1337_v53 = vmul.f32 %v1222_v49, %v1222_v49  ;;  %v1882_v54 = vpop.f32.mrb[56].mxu1  ;;  %v1771_v55 = vpop.f32.mrb[57].mxu0 }
 0x16d   : > { %v1772_v56 = vadd.f32 %v1771_v55, %v1770_v50  ;;  %v1883_v57 = vpop.f32.mrb[57].mxu1  ;;  %v1773_v58 = vpop.f32.mrb[58].mxu0 }
 0x16e   : > { %v1368_v59 = vadd.f32 %v1367_v51, %v1337_v53  ;;  %v1884_v60 = vadd.f32 %v1883_v57, %v1882_v54  ;;  %v1885_v61 = vpop.f32.mrb[58].mxu1  ;;  %v1774_v62 = vpop.f32.mrb[59].mxu0 }
 0x16f   : > { %v1775_v63 = vadd.f32 %v1774_v62, %v1773_v58  ;;  %v1886_v0 = vpop.f32.mrb[59].mxu1 }
 0x170   : > { %v1227_v1 = vadd.f32 %v1884_v60, %v1772_v56  ;;  %v1887_v2 = vadd.f32 %v1886_v0, %v1885_v61 }
 0x172   : > { %1269 = vst [vmem:[%s2288_s26 + $0xe0] sm:$0xff] %v1227_v1  ;;  %v1300_v3 = vadd.f32 %v1299_v52, %v1227_v1  ;;  %v1338_v4 = vmul.f32 %v1227_v1, %v1227_v1  ;;  %v1230_v5 = vadd.f32 %v1887_v2, %v1775_v63 }
 0x173   : > { %v1776_v6 = vpop.f32.mrb[60].mxu0 }
 0x174   : > { %v1369_v7 = vadd.f32 %v1368_v59, %v1338_v4  ;;  %1270 = vst [vmem:[%s2288_s26 + $0xe8] sm:$0xff] %v1230_v5  ;;  %v1301_v8 = vadd.f32 %v1300_v3, %v1230_v5  ;;  %v1339_v9 = vmul.f32 %v1230_v5, %v1230_v5  ;;  %v1888_v10 = vpop.f32.mrb[60].mxu1  ;;  %v1777_v11 = vpop.f32.mrb[61].mxu0 }
 0x175   : > { %v1778_v12 = vadd.f32 %v1777_v11, %v1776_v6  ;;  %v1889_v13 = vpop.f32.mrb[61].mxu1  ;;  %v1779_v14 = vpop.f32.mrb[62].mxu0 }
 0x176   : > { %v1370_v15 = vadd.f32 %v1369_v7, %v1339_v9  ;;  %v1890_v16 = vadd.f32 %v1889_v13, %v1888_v10  ;;  %v1891_v17 = vpop.f32.mrb[62].mxu1  ;;  %v1780_v18 = vpop.f32.mrb[63].mxu0 }
 0x177   : > { %v1781_v19 = vadd.f32 %v1780_v18, %v1779_v14  ;;  %v1892_v20 = vpop.f32.mrb[63].mxu1 }
 0x178   : > { %v1235_v21 = vadd.f32 %v1890_v16, %v1778_v12  ;;  %v1893_v22 = vadd.f32 %v1892_v20, %v1891_v17 }
 0x17a   : > { %1271 = vst [vmem:[%s2288_s26 + $0xf0] sm:$0xff] %v1235_v21  ;;  %v1302_v23 = vadd.f32 %v1301_v8, %v1235_v21  ;;  %v1340_v24 = vmul.f32 %v1235_v21, %v1235_v21  ;;  %v1238_v25 = vadd.f32 %v1893_v22, %v1781_v19 }
 0x17c   : > { %v1371_v26 = vadd.f32 %v1370_v15, %v1340_v24  ;;  %1272 = vst [vmem:[%s2288_s26 + $0xf8] sm:$0xff] %v1238_v25  ;;  %v1303_v27 = vadd.f32 %v1302_v23, %v1238_v25  ;;  %v1341_v28 = vmul.f32 %v1238_v25, %v1238_v25 }
 0x17e   : > { %v1304_v29 = vrot.slane %v1303_v27, 4  ;;  %v1372_v30 = vadd.f32 %v1371_v26, %v1341_v28 }
 0x180   : > { %v1305_v32 = vadd.f32 %v1304_v29, %v1303_v27  ;;  %v1373_v33 = vrot.slane %v1372_v30, 4 }
 0x182   : > { %v1306_v34 = vrot.slane %v1305_v32, 2  ;;  %v1374_v35 = vadd.f32 %v1373_v33, %v1372_v30 }
 0x184   : > { %v1307_v37 = vadd.f32 %v1306_v34, %v1305_v32  ;;  %v1375_v38 = vrot.slane %v1374_v35, 2 }
 0x186   : > { %v1308_v39 = vrot.slane %v1307_v37, 1  ;;  %v1376_v40 = vadd.f32 %v1375_v38, %v1374_v35 }
 0x188   : > { %v1309_v41 = vadd.f32 %v1308_v39, %v1307_v37  ;;  %v1377_v42 = vrot.slane %v1376_v40, 1 }
 0x18a   : > { %v1378_v43 = vadd.f32 %v1377_v42, %v1376_v40  ;;  %v1382_v44 = vsel %vm1381_vm0, %v1309_v41, 0.0 }
 0x18b   : > { %1383 = vst [vmem:[%s270_s30] sm:$0xff] %v1382_v44 }
 0x18c   : > { %v1384_v45 = vsel %vm1381_vm0, %v1378_v43, 0.0 }
 0x18d   : > { %1385 = vst [vmem:[%s277_s7] sm:$0xff] %v1384_v45 }
 0x18e PF: > { %s15_s17 = sadd.s32 1, %s2068_s17   ;;  %s2344_s15 = smov %s2064_s16 }
 0x18f   : > { %p12_p6 = scmp.ge.s32.totalorder %s15_s17, 4   ;;  %s2345_s16 = smov %s2347_s18 }
 0x191   :  { %14 = sbr.rel (!%p12_p6) target bundleno = 2 (0x2), region = 85 }

// kernel: cond_cnn_discriminator_forward.12
= control target key start
LH: loop header
LB: loop body
LE: loop exit
PB: predicated region body
PF: predicated region fallthrough
CT: control target
= control target key end

     0   :  { %s804_s12 = smov 0   ;;  %s952_s0 = inlined_call_operand.vmem [shape: f32[512,128], index: 0, kind: input, shape index: {}]   ;;  %s953_s1 = inlined_call_operand.vmem [shape: f32[1,128], index: 1, kind: input, shape index: {}]   ;;  %s954_s2 = inlined_call_operand.vmem [shape: f32[1,128], index: 2, kind: input, shape index: {}]   ;;  %s955_s3 = inlined_call_operand.vmem [shape: bf16[512,128], index: 3, kind: output, shape index: {}]  }
   0x1 LB: > { %s596_s13 = sadd.s32 4294967295, %s782_s12   ;;  %p600_p0 = scmp.ge.s32.totalorder %s782_s12, 1  ;;  %s782_s12 = sphi %s804_s12, %s13_s12  }
   0x2   : > { %p138_p1 = scmp.lt.s32.totalorder %s782_s12, 3 }
   0x4   : > { %p139_p2 = pnand %p600_p0, %p138_p1 }
   0x5   : > { %s601_s14 = sshll.u32 (!%p139_p2), %s596_s13, 5  ;;  %v818_v0 = vld [vmem:[%s953_s1] ss:$0 sm:$0xff] (!%p139_p2) }
   0x6   : > { %142 = sbr.rel (%p139_p2) target bundleno = 67 (0x43), region = 32  ;;  %p163_p3 = scmp.lt.s32.totalorder (!%p139_p2), %s601_s14, 63  ;;  %v828_v1 = vld [vmem:[%s954_s2] ss:$0 sm:$0xff] (!%p139_p2) }
   0xd   : > { %s957_s14 = smov (!%p163_p3, %s601_s14), 63 }
   0xe   : > { %s602_s15 = sshll.u32 %s957_s14, 3  ;;  %s604_s23 = sshll.u32 %s957_s14, 2 }
   0xf   : > { %s823_s20 = scalar_lea.vmem %s952_s0, %s602_s15  ;;  %s856_s26 = scalar_lea.vmem %s955_s3, %s604_s23 }
  0x10   : > { %v174_v2 = vld [vmem:[%s823_s20] sm:$0xff]  ;;  %v175_v3 = vld [vmem:[%s823_s20 + $0x8] sm:$0xff]  ;;  %v176_v4 = vld [vmem:[%s823_s20 + $0x10] sm:$0xff] }
  0x11   : > { %v213_v5 = vmul.f32 %v818_v0, %v174_v2  ;;  %v214_v6 = vmul.f32 %v818_v0, %v175_v3  ;;  %v177_v7 = vld [vmem:[%s823_s20 + $0x18] sm:$0xff]  ;;  %v215_v8 = vmul.f32 %v818_v0, %v176_v4  ;;  %v178_v9 = vld [vmem:[%s823_s20 + $0x20] sm:$0xff]  ;;  %v179_v10 = vld [vmem:[%s823_s20 + $0x28] sm:$0xff] }
  0x12   : > { %v216_v11 = vmul.f32 %v818_v0, %v177_v7  ;;  %v217_v12 = vmul.f32 %v818_v0, %v178_v9  ;;  %v218_v13 = vmul.f32 %v818_v0, %v179_v10  ;;  %v180_v14 = vld [vmem:[%s823_s20 + $0x30] sm:$0xff]  ;;  %v181_v15 = vld [vmem:[%s823_s20 + $0x38] sm:$0xff]  ;;  %v182_v30 = vld [vmem:[%s823_s20 + $0x40] sm:$0xff] }
  0x13   : > { %v252_v16 = vadd.f32 %v828_v1, %v213_v5  ;;  %v253_v17 = vadd.f32 %v828_v1, %v214_v6  ;;  %v254_v18 = vadd.f32 %v828_v1, %v215_v8  ;;  %v219_v19 = vmul.f32 %v818_v0, %v180_v14  ;;  %v183_v31 = vld [vmem:[%s823_s20 + $0x48] sm:$0xff]  ;;  %v184_v32 = vld [vmem:[%s823_s20 + $0x50] sm:$0xff]  ;;  %v185_v44 = vld [vmem:[%s823_s20 + $0x58] sm:$0xff] }
  0x14   : > { %v255_v20 = vadd.f32 %v828_v1, %v216_v11  ;;  %v256_v21 = vadd.f32 %v828_v1, %v217_v12  ;;  %v257_v22 = vadd.f32 %v828_v1, %v218_v13  ;;  %v220_v23 = vmul.f32 %v818_v0, %v181_v15  ;;  %v186_v46 = vld [vmem:[%s823_s20 + $0x60] sm:$0xff]  ;;  %v187_v56 = vld [vmem:[%s823_s20 + $0x68] sm:$0xff]  ;;  %v188_v60 = vld [vmem:[%s823_s20 + $0x70] sm:$0xff] }
  0x15   : > { %vm284_vm0 = vcmp.ge.f32.partialorder %v252_v16, 0.0  ;;  %vm285_vm1 = vcmp.ge.f32.partialorder %v253_v17, 0.0  ;;  %v316_v24 = vmul.f32 0.2, %v252_v16  ;;  %v317_v25 = vmul.f32 0.2, %v253_v17 }
  0x16   : > { %vm286_vm2 = vcmp.ge.f32.partialorder %v254_v18, 0.0  ;;  %vm287_vm3 = vcmp.ge.f32.partialorder %v255_v20, 0.0  ;;  %v318_v26 = vmul.f32 0.2, %v254_v18  ;;  %v319_v27 = vmul.f32 0.2, %v255_v20 }
  0x17   : > { %v348_v28 = vsel %vm284_vm0, %v252_v16, %v316_v24  ;;  %v349_v29 = vsel %vm285_vm1, %v253_v17, %v317_v25  ;;  %vm288_vm4 = vcmp.ge.f32.partialorder %v256_v21, 0.0  ;;  %vm289_vm5 = vcmp.ge.f32.partialorder %v257_v22, 0.0  ;;  %v189_v6 = vld [vmem:[%s823_s20 + $0x78] sm:$0xff]  ;;  %v190_v10 = vld [vmem:[%s823_s20 + $0x80] sm:$0xff] }
  0x18   : > { %v676_v33 = vpack.c.bf16 %v349_v29, %v348_v28  ;;  %v350_v34 = vsel %vm286_vm2, %v254_v18, %v318_v26  ;;  %v351_v35 = vsel %vm287_vm3, %v255_v20, %v319_v27  ;;  %v320_v36 = vmul.f32 0.2, %v256_v21  ;;  %v191_v18 = vld [vmem:[%s823_s20 + $0x88] sm:$0xff]  ;;  %v193_v26 = vld [vmem:[%s823_s20 + $0x98] sm:$0xff] }
  0x19   : > { %v681_v37 = vpack.c.bf16 %v351_v35, %v350_v34  ;;  %v321_v38 = vmul.f32 0.2, %v257_v22  ;;  %v258_v39 = vadd.f32 %v828_v1, %v219_v19  ;;  %v259_v40 = vadd.f32 %v828_v1, %v220_v23  ;;  %v192_v19 = vld [vmem:[%s823_s20 + $0x90] sm:$0xff] }
  0x1a   : > { %677 = vst [vmem:[%s856_s26] sm:$0xff] %v676_v33   ;;  %v352_v41 = vsel %vm288_vm4, %v256_v21, %v320_v36  ;;  %v221_v42 = vmul.f32 %v818_v0, %v182_v30  ;;  %v222_v43 = vmul.f32 %v818_v0, %v183_v31  ;;  %v223_v45 = vmul.f32 %v818_v0, %v184_v32  ;;  %v194_v31 = vld [vmem:[%s823_s20 + $0xa0] sm:$0xff]  ;;  %v195_v32 = vld [vmem:[%s823_s20 + $0xa8] sm:$0xff] }
  0x1b   : > { %753 = vst [vmem:[%s856_s26 + $0x8] sm:$0xff] %v681_v37   ;;  %v353_v47 = vsel %vm289_vm5, %v257_v22, %v321_v38  ;;  %vm290_vm6 = vcmp.ge.f32.partialorder %v258_v39, 0.0  ;;  %vm291_vm7 = vcmp.ge.f32.partialorder %v259_v40, 0.0  ;;  %v322_v48 = vmul.f32 0.2, %v258_v39 }
  0x1c   : > { %v686_v49 = vpack.c.bf16 %v353_v47, %v352_v41  ;;  %v323_v50 = vmul.f32 0.2, %v259_v40  ;;  %v260_v51 = vadd.f32 %v828_v1, %v221_v42  ;;  %v261_v52 = vadd.f32 %v828_v1, %v222_v43  ;;  %v196_v43 = vld [vmem:[%s823_s20 + $0xb0] sm:$0xff] }
  0x1d   : > { %v354_v53 = vsel %vm290_vm6, %v258_v39, %v322_v48  ;;  %v224_v54 = vmul.f32 %v818_v0, %v185_v44  ;;  %v262_v55 = vadd.f32 %v828_v1, %v223_v45  ;;  %v225_v57 = vmul.f32 %v818_v0, %v186_v46  ;;  %v197_v44 = vld [vmem:[%s823_s20 + $0xb8] sm:$0xff] }
  0x1e   : > { %754 = vst [vmem:[%s856_s26 + $0x10] sm:$0xff] %v686_v49   ;;  %v355_v58 = vsel %vm291_vm7, %v259_v40, %v323_v50  ;;  %vm292_vm8 = vcmp.ge.f32.partialorder %v260_v51, 0.0  ;;  %vm293_vm9 = vcmp.ge.f32.partialorder %v261_v52, 0.0  ;;  %v324_v59 = vmul.f32 0.2, %v260_v51 }
  0x1f   : > { %v691_v61 = vpack.c.bf16 %v355_v58, %v354_v53  ;;  %v325_v62 = vmul.f32 0.2, %v261_v52  ;;  %v263_v63 = vadd.f32 %v828_v1, %v224_v54  ;;  %vm294_vm10 = vcmp.ge.f32.partialorder %v262_v55, 0.0 }
  0x20   : > { %v356_v2 = vsel %vm292_vm8, %v260_v51, %v324_v59  ;;  %v326_v3 = vmul.f32 0.2, %v262_v55  ;;  %v226_v4 = vmul.f32 %v818_v0, %v187_v56  ;;  %v264_v5 = vadd.f32 %v828_v1, %v225_v57  ;;  %v199_v59 = vld [vmem:[%s823_s20 + $0xc8] sm:$0xff] }
  0x21   : > { %755 = vst [vmem:[%s856_s26 + $0x18] sm:$0xff] %v691_v61   ;;  %v357_v7 = vsel %vm293_vm9, %v261_v52, %v325_v62  ;;  %vm295_vm11 = vcmp.ge.f32.partialorder %v263_v63, 0.0  ;;  %v327_v8 = vmul.f32 0.2, %v263_v63  ;;  %v227_v9 = vmul.f32 %v818_v0, %v188_v60 }
  0x22   : > { %v696_v11 = vpack.c.bf16 %v357_v7, %v356_v2  ;;  %v358_v12 = vsel %vm294_vm10, %v262_v55, %v326_v3  ;;  %v265_v13 = vadd.f32 %v828_v1, %v226_v4  ;;  %vm296_vm12 = vcmp.ge.f32.partialorder %v264_v5, 0.0  ;;  %v198_v55 = vld [vmem:[%s823_s20 + $0xc0] sm:$0xff]  ;;  %v200_v4 = vld [vmem:[%s823_s20 + $0xd0] sm:$0xff] }
  0x23   : > { %v359_v14 = vsel %vm295_vm11, %v263_v63, %v327_v8  ;;  %v328_v15 = vmul.f32 0.2, %v264_v5  ;;  %v228_v16 = vmul.f32 %v818_v0, %v189_v6  ;;  %v266_v17 = vadd.f32 %v828_v1, %v227_v9  ;;  %v201_v9 = vld [vmem:[%s823_s20 + $0xd8] sm:$0xff] }
  0x24   : > { %756 = vst [vmem:[%s856_s26 + $0x20] sm:$0xff] %v696_v11   ;;  %v701_v20 = vpack.c.bf16 %v359_v14, %v358_v12  ;;  %vm297_vm13 = vcmp.ge.f32.partialorder %v265_v13, 0.0  ;;  %v329_v21 = vmul.f32 0.2, %v265_v13  ;;  %v229_v22 = vmul.f32 %v818_v0, %v190_v10  ;;  %v202_v10 = vld [vmem:[%s823_s20 + $0xe0] sm:$0xff]  ;;  %v203_v11 = vld [vmem:[%s823_s20 + $0xe8] sm:$0xff] }
  0x25   : > { %v360_v23 = vsel %vm296_vm12, %v264_v5, %v328_v15  ;;  %v267_v24 = vadd.f32 %v828_v1, %v228_v16  ;;  %vm298_vm14 = vcmp.ge.f32.partialorder %v266_v17, 0.0  ;;  %v330_v25 = vmul.f32 0.2, %v266_v17 }
  0x26   : > { %757 = vst [vmem:[%s856_s26 + $0x28] sm:$0xff] %v701_v20   ;;  %v361_v27 = vsel %vm297_vm13, %v265_v13, %v329_v21  ;;  %v230_v28 = vmul.f32 %v818_v0, %v191_v18  ;;  %v268_v29 = vadd.f32 %v828_v1, %v229_v22  ;;  %v231_v30 = vmul.f32 %v818_v0, %v192_v19  ;;  %v204_v22 = vld [vmem:[%s823_s20 + $0xf0] sm:$0xff] }
  0x27   : > { %v706_v33 = vpack.c.bf16 %v361_v27, %v360_v23  ;;  %vm299_vm15 = vcmp.ge.f32.partialorder %v267_v24, 0.0  ;;  %v331_v34 = vmul.f32 0.2, %v267_v24  ;;  %v362_v35 = vsel %vm298_vm14, %v266_v17, %v330_v25 }
  0x28   : > { %v269_v36 = vadd.f32 %v828_v1, %v230_v28  ;;  %vm300_vm0 = vcmp.ge.f32.partialorder %v268_v29, 0.0  ;;  %v332_v37 = vmul.f32 0.2, %v268_v29  ;;  %v232_v38 = vmul.f32 %v818_v0, %v193_v26 }
  0x29   : > { %758 = vst [vmem:[%s856_s26 + $0x30] sm:$0xff] %v706_v33   ;;  %v363_v39 = vsel %vm299_vm15, %v267_v24, %v331_v34  ;;  %v270_v40 = vadd.f32 %v828_v1, %v231_v30  ;;  %v233_v41 = vmul.f32 %v818_v0, %v194_v31  ;;  %v234_v42 = vmul.f32 %v818_v0, %v195_v32  ;;  %v205_v32 = vld [vmem:[%s823_s20 + $0xf8] sm:$0xff] }
  0x2a   : > { %v711_v45 = vpack.c.bf16 %v363_v39, %v362_v35  ;;  %vm301_vm1 = vcmp.ge.f32.partialorder %v269_v36, 0.0  ;;  %v333_v46 = vmul.f32 0.2, %v269_v36  ;;  %v364_v47 = vsel %vm300_vm0, %v268_v29, %v332_v37 }
  0x2b   : > { %v271_v48 = vadd.f32 %v828_v1, %v232_v38  ;;  %vm302_vm2 = vcmp.ge.f32.partialorder %v270_v40, 0.0  ;;  %v334_v49 = vmul.f32 0.2, %v270_v40  ;;  %v272_v50 = vadd.f32 %v828_v1, %v233_v41 }
  0x2c   : > { %759 = vst [vmem:[%s856_s26 + $0x38] sm:$0xff] %v711_v45   ;;  %v365_v51 = vsel %vm301_vm1, %v269_v36, %v333_v46  ;;  %v273_v52 = vadd.f32 %v828_v1, %v234_v42  ;;  %v235_v53 = vmul.f32 %v818_v0, %v196_v43  ;;  %v236_v54 = vmul.f32 %v818_v0, %v197_v44 }
  0x2d   : > { %v716_v56 = vpack.c.bf16 %v365_v51, %v364_v47  ;;  %vm303_vm3 = vcmp.ge.f32.partialorder %v271_v48, 0.0  ;;  %v335_v57 = vmul.f32 0.2, %v271_v48  ;;  %v366_v58 = vsel %vm302_vm2, %v270_v40, %v334_v49 }
  0x2e   : > { %vm304_vm4 = vcmp.ge.f32.partialorder %v272_v50, 0.0  ;;  %vm305_vm5 = vcmp.ge.f32.partialorder %v273_v52, 0.0  ;;  %v336_v60 = vmul.f32 0.2, %v272_v50  ;;  %v337_v61 = vmul.f32 0.2, %v273_v52 }
  0x2f   : > { %760 = vst [vmem:[%s856_s26 + $0x40] sm:$0xff] %v716_v56   ;;  %v367_v62 = vsel %vm303_vm3, %v271_v48, %v335_v57  ;;  %v274_v63 = vadd.f32 %v828_v1, %v235_v53  ;;  %v275_v2 = vadd.f32 %v828_v1, %v236_v54  ;;  %v237_v3 = vmul.f32 %v818_v0, %v198_v55 }
  0x30   : > { %v721_v5 = vpack.c.bf16 %v367_v62, %v366_v58  ;;  %v368_v6 = vsel %vm304_vm4, %v272_v50, %v336_v60  ;;  %v369_v7 = vsel %vm305_vm5, %v273_v52, %v337_v61  ;;  %v238_v8 = vmul.f32 %v818_v0, %v199_v59 }
  0x31   : > { %v726_v12 = vpack.c.bf16 %v369_v7, %v368_v6  ;;  %vm306_vm6 = vcmp.ge.f32.partialorder %v274_v63, 0.0  ;;  %vm307_vm7 = vcmp.ge.f32.partialorder %v275_v2, 0.0  ;;  %v338_v13 = vmul.f32 0.2, %v274_v63 }
  0x32   : > { %761 = vst [vmem:[%s856_s26 + $0x48] sm:$0xff] %v721_v5   ;;  %v339_v14 = vmul.f32 0.2, %v275_v2  ;;  %v276_v15 = vadd.f32 %v828_v1, %v237_v3  ;;  %v277_v16 = vadd.f32 %v828_v1, %v238_v8  ;;  %v239_v17 = vmul.f32 %v818_v0, %v200_v4 }
  0x33   : > { %762 = vst [vmem:[%s856_s26 + $0x50] sm:$0xff] %v726_v12   ;;  %v370_v18 = vsel %vm306_vm6, %v274_v63, %v338_v13  ;;  %v240_v19 = vmul.f32 %v818_v0, %v201_v9  ;;  %v241_v20 = vmul.f32 %v818_v0, %v202_v10  ;;  %v242_v21 = vmul.f32 %v818_v0, %v203_v11 }
  0x34   : > { %v371_v23 = vsel %vm307_vm7, %v275_v2, %v339_v14  ;;  %vm308_vm8 = vcmp.ge.f32.partialorder %v276_v15, 0.0  ;;  %vm309_vm9 = vcmp.ge.f32.partialorder %v277_v16, 0.0  ;;  %v340_v24 = vmul.f32 0.2, %v276_v15 }
  0x35   : > { %v731_v25 = vpack.c.bf16 %v371_v23, %v370_v18  ;;  %v341_v26 = vmul.f32 0.2, %v277_v16  ;;  %v278_v27 = vadd.f32 %v828_v1, %v239_v17  ;;  %v279_v28 = vadd.f32 %v828_v1, %v240_v19 }
  0x36   : > { %v372_v29 = vsel %vm308_vm8, %v276_v15, %v340_v24  ;;  %v280_v30 = vadd.f32 %v828_v1, %v241_v20  ;;  %v281_v31 = vadd.f32 %v828_v1, %v242_v21  ;;  %v243_v33 = vmul.f32 %v818_v0, %v204_v22 }
  0x37   : > { %763 = vst [vmem:[%s856_s26 + $0x58] sm:$0xff] %v731_v25   ;;  %v373_v34 = vsel %vm309_vm9, %v277_v16, %v341_v26  ;;  %vm310_vm10 = vcmp.ge.f32.partialorder %v278_v27, 0.0  ;;  %vm311_vm11 = vcmp.ge.f32.partialorder %v279_v28, 0.0  ;;  %v342_v35 = vmul.f32 0.2, %v278_v27 }
  0x38   : > { %v736_v36 = vpack.c.bf16 %v373_v34, %v372_v29  ;;  %v343_v37 = vmul.f32 0.2, %v279_v28  ;;  %vm312_vm12 = vcmp.ge.f32.partialorder %v280_v30, 0.0  ;;  %vm313_vm13 = vcmp.ge.f32.partialorder %v281_v31, 0.0 }
  0x39   : > { %v374_v38 = vsel %vm310_vm10, %v278_v27, %v342_v35  ;;  %v344_v39 = vmul.f32 0.2, %v280_v30  ;;  %v345_v40 = vmul.f32 0.2, %v281_v31  ;;  %v244_v41 = vmul.f32 %v818_v0, %v205_v32 }
  0x3a   : > { %764 = vst [vmem:[%s856_s26 + $0x60] sm:$0xff] %v736_v36   ;;  %v375_v42 = vsel %vm311_vm11, %v279_v28, %v343_v37  ;;  %v282_v43 = vadd.f32 %v828_v1, %v243_v33 }
  0x3b   : > { %v741_v44 = vpack.c.bf16 %v375_v42, %v374_v38  ;;  %v376_v45 = vsel %vm312_vm12, %v280_v30, %v344_v39  ;;  %v377_v46 = vsel %vm313_vm13, %v281_v31, %v345_v40  ;;  %v283_v47 = vadd.f32 %v828_v1, %v244_v41 }
  0x3c   : > { %v746_v48 = vpack.c.bf16 %v377_v46, %v376_v45  ;;  %vm314_vm14 = vcmp.ge.f32.partialorder %v282_v43, 0.0  ;;  %v346_v49 = vmul.f32 0.2, %v282_v43 }
  0x3d   : > { %765 = vst [vmem:[%s856_s26 + $0x68] sm:$0xff] %v741_v44   ;;  %vm315_vm15 = vcmp.ge.f32.partialorder %v283_v47, 0.0  ;;  %v347_v50 = vmul.f32 0.2, %v283_v47 }
  0x3e   : > { %766 = vst [vmem:[%s856_s26 + $0x70] sm:$0xff] %v746_v48   ;;  %v378_v51 = vsel %vm314_vm14, %v282_v43, %v346_v49 }
  0x3f   : > { %v379_v52 = vsel %vm315_vm15, %v283_v47, %v347_v50 }
  0x40   : > { %v751_v0 = vpack.c.bf16 %v379_v52, %v378_v51 }
  0x42   : > { %767 = vst [vmem:[%s856_s26 + $0x78] sm:$0xff] %v751_v0  }
  0x43 PF: > { %s13_s12 = sadd.s32 1, %s782_s12  }
  0x44   : > { %p10_p4 = scmp.ge.s32.totalorder %s13_s12, 4  }
  0x46   :  { %12 = sbr.rel (!%p10_p4) target bundleno = 1 (0x1), region = 62 }

// kernel: cond_cnn_discriminator_forward.14
= control target key start
LH: loop header
LB: loop body
LE: loop exit
PB: predicated region body
PF: predicated region fallthrough
CT: control target
= control target key end

     0   :  { %s420_s12 = smov 0   ;;  %s447_s0 = inlined_call_operand.vmem [shape: f32[128,128], index: 0, kind: input, shape index: {}]   ;;  %s448_s1 = inlined_call_operand.vmem [shape: f32[1,128], index: 1, kind: input, shape index: {}]   ;;  %s449_s2 = inlined_call_operand.vmem [shape: f32[1,128], index: 2, kind: input, shape index: {}]   ;;  %s450_s3 = inlined_call_operand.vmem [shape: bf16[128,128], index: 3, kind: output, shape index: {}]  }
   0x1 LB: > { %s332_s13 = sadd.s32 4294967295, %s398_s12   ;;  %p336_p0 = scmp.ge.s32.totalorder %s398_s12, 1  ;;  %s398_s12 = sphi %s420_s12, %s13_s12  }
   0x2   : > { %p138_p1 = scmp.lt.s32.totalorder %s398_s12, 3 }
   0x4   : > { %p139_p2 = pnand %p336_p0, %p138_p1 }
   0x5   : > { %s337_s14 = sshll.u32 (!%p139_p2), %s332_s13, 3  ;;  %v341_v0 = vld [vmem:[%s448_s1] ss:$0 sm:$0xff] (!%p139_p2) }
   0x6   : > { %142 = sbr.rel (%p139_p2) target bundleno = 34 (0x22), region = 32  ;;  %p163_p3 = scmp.lt.s32.totalorder (!%p139_p2), %s337_s14, 15  ;;  %v342_v1 = vld [vmem:[%s449_s2] ss:$0 sm:$0xff] (!%p139_p2) }
   0xd   : > { %s452_s14 = smov (!%p163_p3, %s337_s14), 15 }
   0xe   : > { %s338_s15 = sshll.u32 %s452_s14, 3  ;;  %s340_s23 = sshll.u32 %s452_s14, 2 }
   0xf   : > { %s166_s20 = scalar_lea.vmem %s447_s0, %s338_s15  ;;  %s172_s26 = scalar_lea.vmem %s450_s3, %s340_s23 }
  0x10   : > { %v174_v2 = vld [vmem:[%s166_s20] sm:$0xff]  ;;  %v175_v3 = vld [vmem:[%s166_s20 + $0x8] sm:$0xff]  ;;  %v176_v4 = vld [vmem:[%s166_s20 + $0x10] sm:$0xff] }
  0x11   : > { %v189_v5 = vmul.f32 %v341_v0, %v174_v2  ;;  %v190_v6 = vmul.f32 %v341_v0, %v175_v3  ;;  %v177_v7 = vld [vmem:[%s166_s20 + $0x18] sm:$0xff]  ;;  %v191_v8 = vmul.f32 %v341_v0, %v176_v4  ;;  %v178_v9 = vld [vmem:[%s166_s20 + $0x20] sm:$0xff]  ;;  %v179_v10 = vld [vmem:[%s166_s20 + $0x28] sm:$0xff] }
  0x12   : > { %v192_v11 = vmul.f32 %v341_v0, %v177_v7  ;;  %v193_v12 = vmul.f32 %v341_v0, %v178_v9  ;;  %v194_v13 = vmul.f32 %v341_v0, %v179_v10  ;;  %v180_v14 = vld [vmem:[%s166_s20 + $0x30] sm:$0xff]  ;;  %v181_v15 = vld [vmem:[%s166_s20 + $0x38] sm:$0xff] }
  0x13   : > { %v204_v16 = vadd.f32 %v342_v1, %v189_v5  ;;  %v205_v17 = vadd.f32 %v342_v1, %v190_v6  ;;  %v206_v18 = vadd.f32 %v342_v1, %v191_v8  ;;  %v195_v19 = vmul.f32 %v341_v0, %v180_v14 }
  0x14   : > { %v207_v20 = vadd.f32 %v342_v1, %v192_v11  ;;  %v208_v21 = vadd.f32 %v342_v1, %v193_v12  ;;  %v209_v22 = vadd.f32 %v342_v1, %v194_v13  ;;  %v196_v23 = vmul.f32 %v341_v0, %v181_v15 }
  0x15   : > { %vm212_vm0 = vcmp.ge.f32.partialorder %v204_v16, 0.0  ;;  %vm213_vm1 = vcmp.ge.f32.partialorder %v205_v17, 0.0  ;;  %v220_v24 = vmul.f32 0.2, %v204_v16  ;;  %v221_v25 = vmul.f32 0.2, %v205_v17 }
  0x16   : > { %vm214_vm2 = vcmp.ge.f32.partialorder %v206_v18, 0.0  ;;  %vm215_vm3 = vcmp.ge.f32.partialorder %v207_v20, 0.0  ;;  %v222_v26 = vmul.f32 0.2, %v206_v18  ;;  %v223_v27 = vmul.f32 0.2, %v207_v20 }
  0x17   : > { %v228_v28 = vsel %vm212_vm0, %v204_v16, %v220_v24  ;;  %v229_v29 = vsel %vm213_vm1, %v205_v17, %v221_v25  ;;  %vm216_vm4 = vcmp.ge.f32.partialorder %v208_v21, 0.0  ;;  %vm217_vm5 = vcmp.ge.f32.partialorder %v209_v22, 0.0 }
  0x18   : > { %v364_v30 = vpack.c.bf16 %v229_v29, %v228_v28  ;;  %v230_v31 = vsel %vm214_vm2, %v206_v18, %v222_v26  ;;  %v231_v32 = vsel %vm215_vm3, %v207_v20, %v223_v27  ;;  %v224_v33 = vmul.f32 0.2, %v208_v21 }
  0x19   : > { %v369_v34 = vpack.c.bf16 %v231_v32, %v230_v31  ;;  %v225_v35 = vmul.f32 0.2, %v209_v22  ;;  %v210_v36 = vadd.f32 %v342_v1, %v195_v19  ;;  %v211_v37 = vadd.f32 %v342_v1, %v196_v23 }
  0x1a   : > { %365 = vst [vmem:[%s172_s26] sm:$0xff] %v364_v30   ;;  %v232_v38 = vsel %vm216_vm4, %v208_v21, %v224_v33 }
  0x1b   : > { %381 = vst [vmem:[%s172_s26 + $0x8] sm:$0xff] %v369_v34   ;;  %v233_v39 = vsel %vm217_vm5, %v209_v22, %v225_v35  ;;  %vm218_vm6 = vcmp.ge.f32.partialorder %v210_v36, 0.0  ;;  %vm219_vm7 = vcmp.ge.f32.partialorder %v211_v37, 0.0  ;;  %v226_v40 = vmul.f32 0.2, %v210_v36 }
  0x1c   : > { %v374_v41 = vpack.c.bf16 %v233_v39, %v232_v38  ;;  %v227_v42 = vmul.f32 0.2, %v211_v37 }
  0x1d   : > { %v234_v43 = vsel %vm218_vm6, %v210_v36, %v226_v40 }
  0x1e   : > { %382 = vst [vmem:[%s172_s26 + $0x10] sm:$0xff] %v374_v41   ;;  %v235_v44 = vsel %vm219_vm7, %v211_v37, %v227_v42 }
  0x1f   : > { %v379_v45 = vpack.c.bf16 %v235_v44, %v234_v43 }
  0x21   : > { %383 = vst [vmem:[%s172_s26 + $0x18] sm:$0xff] %v379_v45  }
  0x22 PF: > { %s13_s12 = sadd.s32 1, %s398_s12  }
  0x23   : > { %p10_p4 = scmp.ge.s32.totalorder %s13_s12, 4  }
  0x25   :  { %12 = sbr.rel (!%p10_p4) target bundleno = 1 (0x1), region = 62 }

// kernel: cond_cnn_discriminator_forward.13
= control target key start
LH: loop header
LB: loop body
LE: loop exit
PB: predicated region body
PF: predicated region fallthrough
CT: control target
= control target key end

     0   :  { %s1873_s15 = smov 0   ;;  %s1875_s16 = smov 0   ;;  %s2175_s0 = inlined_call_operand.vmem [shape: bf16[128,1024], index: 0, kind: input, shape index: {}]   ;;  %s2176_s1 = inlined_call_operand.vmem [shape: bf16[1024,128], index: 1, kind: input, shape index: {}]   ;;  %s2177_s2 = inlined_call_operand.vmem [shape: f32[128,128], index: 2, kind: output, shape index: {0}]   ;;  %s2178_s3 = inlined_call_operand.vmem [shape: f32[2,8,128], index: 3, kind: output, shape index: {1}]   ;;  %s2179_s4 = inlined_call_operand.vmem [shape: f32[2,8,128], index: 4, kind: output, shape index: {2}]  }
   0x1   :  { %s1877_s17 = smov 0  }
   0x2 LB: > { %s27_s18 = sadd.s32 1, %s1842_s16  ;;  %p1469_p0 = scmp.ge.s32.totalorder %s1846_s17, 1  ;;  %s1846_s17 = sphi %s1877_s17, %s15_s17   ;;  %s1842_s16 = sphi %s1875_s16, %s2181_s16   ;;  %s1838_s15 = sphi %s1873_s15, %s2180_s15  }
   0x3   : > { %p29_p1 = scmp.ge.s32.totalorder %s27_s18, 2  ;;  %p196_p2 = scmp.lt.s32.totalorder %s1846_s17, 3 }
   0x5   : > { %s2183_s18 = smov (%p29_p1, %s27_s18), 0  ;;  %p197_p3 = pnand %p1469_p0, %p196_p2 }
   0x6   : > { %v1760_v0 = vld [vmem:[%s2176_s1 + $0x40] sm:$0xff] (!%p197_p3)   ;;  %v1764_v4 = vld [vmem:[%s2176_s1 + $0x48] sm:$0xff] (!%p197_p3)   ;;  %v1768_v8 = vld [vmem:[%s2176_s1 + $0x50] sm:$0xff] (!%p197_p3)   ;;  %s1470_s29 = sshll.u32 (!%p197_p3), %s1838_s15, 3  ;;  %p264_p5 = scmp.lt.s32.totalorder (!%p197_p3), %s1838_s15, 1 }
   0x7   : > { %200 = sbr.rel (%p197_p3) target bundleno = 335 (0x14f), region = 28  ;;  %v1761_v1 = vld [vmem:[%s2176_s1 + $0xc0] sm:$0xff] (!%p197_p3)   ;;  %1576 = vmatprep.subr.bf16.mxu0 (!%p197_p3), %v1760_v0  ;;  %v1765_v5 = vld [vmem:[%s2176_s1 + $0xc8] sm:$0xff] (!%p197_p3)   ;;  %v1769_v9 = vld [vmem:[%s2176_s1 + $0xd0] sm:$0xff] (!%p197_p3)   ;;  %p245_p4 = scmp.lt.s32.totalorder (!%p197_p3), %s1470_s29, 15 }
   0x8   : > { %v1762_v2 = vld [vmem:[%s2176_s1] sm:$0xff] (!%p197_p3)   ;;  %1616 = vmatprep.subr.bf16.mxu1 (!%p197_p3), %v1761_v1  ;;  %v1766_v6 = vld [vmem:[%s2176_s1 + $0x8] sm:$0xff] (!%p197_p3)   ;;  %v1770_v10 = vld [vmem:[%s2176_s1 + $0x10] sm:$0xff] (!%p197_p3)  }
   0x9   : > { %v1763_v3 = vld [vmem:[%s2176_s1 + $0x80] sm:$0xff] (!%p197_p3)   ;;  %1577 = vmatpush3.bf16.msra.mxu0 (!%p197_p3), %v1762_v2  ;;  %v1767_v7 = vld [vmem:[%s2176_s1 + $0x88] sm:$0xff] (!%p197_p3)   ;;  %v1771_v11 = vld [vmem:[%s2176_s1 + $0x90] sm:$0xff] (!%p197_p3)  }
   0xa   : > { %1617 = vmatpush3.bf16.msra.mxu1 (!%p197_p3), %v1763_v3  ;;  %1578 = vmatprep.subr.bf16.mxu0 (!%p197_p3), %v1764_v4  ;;  %v1772_v12 = vld [vmem:[%s2176_s1 + $0x58] sm:$0xff] (!%p197_p3)   ;;  %v1776_v16 = vld [vmem:[%s2176_s1 + $0x60] sm:$0xff] (!%p197_p3)   ;;  %v1780_v20 = vld [vmem:[%s2176_s1 + $0x68] sm:$0xff] (!%p197_p3)  }
   0xb   : > { %1618 = vmatprep.subr.bf16.mxu1 (!%p197_p3), %v1765_v5  ;;  %v1773_v13 = vld [vmem:[%s2176_s1 + $0xd8] sm:$0xff] (!%p197_p3)   ;;  %v1777_v17 = vld [vmem:[%s2176_s1 + $0xe0] sm:$0xff] (!%p197_p3)   ;;  %v1781_v21 = vld [vmem:[%s2176_s1 + $0xe8] sm:$0xff] (!%p197_p3)  }
   0xc   : > { %v1774_v14 = vld [vmem:[%s2176_s1 + $0x18] sm:$0xff] (!%p197_p3)   ;;  %v1778_v18 = vld [vmem:[%s2176_s1 + $0x20] sm:$0xff] (!%p197_p3)   ;;  %v1782_v22 = vld [vmem:[%s2176_s1 + $0x28] sm:$0xff] (!%p197_p3)  }
   0xd   : > { %1579 = vmatpush3.bf16.msra.mxu0 (!%p197_p3), %v1766_v6  ;;  %v1775_v15 = vld [vmem:[%s2176_s1 + $0x98] sm:$0xff] (!%p197_p3)   ;;  %v1779_v19 = vld [vmem:[%s2176_s1 + $0xa0] sm:$0xff] (!%p197_p3)   ;;  %v1783_v23 = vld [vmem:[%s2176_s1 + $0xa8] sm:$0xff] (!%p197_p3)  }
   0xe   : > { %1619 = vmatpush3.bf16.msra.mxu1 %v1767_v7  ;;  %1580 = vmatprep.subr.bf16.mxu0 %v1768_v8  ;;  %s2185_s29 = smov (!%p245_p4, %s1470_s29), 15  ;;  %v1784_v24 = vld [vmem:[%s2176_s1 + $0x70] sm:$0xff]   ;;  %v1788_v28 = vld [vmem:[%s2176_s1 + $0x78] sm:$0xff]   ;;  %v1792_v40 = vld [vmem:[%s2176_s1 + $0x140] sm:$0xff]   ;;  %s2187_s15 = smov (!%p264_p5, %s1838_s15), 1 }
   0xf   : > { %1620 = vmatprep.subr.bf16.mxu1 %v1769_v9  ;;  %v1785_v25 = vld [vmem:[%s2176_s1 + $0xf0] sm:$0xff]   ;;  %s1575_s5 = sshll.u32 %s2185_s29, 5  ;;  %v1789_v29 = vld [vmem:[%s2176_s1 + $0xf8] sm:$0xff]   ;;  %v1793_v41 = vld [vmem:[%s2176_s1 + $0x1c0] sm:$0xff]  }
  0x10   : > { %v1786_v26 = vld [vmem:[%s2176_s1 + $0x30] sm:$0xff]   ;;  %s1990_s14 = scalar_lea.vmem %s2175_s0, %s1575_s5  ;;  %v1790_v30 = vld [vmem:[%s2176_s1 + $0x38] sm:$0xff]   ;;  %v1794_v42 = vld [vmem:[%s2176_s1 + $0x100] sm:$0xff]  }
  0x11   : > { %1581 = vmatpush3.bf16.msra.mxu0 %v1770_v10  ;;  %v1787_v27 = vld [vmem:[%s2176_s1 + $0xb0] sm:$0xff]   ;;  %v1791_v31 = vld [vmem:[%s2176_s1 + $0xb8] sm:$0xff]   ;;  %v279_v32 = vld [vmem:[%s1990_s14] sm:$0xff] }
  0x12   : > { %1621 = vmatpush3.bf16.msra.mxu1 %v1771_v11  ;;  %1582 = vmatprep.subr.bf16.mxu0 %v1772_v12  ;;  %v283_v33 = vld [vmem:[%s1990_s14 + $0x20] sm:$0xff]  ;;  %v280_v34 = vld [vmem:[%s1990_s14 + $0x8] sm:$0xff]  ;;  %v1800_v56 = vld [vmem:[%s2176_s1 + $0x150] sm:$0xff]  }
  0x13   : > { %1622 = vmatprep.subr.bf16.mxu1 %v1773_v13  ;;  %v1477_v35 = vcombine.low %v279_v32, %v283_v33  ;;  %v1478_v36 = vcombine.high %v279_v32, %v283_v33  ;;  %v284_v37 = vld [vmem:[%s1990_s14 + $0x28] sm:$0xff]  ;;  %v1795_v43 = vld [vmem:[%s2176_s1 + $0x180] sm:$0xff]   ;;  %v1801_v57 = vld [vmem:[%s2176_s1 + $0x1d0] sm:$0xff]  }
  0x14   : > { %v1479_v38 = vcombine.low %v280_v34, %v284_v37  ;;  %v1480_v39 = vcombine.high %v280_v34, %v284_v37  ;;  %v1796_v44 = vld [vmem:[%s2176_s1 + $0x148] sm:$0xff]   ;;  %v287_v48 = vld [vmem:[%s1990_s14 + $0x40] sm:$0xff]  ;;  %v1802_v58 = vld [vmem:[%s2176_s1 + $0x110] sm:$0xff]  }
  0x15   : > { %1583 = vmatpush3.bf16.msra.mxu0 %v1774_v14  ;;  %1015 = vmatprep.mubr.bf16.mxu0 %v1478_v36  ;;  %v1797_v45 = vld [vmem:[%s2176_s1 + $0x1c8] sm:$0xff]   ;;  %v291_v49 = vld [vmem:[%s1990_s14 + $0x60] sm:$0xff]  ;;  %v1803_v59 = vld [vmem:[%s2176_s1 + $0x190] sm:$0xff]  }
  0x16   : > { %1623 = vmatpush3.bf16.msra.mxu1 %v1775_v15  ;;  %1584 = vmatprep.subr.bf16.mxu0 %v1776_v16  ;;  %v1798_v46 = vld [vmem:[%s2176_s1 + $0x108] sm:$0xff]   ;;  %v1486_v50 = vcombine.high %v287_v48, %v291_v49  ;;  %v1485_v53 = vcombine.low %v287_v48, %v291_v49  ;;  %v1804_v60 = vld [vmem:[%s2176_s1 + $0x158] sm:$0xff]   ;;  %v295_v0 = vld [vmem:[%s1990_s14 + $0x80] sm:$0xff] }
  0x17   : > { %1624 = vmatprep.subr.bf16.mxu1 %v1777_v17  ;;  %1080 = vmatprep.mubr.bf16.mxu1 %v1480_v39  ;;  %v1799_v47 = vld [vmem:[%s2176_s1 + $0x188] sm:$0xff]   ;;  %v1805_v61 = vld [vmem:[%s2176_s1 + $0x1d8] sm:$0xff]   ;;  %v299_v1 = vld [vmem:[%s1990_s14 + $0xa0] sm:$0xff] }
  0x18   : > { %v288_v51 = vld [vmem:[%s1990_s14 + $0x48] sm:$0xff]  ;;  %v1806_v62 = vld [vmem:[%s2176_s1 + $0x118] sm:$0xff]   ;;  %v1494_v4 = vcombine.high %v295_v0, %v299_v1  ;;  %v1493_v6 = vcombine.low %v295_v0, %v299_v1  ;;  %v1808_v8 = vld [vmem:[%s2176_s1 + $0x160] sm:$0xff]  }
  0x19   : > { %1585 = vmatpush3.bf16.msra.mxu0 %v1778_v18  ;;  %v292_v52 = vld [vmem:[%s1990_s14 + $0x68] sm:$0xff]  ;;  %v1807_v63 = vld [vmem:[%s2176_s1 + $0x198] sm:$0xff]   ;;  %v1809_v9 = vld [vmem:[%s2176_s1 + $0x1e0] sm:$0xff]  }
  0x1a   : > { %1625 = vmatpush3.bf16.msra.mxu1 %v1779_v19  ;;  %1586 = vmatprep.subr.bf16.mxu0 %v1780_v20  ;;  %v1488_v54 = vcombine.high %v288_v51, %v292_v52  ;;  %v1487_v55 = vcombine.low %v288_v51, %v292_v52  ;;  %v296_v2 = vld [vmem:[%s1990_s14 + $0x88] sm:$0xff]  ;;  %v1810_v10 = vld [vmem:[%s2176_s1 + $0x120] sm:$0xff]   ;;  %v281_v32 = vld [vmem:[%s1990_s14 + $0x10] sm:$0xff] }
  0x1b   : > { %1626 = vmatprep.subr.bf16.mxu1 %v1781_v21  ;;  %v300_v3 = vld [vmem:[%s1990_s14 + $0xa8] sm:$0xff]  ;;  %v1811_v11 = vld [vmem:[%s2176_s1 + $0x1a0] sm:$0xff]   ;;  %v285_v33 = vld [vmem:[%s1990_s14 + $0x30] sm:$0xff] }
  0x1c   : > { %v1496_v5 = vcombine.high %v296_v2, %v300_v3  ;;  %v1495_v7 = vcombine.low %v296_v2, %v300_v3  ;;  %v1812_v12 = vld [vmem:[%s2176_s1 + $0x168] sm:$0xff]   ;;  %v303_v16 = vld [vmem:[%s1990_s14 + $0xc0] sm:$0xff]  ;;  %v1481_v34 = vcombine.low %v281_v32, %v285_v33  ;;  %v282_v36 = vld [vmem:[%s1990_s14 + $0x18] sm:$0xff] }
  0x1d   : > { %1587 = vmatpush3.bf16.msra.mxu0 %v1782_v22  ;;  %v1813_v13 = vld [vmem:[%s2176_s1 + $0x1e8] sm:$0xff]   ;;  %v307_v17 = vld [vmem:[%s1990_s14 + $0xe0] sm:$0xff]  ;;  %v286_v37 = vld [vmem:[%s1990_s14 + $0x38] sm:$0xff] }
  0x1e   : > { %1627 = vmatpush3.bf16.msra.mxu1 %v1783_v23  ;;  %1588 = vmatprep.subr.bf16.mxu0 %v1784_v24  ;;  %v1814_v14 = vld [vmem:[%s2176_s1 + $0x128] sm:$0xff]   ;;  %v1502_v19 = vcombine.high %v303_v16, %v307_v17  ;;  %v1501_v21 = vcombine.low %v303_v16, %v307_v17  ;;  %v1816_v24 = vld [vmem:[%s2176_s1 + $0x170] sm:$0xff]   ;;  %v1483_v39 = vcombine.low %v282_v36, %v286_v37  ;;  %v298_v48 = vld [vmem:[%s1990_s14 + $0x98] sm:$0xff] }
  0x1f   : > { %1628 = vmatprep.subr.bf16.mxu1 %v1785_v25  ;;  %v1815_v15 = vld [vmem:[%s2176_s1 + $0x1a8] sm:$0xff]   ;;  %v1817_v25 = vld [vmem:[%s2176_s1 + $0x1f0] sm:$0xff]   ;;  %v302_v49 = vld [vmem:[%s1990_s14 + $0xb8] sm:$0xff] }
  0x20   : > { %v304_v18 = vld [vmem:[%s1990_s14 + $0xc8] sm:$0xff] }
  0x21   : > { %1589 = vmatpush3.bf16.msra.mxu0 %v1786_v26  ;;  %v308_v20 = vld [vmem:[%s1990_s14 + $0xe8] sm:$0xff]  ;;  %v1818_v26 = vld [vmem:[%s2176_s1 + $0x130] sm:$0xff]  }
  0x22   : > { %1629 = vmatpush3.bf16.msra.mxu1 %v1787_v27  ;;  %1590 = vmatprep.subr.bf16.mxu0 %v1788_v28  ;;  %v1504_v22 = vcombine.high %v304_v18, %v308_v20  ;;  %v1503_v23 = vcombine.low %v304_v18, %v308_v20  ;;  %v1819_v27 = vld [vmem:[%s2176_s1 + $0x1b0] sm:$0xff]   ;;  %v1820_v28 = vld [vmem:[%s2176_s1 + $0x178] sm:$0xff]  }
  0x23   : > { %1630 = vmatprep.subr.bf16.mxu1 %v1789_v29  ;;  %v1821_v29 = vld [vmem:[%s2176_s1 + $0x1f8] sm:$0xff]  }
  0x25   : > { %1591 = vmatpush3.bf16.msra.mxu0 %v1790_v30  ;;  %v1822_v30 = vld [vmem:[%s2176_s1 + $0x138] sm:$0xff]  }
  0x26   : > { %1631 = vmatpush3.bf16.msra.mxu1 %v1791_v31  ;;  %1656 = vmatprep.subr.bf16.mxu0 %v1792_v40  ;;  %v1823_v31 = vld [vmem:[%s2176_s1 + $0x1b8] sm:$0xff]   ;;  %v1484_v40 = vcombine.high %v282_v36, %v286_v37 }
  0x27   : > { %1696 = vmatprep.subr.bf16.mxu1 %v1793_v41  ;;  %v293_v41 = vld [vmem:[%s1990_s14 + $0x70] sm:$0xff] }
  0x28   : > { %1016 = vmatmul.mubr.bf16.vlgmr.msra.gmra.mrb[0].mxu0 %v1477_v35  ;;  %v1482_v35 = vcombine.high %v281_v32, %v285_v33 }
  0x29   : > { %1081 = vmatmul.mubr.bf16.vlgmr.msra.gmra.mrb[0].mxu1 %v1479_v38  ;;  %1657 = vmatpush3.bf16.msra.mxu0 %v1794_v42  ;;  %v289_v38 = vld [vmem:[%s1990_s14 + $0x50] sm:$0xff]  ;;  %v290_v42 = vld [vmem:[%s1990_s14 + $0x58] sm:$0xff] }
  0x2a   : > { %1697 = vmatpush3.bf16.msra.mxu1 %v1795_v43  ;;  %1658 = vmatprep.subr.bf16.mxu0 %v1796_v44  ;;  %v294_v43 = vld [vmem:[%s1990_s14 + $0x78] sm:$0xff]  ;;  %v1490_v44 = vcombine.high %v289_v38, %v293_v41 }
  0x2b   : > { %1698 = vmatprep.subr.bf16.mxu1 %v1797_v45  ;;  %1023 = vmatprep.mubr.bf16.mxu0 %v1486_v50  ;;  %v1492_v45 = vcombine.high %v290_v42, %v294_v43  ;;  %v1489_v50 = vcombine.low %v289_v38, %v293_v41  ;;  %v1491_v51 = vcombine.low %v290_v42, %v294_v43 }
  0x2c   : > { %1088 = vmatprep.mubr.bf16.mxu1 %v1488_v54  ;;  %v305_v54 = vld [vmem:[%s1990_s14 + $0xd0] sm:$0xff] }
  0x2d   : > { %1659 = vmatpush3.bf16.msra.mxu0 %v1798_v46  ;;  %v297_v46 = vld [vmem:[%s1990_s14 + $0x90] sm:$0xff] }
  0x2e   : > { %1699 = vmatpush3.bf16.msra.mxu1 %v1799_v47  ;;  %1660 = vmatprep.subr.bf16.mxu0 %v1800_v56  ;;  %v301_v47 = vld [vmem:[%s1990_s14 + $0xb0] sm:$0xff]  ;;  %v306_v56 = vld [vmem:[%s1990_s14 + $0xd8] sm:$0xff] }
  0x2f   : > { %1700 = vmatprep.subr.bf16.mxu1 %v1801_v57  ;;  %v1498_v52 = vcombine.high %v297_v46, %v301_v47  ;;  %v310_v57 = vld [vmem:[%s1990_s14 + $0xf8] sm:$0xff] }
  0x30   : > { %1024 = vmatmul.mubr.bf16.gmra.mrb[4].mxu0 %v1485_v53  ;;  %v1500_v53 = vcombine.high %v298_v48, %v302_v49 }
  0x31   : > { %1089 = vmatmul.mubr.bf16.gmra.mrb[4].mxu1 %v1487_v55  ;;  %1661 = vmatpush3.bf16.msra.mxu0 %v1802_v58  ;;  %v309_v55 = vld [vmem:[%s1990_s14 + $0xf0] sm:$0xff]  ;;  %v1497_v58 = vcombine.low %v297_v46, %v301_v47  ;;  %s1474_s14 = sshll.u32 %s2185_s29, 3  ;;  %s1475_s29 = sshll.u32 %s2187_s15, 3 }
  0x32   : > { %1701 = vmatpush3.bf16.msra.mxu1 %v1803_v59  ;;  %1662 = vmatprep.subr.bf16.mxu0 %v1804_v60  ;;  %v1499_v59 = vcombine.low %v298_v48, %v302_v49  ;;  %v1506_v60 = vcombine.high %v305_v54, %v309_v55  ;;  %s2142_s30 = scalar_lea.vmem %s2177_s2, %s1474_s14  ;;  %s270_s7 = scalar_lea.vmem %s2178_s3, %s1475_s29 }
  0x33   : > { %1702 = vmatprep.subr.bf16.mxu1 %v1805_v61  ;;  %1031 = vmatprep.mubr.bf16.mxu0 %v1494_v4  ;;  %v1508_v61 = vcombine.high %v306_v56, %v310_v57  ;;  %s277_s10 = scalar_lea.vmem %s2179_s4, %s1475_s29 }
  0x34   : > { %1096 = vmatprep.mubr.bf16.mxu1 %v1496_v5 }
  0x35   : > { %1663 = vmatpush3.bf16.msra.mxu0 %v1806_v62  ;;  %v1505_v62 = vcombine.low %v305_v54, %v309_v55 }
  0x36   : > { %1703 = vmatpush3.bf16.msra.mxu1 %v1807_v63  ;;  %1664 = vmatprep.subr.bf16.mxu0 %v1808_v8  ;;  %v1507_v63 = vcombine.low %v306_v56, %v310_v57 }
  0x37   : > { %1704 = vmatprep.subr.bf16.mxu1 %v1809_v9 }
  0x38   : > { %1032 = vmatmul.mubr.bf16.gmra.mrb[8].mxu0 %v1493_v6 }
  0x39   : > { %1097 = vmatmul.mubr.bf16.gmra.mrb[8].mxu1 %v1495_v7  ;;  %1665 = vmatpush3.bf16.msra.mxu0 %v1810_v10 }
  0x3a   : > { %1705 = vmatpush3.bf16.msra.mxu1 %v1811_v11  ;;  %1666 = vmatprep.subr.bf16.mxu0 %v1812_v12 }
  0x3b   : > { %1706 = vmatprep.subr.bf16.mxu1 %v1813_v13  ;;  %1039 = vmatprep.mubr.bf16.mxu0 %v1502_v19 }
  0x3c   : > { %1104 = vmatprep.mubr.bf16.mxu1 %v1504_v22 }
  0x3d   : > { %1667 = vmatpush3.bf16.msra.mxu0 %v1814_v14 }
  0x3e   : > { %1707 = vmatpush3.bf16.msra.mxu1 %v1815_v15  ;;  %1668 = vmatprep.subr.bf16.mxu0 %v1816_v24 }
  0x3f   : > { %1708 = vmatprep.subr.bf16.mxu1 %v1817_v25 }
  0x40   : > { %1040 = vmatmul.mubr.bf16.gmra.mrb[12].mxu0 %v1501_v21 }
  0x41   : > { %1105 = vmatmul.mubr.bf16.gmra.mrb[12].mxu1 %v1503_v23  ;;  %1669 = vmatpush3.bf16.msra.mxu0 %v1818_v26 }
  0x42   : > { %1709 = vmatpush3.bf16.msra.mxu1 %v1819_v27  ;;  %1670 = vmatprep.subr.bf16.mxu0 %v1820_v28 }
  0x43   : > { %1710 = vmatprep.subr.bf16.mxu1 %v1821_v29  ;;  %1145 = vmatprep.mubr.bf16.mxu0 %v1482_v35 }
  0x44   : > { %1210 = vmatprep.mubr.bf16.mxu1 %v1484_v40 }
  0x45   : > { %1671 = vmatpush3.bf16.msra.mxu0 %v1822_v30 }
  0x46   : > { %1711 = vmatpush3.bf16.msra.mxu1 %v1823_v31 }
  0x48   : > { %1146 = vmatmul.mubr.bf16.vlgmr.msra.gmra.mrb[16].mxu0 %v1481_v34 }
  0x49   : > { %1211 = vmatmul.mubr.bf16.vlgmr.msra.gmra.mrb[16].mxu1 %v1483_v39  ;;  %1153 = vmatprep.mubr.bf16.mxu0 %v1490_v44 }
  0x4a   : > { %1218 = vmatprep.mubr.bf16.mxu1 %v1492_v45 }
  0x50   : > { %1154 = vmatmul.mubr.bf16.gmra.mrb[20].mxu0 %v1489_v50 }
  0x51   : > { %1219 = vmatmul.mubr.bf16.gmra.mrb[20].mxu1 %v1491_v51  ;;  %1161 = vmatprep.mubr.bf16.mxu0 %v1498_v52 }
  0x52   : > { %1226 = vmatprep.mubr.bf16.mxu1 %v1500_v53 }
  0x58   : > { %1162 = vmatmul.mubr.bf16.gmra.mrb[24].mxu0 %v1497_v58 }
  0x59   : > { %1227 = vmatmul.mubr.bf16.gmra.mrb[24].mxu1 %v1499_v59  ;;  %1169 = vmatprep.mubr.bf16.mxu0 %v1506_v60 }
  0x5a   : > { %1234 = vmatprep.mubr.bf16.mxu1 %v1508_v61 }
  0x60   : > { %1170 = vmatmul.mubr.bf16.gmra.mrb[28].mxu0 %v1505_v62 }
  0x61   : > { %1235 = vmatmul.mubr.bf16.gmra.mrb[28].mxu1 %v1507_v63 }
  0xfb   : > { %v1592_v0 = vpop.f32.mrb[0].mxu0 }
  0xfc   : > { %v1632_v1 = vpop.f32.mrb[0].mxu1  ;;  %v1593_v2 = vpop.f32.mrb[1].mxu0 }
  0xfd   : > { %v1594_v3 = vadd.f32 %v1593_v2, %v1592_v0  ;;  %v1633_v4 = vpop.f32.mrb[1].mxu1  ;;  %v1595_v5 = vpop.f32.mrb[2].mxu0 }
  0xfe   : > { %v1634_v6 = vadd.f32 %v1633_v4, %v1632_v1  ;;  %v1635_v7 = vpop.f32.mrb[2].mxu1  ;;  %v1596_v8 = vpop.f32.mrb[3].mxu0 }
  0xff   : > { %v1597_v9 = vadd.f32 %v1596_v8, %v1595_v5  ;;  %v1636_v10 = vpop.f32.mrb[3].mxu1 }
 0x100   : > { %v1083_v11 = vadd.f32 %v1634_v6, %v1594_v3  ;;  %v1637_v12 = vadd.f32 %v1636_v10, %v1635_v7 }
 0x102   : > { %v1086_v13 = vadd.f32 %v1637_v12, %v1597_v9 }
 0x103   : > { %v1598_v14 = vpop.f32.mrb[4].mxu0 }
 0x104   : > { %v1638_v15 = vpop.f32.mrb[4].mxu1  ;;  %v1599_v16 = vpop.f32.mrb[5].mxu0 }
 0x105   : > { %v1600_v17 = vadd.f32 %v1599_v16, %v1598_v14  ;;  %v1639_v18 = vpop.f32.mrb[5].mxu1  ;;  %v1601_v19 = vpop.f32.mrb[6].mxu0 }
 0x106   : > { %v1640_v20 = vadd.f32 %v1639_v18, %v1638_v15  ;;  %v1641_v21 = vpop.f32.mrb[6].mxu1  ;;  %v1602_v22 = vpop.f32.mrb[7].mxu0 }
 0x107   : > { %v1603_v23 = vadd.f32 %v1602_v22, %v1601_v19  ;;  %v1642_v24 = vpop.f32.mrb[7].mxu1 }
 0x108   : > { %v2126_v25 = vadd.f32 %v1640_v20, %v1600_v17  ;;  %v1643_v26 = vadd.f32 %v1642_v24, %v1641_v21 }
 0x10a   : > { %v2128_v27 = vadd.f32 %v1643_v26, %v1603_v23 }
 0x10b   : > { %v1604_v28 = vpop.f32.mrb[8].mxu0 }
 0x10c   : > { %v1644_v29 = vpop.f32.mrb[8].mxu1  ;;  %v1605_v30 = vpop.f32.mrb[9].mxu0 }
 0x10d   : > { %v1645_v31 = vpop.f32.mrb[9].mxu1  ;;  %v1606_v32 = vadd.f32 %v1605_v30, %v1604_v28  ;;  %v1607_v34 = vpop.f32.mrb[10].mxu0 }
 0x10e   : > { %v1646_v33 = vadd.f32 %v1645_v31, %v1644_v29  ;;  %v1647_v35 = vpop.f32.mrb[10].mxu1  ;;  %v1608_v36 = vpop.f32.mrb[11].mxu0 }
 0x10f   : > { %v1648_v37 = vpop.f32.mrb[11].mxu1  ;;  %v1609_v39 = vadd.f32 %v1608_v36, %v1607_v34 }
 0x110   : > { %v2130_v38 = vadd.f32 %v1646_v33, %v1606_v32  ;;  %v1649_v40 = vadd.f32 %v1648_v37, %v1647_v35 }
 0x112   : > { %v2132_v41 = vadd.f32 %v1649_v40, %v1609_v39 }
 0x113   : > { %v1610_v42 = vpop.f32.mrb[12].mxu0 }
 0x114   : > { %v1650_v43 = vpop.f32.mrb[12].mxu1  ;;  %v1611_v44 = vpop.f32.mrb[13].mxu0 }
 0x115   : > { %v1612_v45 = vadd.f32 %v1611_v44, %v1610_v42  ;;  %v1651_v46 = vpop.f32.mrb[13].mxu1  ;;  %v1613_v47 = vpop.f32.mrb[14].mxu0 }
 0x116   : > { %v1652_v48 = vadd.f32 %v1651_v46, %v1650_v43  ;;  %v1653_v49 = vpop.f32.mrb[14].mxu1  ;;  %v1614_v50 = vpop.f32.mrb[15].mxu0 }
 0x117   : > { %v1615_v51 = vadd.f32 %v1614_v50, %v1613_v47  ;;  %v1654_v52 = vpop.f32.mrb[15].mxu1 }
 0x118   : > { %v2134_v53 = vadd.f32 %v1652_v48, %v1612_v45  ;;  %v1655_v54 = vadd.f32 %v1654_v52, %v1653_v49 }
 0x11a   : > { %v2136_v55 = vadd.f32 %v1655_v54, %v1615_v51 }
 0x11b   : > { %v1672_v56 = vpop.f32.mrb[16].mxu0 }
 0x11c   : > { %v1712_v57 = vpop.f32.mrb[16].mxu1  ;;  %v1673_v58 = vpop.f32.mrb[17].mxu0 }
 0x11d   : > { %v1674_v59 = vadd.f32 %v1673_v58, %v1672_v56  ;;  %v1713_v60 = vpop.f32.mrb[17].mxu1  ;;  %v1675_v61 = vpop.f32.mrb[18].mxu0 }
 0x11e   : > { %v1714_v62 = vadd.f32 %v1713_v60, %v1712_v57  ;;  %v1715_v63 = vpop.f32.mrb[18].mxu1  ;;  %v1676_v0 = vpop.f32.mrb[19].mxu0 }
 0x11f   : > { %v1148_v1 = vadd.f32 %v1674_v59, %v1083_v11  ;;  %v1677_v2 = vadd.f32 %v1676_v0, %v1675_v61  ;;  %v1716_v3 = vpop.f32.mrb[19].mxu1 }
 0x120   : > { %v1717_v4 = vadd.f32 %v1716_v3, %v1715_v63 }
 0x121   : > { %v1213_v5 = vadd.f32 %v1714_v62, %v1148_v1  ;;  %v1151_v6 = vadd.f32 %v1677_v2, %v1086_v13 }
 0x123   : > { %1243 = vst [vmem:[%s2142_s30] sm:$0xff] %v1213_v5  ;;  %v1216_v7 = vadd.f32 %v1717_v4, %v1151_v6  ;;  %v1678_v8 = vpop.f32.mrb[20].mxu0  ;;  %v1264_v12 = vmul.f32 %v1213_v5, %v1213_v5 }
 0x124   : > { %v1718_v9 = vpop.f32.mrb[20].mxu1  ;;  %v1679_v10 = vpop.f32.mrb[21].mxu0 }
 0x125   : > { %1244 = vst [vmem:[%s2142_s30 + $0x8] sm:$0xff] %v1216_v7  ;;  %v1251_v11 = vadd.f32 %v1216_v7, %v1213_v5  ;;  %v1265_v14 = vmul.f32 %v1216_v7, %v1216_v7  ;;  %v1680_v15 = vadd.f32 %v1679_v10, %v1678_v8  ;;  %v1719_v16 = vpop.f32.mrb[21].mxu1  ;;  %v1681_v17 = vpop.f32.mrb[22].mxu0 }
 0x126   : > { %v1720_v18 = vadd.f32 %v1719_v16, %v1718_v9  ;;  %v1721_v19 = vpop.f32.mrb[22].mxu1  ;;  %v1682_v20 = vpop.f32.mrb[23].mxu0 }
 0x127   : > { %v1272_v21 = vadd.f32 %v1265_v14, %v1264_v12  ;;  %v1156_v13 = vadd.f32 %v1680_v15, %v2126_v25  ;;  %v1683_v22 = vadd.f32 %v1682_v20, %v1681_v17  ;;  %v1722_v23 = vpop.f32.mrb[23].mxu1 }
 0x128   : > { %v1723_v24 = vadd.f32 %v1722_v23, %v1721_v19 }
 0x129   : > { %v1221_v26 = vadd.f32 %v1720_v18, %v1156_v13  ;;  %v1159_v28 = vadd.f32 %v1683_v22, %v2128_v27  ;;  %v1285_v18 = vlaneseq }
 0x12b   : > { %1245 = vst [vmem:[%s2142_s30 + $0x10] sm:$0xff] %v1221_v26  ;;  %v1252_v29 = vadd.f32 %v1251_v11, %v1221_v26  ;;  %v1266_v30 = vmul.f32 %v1221_v26, %v1221_v26  ;;  %v1224_v31 = vadd.f32 %v1723_v24, %v1159_v28  ;;  %v1684_v32 = vpop.f32.mrb[24].mxu0  ;;  %v1286_v13 = vshrl.u32 %v1285_v18, 7 }
 0x12c   : > { %v1724_v33 = vpop.f32.mrb[24].mxu1  ;;  %v1685_v34 = vpop.f32.mrb[25].mxu0 }
 0x12d   : > { %v1273_v35 = vadd.f32 %v1272_v21, %v1266_v30  ;;  %1246 = vst [vmem:[%s2142_s30 + $0x18] sm:$0xff] %v1224_v31  ;;  %v1253_v36 = vadd.f32 %v1252_v29, %v1224_v31  ;;  %v1267_v37 = vmul.f32 %v1224_v31, %v1224_v31  ;;  %v1686_v39 = vadd.f32 %v1685_v34, %v1684_v32  ;;  %v1725_v25 = vpop.f32.mrb[25].mxu1  ;;  %v1687_v40 = vpop.f32.mrb[26].mxu0 }
 0x12e   : > { %v1726_v42 = vadd.f32 %v1725_v25, %v1724_v33  ;;  %v1727_v43 = vpop.f32.mrb[26].mxu1  ;;  %v1688_v44 = vpop.f32.mrb[27].mxu0  ;;  %vm1287_vm0 = vcmp.eq.s32.totalorder %v1286_v13, 0 }
 0x12f   : > { %v1274_v27 = vadd.f32 %v1273_v35, %v1267_v37  ;;  %v1164_v45 = vadd.f32 %v1686_v39, %v2130_v38  ;;  %v1689_v46 = vadd.f32 %v1688_v44, %v1687_v40  ;;  %v1728_v47 = vpop.f32.mrb[27].mxu1 }
 0x130   : > { %v1729_v48 = vadd.f32 %v1728_v47, %v1727_v43 }
 0x131   : > { %v1229_v49 = vadd.f32 %v1726_v42, %v1164_v45  ;;  %v1167_v50 = vadd.f32 %v1689_v46, %v2132_v41 }
 0x133   : > { %1247 = vst [vmem:[%s2142_s30 + $0x20] sm:$0xff] %v1229_v49  ;;  %v1254_v51 = vadd.f32 %v1253_v36, %v1229_v49  ;;  %v1268_v52 = vmul.f32 %v1229_v49, %v1229_v49  ;;  %v1232_v54 = vadd.f32 %v1729_v48, %v1167_v50  ;;  %v1690_v56 = vpop.f32.mrb[28].mxu0 }
 0x134   : > { %v1730_v57 = vpop.f32.mrb[28].mxu1  ;;  %v1691_v58 = vpop.f32.mrb[29].mxu0 }
 0x135   : > { %v1275_v59 = vadd.f32 %v1274_v27, %v1268_v52  ;;  %1248 = vst [vmem:[%s2142_s30 + $0x28] sm:$0xff] %v1232_v54  ;;  %v1255_v60 = vadd.f32 %v1254_v51, %v1232_v54  ;;  %v1269_v61 = vmul.f32 %v1232_v54, %v1232_v54  ;;  %v1692_v62 = vadd.f32 %v1691_v58, %v1690_v56  ;;  %v1731_v38 = vpop.f32.mrb[29].mxu1  ;;  %v1693_v63 = vpop.f32.mrb[30].mxu0 }
 0x136   : > { %v1732_v0 = vadd.f32 %v1731_v38, %v1730_v57  ;;  %v1733_v1 = vpop.f32.mrb[30].mxu1  ;;  %v1694_v2 = vpop.f32.mrb[31].mxu0 }
 0x137   : > { %v1276_v41 = vadd.f32 %v1275_v59, %v1269_v61  ;;  %v1172_v3 = vadd.f32 %v1692_v62, %v2134_v53  ;;  %v1695_v4 = vadd.f32 %v1694_v2, %v1693_v63  ;;  %v1734_v5 = vpop.f32.mrb[31].mxu1 }
 0x138   : > { %v1735_v6 = vadd.f32 %v1734_v5, %v1733_v1 }
 0x139   : > { %v1237_v7 = vadd.f32 %v1732_v0, %v1172_v3  ;;  %v1175_v8 = vadd.f32 %v1695_v4, %v2136_v55 }
 0x13b   : > { %1249 = vst [vmem:[%s2142_s30 + $0x30] sm:$0xff] %v1237_v7  ;;  %v1256_v9 = vadd.f32 %v1255_v60, %v1237_v7  ;;  %v1270_v10 = vmul.f32 %v1237_v7, %v1237_v7  ;;  %v1240_v12 = vadd.f32 %v1735_v6, %v1175_v8 }
 0x13d   : > { %v1277_v11 = vadd.f32 %v1276_v41, %v1270_v10  ;;  %1250 = vst [vmem:[%s2142_s30 + $0x38] sm:$0xff] %v1240_v12  ;;  %v1257_v14 = vadd.f32 %v1256_v9, %v1240_v12  ;;  %v1271_v15 = vmul.f32 %v1240_v12, %v1240_v12 }
 0x13f   : > { %v1258_v16 = vrot.slane %v1257_v14, 4  ;;  %v1278_v17 = vadd.f32 %v1277_v11, %v1271_v15 }
 0x141   : > { %v1259_v53 = vadd.f32 %v1258_v16, %v1257_v14  ;;  %v1279_v19 = vrot.slane %v1278_v17, 4 }
 0x143   : > { %v1260_v20 = vrot.slane %v1259_v53, 2  ;;  %v1280_v21 = vadd.f32 %v1279_v19, %v1278_v17 }
 0x145   : > { %v1261_v22 = vadd.f32 %v1260_v20, %v1259_v53  ;;  %v1281_v55 = vrot.slane %v1280_v21, 2 }
 0x147   : > { %v1262_v23 = vrot.slane %v1261_v22, 1  ;;  %v1282_v24 = vadd.f32 %v1281_v55, %v1280_v21 }
 0x149   : > { %v1263_v26 = vadd.f32 %v1262_v23, %v1261_v22  ;;  %v1283_v28 = vrot.slane %v1282_v24, 1 }
 0x14b   : > { %v1284_v29 = vadd.f32 %v1283_v28, %v1282_v24  ;;  %v1288_v30 = vsel %vm1287_vm0, %v1263_v26, 0.0 }
 0x14c   : > { %1289 = vst [vmem:[%s270_s7] sm:$0xff] %v1288_v30 }
 0x14d   : > { %v1290_v31 = vsel %vm1287_vm0, %v1284_v29, 0.0 }
 0x14e   : > { %1291 = vst [vmem:[%s277_s10] sm:$0xff] %v1290_v31 }
 0x14f PF: > { %s15_s17 = sadd.s32 1, %s1846_s17   ;;  %s2180_s15 = smov %s1842_s16 }
 0x150   : > { %p12_p6 = scmp.ge.s32.totalorder %s15_s17, 4   ;;  %s2181_s16 = smov %s2183_s18 }
 0x152   :  { %14 = sbr.rel (!%p12_p6) target bundleno = 2 (0x2), region = 85 }

// kernel: cond_cnn_discriminator_forward.16
= control target key start
LH: loop header
LB: loop body
LE: loop exit
PB: predicated region body
PF: predicated region fallthrough
CT: control target
= control target key end

     0   :  { %s340_s12 = smov 0   ;;  %s363_s0 = inlined_call_operand.vmem [shape: f32[32,256], index: 0, kind: input, shape index: {}]   ;;  %s364_s1 = inlined_call_operand.vmem [shape: f32[1,256], index: 1, kind: input, shape index: {}]   ;;  %s365_s2 = inlined_call_operand.vmem [shape: f32[1,256], index: 2, kind: input, shape index: {}]   ;;  %s366_s3 = inlined_call_operand.vmem [shape: f32[32,256], index: 3, kind: output, shape index: {}]  }
   0x1 LB: > { %s289_s13 = sadd.s32 4294967295, %s318_s12   ;;  %p293_p0 = scmp.ge.s32.totalorder %s318_s12, 1  ;;  %s318_s12 = sphi %s340_s12, %s13_s12  }
   0x2   : > { %p139_p1 = scmp.lt.s32.totalorder %s318_s12, 3 }
   0x4   : > { %p140_p2 = pnand %p293_p0, %p139_p1 }
   0x5   : > { %s294_s14 = sshll.u32 (!%p140_p2), %s289_s13, 1  ;;  %v185_v0 = vlaneseq (!%p140_p2)  ;;  %v183_v2 = vld [vmem:[%s364_s1] sm:$0x3] (!%p140_p2) }
   0x6   : > { %143 = sbr.rel (%p140_p2) target bundleno = 26 (0x1a), region = 32  ;;  %p166_p3 = scmp.lt.s32.totalorder (!%p140_p2), %s294_s14, 3  ;;  %v199_v3 = vld [vmem:[%s365_s2] sm:$0x3] (!%p140_p2) }
   0x7   : > { %v186_v1 = vshrl.u32 (!%p140_p2), %v185_v0, 7 }
   0x9   : > { %v187_v4 = vsub.s32 (!%p140_p2), 0, %v186_v1  ;;  %v191_v5 = vsub.s32 (!%p140_p2), 1, %v186_v1 }
   0xb   : > { %v188_v6 = vrot.slane (!%p140_p2), %v183_v2, %v187_v4  ;;  %v204_v7 = vrot.slane (!%p140_p2), %v199_v3, %v187_v4  ;;  %v192_v8 = vrot.slane (!%p140_p2), %v183_v2, %v191_v5  ;;  %v208_v9 = vrot.slane (!%p140_p2), %v199_v3, %v191_v5 }
   0xd   : > { %s368_s14 = smov (!%p166_p3, %s294_s14), 3 }
   0xe   : > { %s302_s19 = sshll.u32 %s368_s14, 4 }
   0xf   : > { %s170_s22 = scalar_lea.vmem %s363_s0, %s302_s19  ;;  %s177_s25 = scalar_lea.vmem %s366_s3, %s302_s19 }
  0x10   : > { %v179_v10 = vld [vmem:[%s170_s22] sm:$0xff]  ;;  %v180_v11 = vld [vmem:[%s170_s22 + $0x8] sm:$0xff]  ;;  %v181_v12 = vld [vmem:[%s170_s22 + $0x10] sm:$0xff] }
  0x11   : > { %v195_v13 = vmul.f32 %v188_v6, %v179_v10  ;;  %v196_v14 = vmul.f32 %v192_v8, %v180_v11  ;;  %v197_v15 = vmul.f32 %v188_v6, %v181_v12  ;;  %v182_v16 = vld [vmem:[%s170_s22 + $0x18] sm:$0xff] }
  0x12   : > { %v198_v17 = vmul.f32 %v192_v8, %v182_v16 }
  0x13   : > { %v211_v18 = vadd.f32 %v204_v7, %v195_v13  ;;  %v212_v19 = vadd.f32 %v208_v9, %v196_v14  ;;  %v213_v20 = vadd.f32 %v204_v7, %v197_v15 }
  0x14   : > { %v214_v21 = vadd.f32 %v208_v9, %v198_v17 }
  0x15   : > { %vm215_vm0 = vcmp.ge.f32.partialorder %v211_v18, 0.0  ;;  %v219_v22 = vmul.f32 0.2, %v211_v18  ;;  %vm216_vm1 = vcmp.ge.f32.partialorder %v212_v19, 0.0  ;;  %v220_v23 = vmul.f32 0.2, %v212_v19 }
  0x16   : > { %vm217_vm2 = vcmp.ge.f32.partialorder %v213_v20, 0.0  ;;  %v221_v24 = vmul.f32 0.2, %v213_v20  ;;  %vm218_vm3 = vcmp.ge.f32.partialorder %v214_v21, 0.0  ;;  %v222_v25 = vmul.f32 0.2, %v214_v21 }
  0x17   : > { %v223_v26 = vsel %vm215_vm0, %v211_v18, %v219_v22  ;;  %v224_v27 = vsel %vm216_vm1, %v212_v19, %v220_v23 }
  0x18   : > { %227 = vst [vmem:[%s177_s25] sm:$0xff] %v223_v26  ;;  %228 = vst [vmem:[%s177_s25 + $0x8] sm:$0xff] %v224_v27  ;;  %v225_v28 = vsel %vm217_vm2, %v213_v20, %v221_v24  ;;  %v226_v29 = vsel %vm218_vm3, %v214_v21, %v222_v25 }
  0x19   : > { %229 = vst [vmem:[%s177_s25 + $0x10] sm:$0xff] %v225_v28  ;;  %230 = vst [vmem:[%s177_s25 + $0x18] sm:$0xff] %v226_v29 }
  0x1a PF: > { %s13_s12 = sadd.s32 1, %s318_s12  }
  0x1b   : > { %p10_p4 = scmp.ge.s32.totalorder %s13_s12, 4  }
  0x1d   :  { %12 = sbr.rel (!%p10_p4) target bundleno = 1 (0x1), region = 62 }

// kernel: cond_cnn_discriminator_forward.15
= control target key start
LH: loop header
LB: loop body
LE: loop exit
PB: predicated region body
PF: predicated region fallthrough
CT: control target
= control target key end

     0   :  { %10 = vsyncpa [#allocation3], 0  ;;  %s4415_s0 = inlined_call_operand.vmem [shape: bf16[32,2048], index: 0, kind: input, shape index: {}]   ;;  %s4416_s1 = inlined_call_operand.vmem [shape: bf16[2048,256], index: 1, kind: input, shape index: {}]   ;;  %s4417_s2 = inlined_call_operand.vmem [shape: f32[32,256], index: 2, kind: output, shape index: {0}]   ;;  %s4418_s3 = inlined_call_operand.hbm [shape: f32[2,8,256], index: 3, kind: output, shape index: {1}]   ;;  %s4419_s4 = inlined_call_operand.hbm [shape: f32[2,8,256], index: 4, kind: output, shape index: {2}]  }
   0x1   :  { %12 = vsyncpa [#allocation3 + $0x1], 0 }
   0x2   :  { %13 = vsyncpa [#allocation5], 0 }
   0x3   :  { %15 = vsyncpa [#allocation5 + $0x1], 0  ;;  %s3421_s15 = smov 0   ;;  %s3423_s16 = smov 0  }
   0x4   :  { %s3425_s17 = smov 0   ;;  %s3427_s18 = smov 0  }
   0x5   :  { %s3429_s19 = smov 0   ;;  %s3431_s20 = smov 0  }
   0x6 LB: > { %s2512_s21 = sadd.s32 4294967295, %s3392_s20   ;;  %s2513_s22 = sadd.s32 4294967294, %s3392_s20   ;;  %s3392_s20 = sphi %s3431_s20, %s21_s20   ;;  %s3388_s19 = sphi %s3429_s19, %s4426_s19   ;;  %s3384_s18 = sphi %s3427_s18, %s4425_s18   ;;  %s3380_s17 = sphi %s3425_s17, %s4424_s17   ;;  %s3376_s16 = sphi %s3423_s16, %s4423_s16   ;;  %s3372_s15 = sphi %s3421_s15, %s4422_s15  }
   0x7   : > { %s33_s23 = sadd.s32 1, %s3388_s19  ;;  %s122_s24 = sadd.s32 1, %s3380_s17 }
   0x8   : > { %p35_p0 = scmp.ge.s32.totalorder %s33_s23, 2  ;;  %p132_p1 = scmp.ne.s32.totalorder %s3380_s17, %s3376_s16 }
   0x9   : > { %p133_p2 = scmp.eq.s32.totalorder %s2512_s21, 1  ;;  %p138_p3 = scmp.ne.s32.totalorder %s3376_s16, %s3372_s15 }
   0xa   : > { %s4428_s23 = smov (%p35_p0, %s33_s23), 0  ;;  %p139_p5 = scmp.eq.s32.totalorder %s2513_s22, 1 }
   0xb   : > { %p3461_p4 = por %p133_p2, %p132_p1  ;;  %s117_s26 = ssub.s32 %s3388_s19, %s4428_s23 }
   0xc   : > { %p2517_p6 = scmp.ge.s32.totalorder %s3392_s20, 1  ;;  %p120_p7 = scmp.eq.s32.totalorder %s117_s26, 0 }
   0xd   : > { %p3468_p8 = por %p139_p5, %p138_p3  ;;  %p204_p9 = scmp.lt.s32.totalorder %s3392_s20, 3 }
   0xe   : > { %s3474_s28 = scalar_select %p120_p7, %s3380_s17, %s122_s24  }
   0xf   : > { %p205_p10 = pnand %p2517_p6, %p204_p9 }
  0x10   : > { %v2898_v0 = vld [vmem:[%s4416_s1 + $0x4] ss:$8 sps:$4 sm:$0xff] (!%p205_p10)   ;;  %v2902_v2 = vld [vmem:[%s4416_s1] ss:$8 sps:$4 sm:$0xff] (!%p205_p10)   ;;  %v2904_v4 = vld [vmem:[%s4416_s1 + $0x14] ss:$8 sps:$4 sm:$0xff] (!%p205_p10)  }
  0x11   : > { %208 = sbr.rel (%p205_p10) target bundleno = 543 (0x21f), region = 28  ;;  %v2900_v1 = vld [vmem:[%s4416_s1 + $0x404] ss:$8 sps:$4 sm:$0xff] (!%p205_p10)   ;;  %1910 = vmatprep.subr.bf16.mxu1 (!%p205_p10), %v2898_v0  ;;  %v2903_v3 = vld [vmem:[%s4416_s1 + $0x400] ss:$8 sps:$4 sm:$0xff] (!%p205_p10)   ;;  %s2520_s21 = sshll.u32 (!%p205_p10), %s3384_s18, 1 }
  0x12   : > { %2082 = vmatprep.subr.bf16.mxu0 (!%p205_p10), %v2900_v1  ;;  %1911 = vmatpush1.bf16.msra.mxu1 (!%p205_p10), %v2902_v2  ;;  %v2906_v5 = vld [vmem:[%s4416_s1 + $0x414] ss:$8 sps:$4 sm:$0xff] (!%p205_p10)   ;;  %v2908_v6 = vld [vmem:[%s4416_s1 + $0x10] ss:$8 sps:$4 sm:$0xff] (!%p205_p10)   ;;  %v2910_v8 = vld [vmem:[%s4416_s1 + $0x24] ss:$8 sps:$4 sm:$0xff] (!%p205_p10)  }
  0x13   : > { %2083 = vmatpush1.bf16.msra.mxu0 (!%p205_p10), %v2903_v3  ;;  %1912 = vmatprep.subr.bf16.mxu1 (!%p205_p10), %v2904_v4  ;;  %v2909_v7 = vld [vmem:[%s4416_s1 + $0x410] ss:$8 sps:$4 sm:$0xff] (!%p205_p10)   ;;  %v2912_v9 = vld [vmem:[%s4416_s1 + $0x424] ss:$8 sps:$4 sm:$0xff] (!%p205_p10)   ;;  %v2914_v10 = vld [vmem:[%s4416_s1 + $0x20] ss:$8 sps:$4 sm:$0xff] (!%p205_p10)  }
  0x14   : > { %2084 = vmatprep.subr.bf16.mxu0 (!%p205_p10), %v2906_v5  ;;  %v2915_v11 = vld [vmem:[%s4416_s1 + $0x420] ss:$8 sps:$4 sm:$0xff] (!%p205_p10)   ;;  %v2916_v12 = vld [vmem:[%s4416_s1 + $0x34] ss:$8 sps:$4 sm:$0xff] (!%p205_p10)   ;;  %v2920_v14 = vld [vmem:[%s4416_s1 + $0x30] ss:$8 sps:$4 sm:$0xff] (!%p205_p10)  }
  0x15   : > { %v2918_v13 = vld [vmem:[%s4416_s1 + $0x434] ss:$8 sps:$4 sm:$0xff] (!%p205_p10)   ;;  %v2921_v15 = vld [vmem:[%s4416_s1 + $0x430] ss:$8 sps:$4 sm:$0xff] (!%p205_p10)   ;;  %v2922_v16 = vld [vmem:[%s4416_s1 + $0x44] ss:$8 sps:$4 sm:$0xff] (!%p205_p10)  }
  0x16   : > { %1913 = vmatpush1.bf16.msra.mxu1 (!%p205_p10), %v2908_v6  ;;  %v2924_v17 = vld [vmem:[%s4416_s1 + $0x444] ss:$8 sps:$4 sm:$0xff] (!%p205_p10)   ;;  %v2926_v18 = vld [vmem:[%s4416_s1 + $0x40] ss:$8 sps:$4 sm:$0xff] (!%p205_p10)   ;;  %v2928_v20 = vld [vmem:[%s4416_s1 + $0x54] ss:$8 sps:$4 sm:$0xff] (!%p205_p10)  }
  0x17   : > { %2085 = vmatpush1.bf16.msra.mxu0 (!%p205_p10), %v2909_v7  ;;  %1914 = vmatprep.subr.bf16.mxu1 (!%p205_p10), %v2910_v8  ;;  %v2927_v19 = vld [vmem:[%s4416_s1 + $0x440] ss:$8 sps:$4 sm:$0xff] (!%p205_p10)   ;;  %v2930_v21 = vld [vmem:[%s4416_s1 + $0x454] ss:$8 sps:$4 sm:$0xff] (!%p205_p10)   ;;  %v2932_v22 = vld [vmem:[%s4416_s1 + $0x50] ss:$8 sps:$4 sm:$0xff] (!%p205_p10)  }
  0x18   : > { %2086 = vmatprep.subr.bf16.mxu0 %v2912_v9  ;;  %v2933_v23 = vld [vmem:[%s4416_s1 + $0x450] ss:$8 sps:$4 sm:$0xff]   ;;  %v2934_v24 = vld [vmem:[%s4416_s1 + $0x64] ss:$8 sps:$4 sm:$0xff]   ;;  %v2938_v26 = vld [vmem:[%s4416_s1 + $0x60] ss:$8 sps:$4 sm:$0xff]  }
  0x19   : > { %v2936_v25 = vld [vmem:[%s4416_s1 + $0x464] ss:$8 sps:$4 sm:$0xff]   ;;  %v2939_v27 = vld [vmem:[%s4416_s1 + $0x460] ss:$8 sps:$4 sm:$0xff]   ;;  %v2940_v28 = vld [vmem:[%s4416_s1 + $0x74] ss:$8 sps:$4 sm:$0xff]  }
  0x1a   : > { %1915 = vmatpush1.bf16.msra.mxu1 %v2914_v10  ;;  %v2942_v29 = vld [vmem:[%s4416_s1 + $0x474] ss:$8 sps:$4 sm:$0xff]   ;;  %v2944_v30 = vld [vmem:[%s4416_s1 + $0x70] ss:$8 sps:$4 sm:$0xff]   ;;  %v2946_v32 = vld [vmem:[%s4416_s1 + $0x84] ss:$8 sps:$4 sm:$0xff]  }
  0x1b   : > { %2087 = vmatpush1.bf16.msra.mxu0 %v2915_v11  ;;  %1916 = vmatprep.subr.bf16.mxu1 %v2916_v12  ;;  %v2945_v31 = vld [vmem:[%s4416_s1 + $0x470] ss:$8 sps:$4 sm:$0xff]   ;;  %p252_p11 = scmp.lt.s32.totalorder %s2520_s21, 3  ;;  %v2948_v33 = vld [vmem:[%s4416_s1 + $0x484] ss:$8 sps:$4 sm:$0xff]   ;;  %s2808_s26 = sshll.u32 %s3384_s18, 8 }
  0x1c   : > { %2088 = vmatprep.subr.bf16.mxu0 %v2918_v13  ;;  %v2950_v34 = vld [vmem:[%s4416_s1 + $0x80] ss:$8 sps:$4 sm:$0xff]   ;;  %v2952_v36 = vld [vmem:[%s4416_s1 + $0x94] ss:$8 sps:$4 sm:$0xff]   ;;  %v2956_v38 = vld [vmem:[%s4416_s1 + $0x90] ss:$8 sps:$4 sm:$0xff]   ;;  %s4333_s9 = scalar_lea.hbm %s4418_s3, %s2808_s26  ;;  %s4342_s11 = scalar_lea.hbm %s4419_s4, %s2808_s26 }
  0x1d   : > { %v2951_v35 = vld [vmem:[%s4416_s1 + $0x480] ss:$8 sps:$4 sm:$0xff]   ;;  %s4430_s21 = smov (!%p252_p11, %s2520_s21), 3  ;;  %v2954_v37 = vld [vmem:[%s4416_s1 + $0x494] ss:$8 sps:$4 sm:$0xff]   ;;  %s3394_s14 = smov [#allocation2]  }
  0x1e   : > { %1917 = vmatpush1.bf16.msra.mxu1 %v2920_v14  ;;  %v2957_v39 = vld [vmem:[%s4416_s1 + $0x490] ss:$8 sps:$4 sm:$0xff]   ;;  %v2958_v40 = vld [vmem:[%s4416_s1 + $0xa4] ss:$8 sps:$4 sm:$0xff]   ;;  %s2806_s7 = sshll.u32 %s4430_s21, 6  ;;  %s2807_s12 = sshll.u32 %s4430_s21, 4 }
  0x1f   : > { %2089 = vmatpush1.bf16.msra.mxu0 %v2921_v15  ;;  %1918 = vmatprep.subr.bf16.mxu1 %v2922_v16  ;;  %v2960_v41 = vld [vmem:[%s4416_s1 + $0x4a4] ss:$8 sps:$4 sm:$0xff]   ;;  %v2962_v42 = vld [vmem:[%s4416_s1 + $0xa0] ss:$8 sps:$4 sm:$0xff]   ;;  %s3615_s24 = scalar_lea.vmem %s4415_s0, %s2806_s7  ;;  %v2964_v44 = vld [vmem:[%s4416_s1 + $0xb4] ss:$8 sps:$4 sm:$0xff]   ;;  %s273_s22 = scalar_lea.vmem %s4417_s2, %s2807_s12 }
  0x20   : > { %2090 = vmatprep.subr.bf16.mxu0 %v2924_v17  ;;  %v2963_v43 = vld [vmem:[%s4416_s1 + $0x4a0] ss:$8 sps:$4 sm:$0xff]   ;;  %v2966_v45 = vld [vmem:[%s4416_s1 + $0x4b4] ss:$8 sps:$4 sm:$0xff]   ;;  %v2968_v46 = vld [vmem:[%s4416_s1 + $0xb0] ss:$8 sps:$4 sm:$0xff]  }
  0x21   : > { %v2969_v47 = vld [vmem:[%s4416_s1 + $0x4b0] ss:$8 sps:$4 sm:$0xff]   ;;  %v278_v48 = vld [vmem:[%s3615_s24] sm:$0xff]  ;;  %v2976_v58 = vld [vmem:[%s4416_s1 + $0xd4] ss:$8 sps:$4 sm:$0xff]   ;;  %s4322_s21 = sand.u32 1, %s3376_s16  }
  0x22   : > { %1919 = vmatpush1.bf16.msra.mxu1 %v2926_v18  ;;  %v286_v49 = vld [vmem:[%s3615_s24 + $0x40] sm:$0xff]  ;;  %v2978_v59 = vld [vmem:[%s4416_s1 + $0x4d4] ss:$8 sps:$4 sm:$0xff]   ;;  %v2980_v60 = vld [vmem:[%s4416_s1 + $0xd0] ss:$8 sps:$4 sm:$0xff]   ;;  %s2312_s12 = scalar_lea.sflag [#allocation3], %s4322_s21 }
  0x23   : > { %2091 = vmatpush1.bf16.msra.mxu0 %v2927_v19  ;;  %1920 = vmatprep.subr.bf16.mxu1 %v2928_v20  ;;  %v2970_v50 = vld [vmem:[%s4416_s1 + $0xc4] ss:$8 sps:$4 sm:$0xff]   ;;  %v2527_v52 = vcombine.high %v278_v48, %v286_v49  ;;  %v2974_v56 = vld [vmem:[%s4416_s1 + $0xc0] ss:$8 sps:$4 sm:$0xff]   ;;  %v2981_v61 = vld [vmem:[%s4416_s1 + $0x4d0] ss:$8 sps:$4 sm:$0xff]   ;;  %v2526_v8 = vcombine.low %v278_v48, %v286_v49 }
  0x24   : > { %2092 = vmatprep.subr.bf16.mxu0 %v2930_v21  ;;  %v2972_v51 = vld [vmem:[%s4416_s1 + $0x4c4] ss:$8 sps:$4 sm:$0xff]   ;;  %v2975_v57 = vld [vmem:[%s4416_s1 + $0x4c0] ss:$8 sps:$4 sm:$0xff]   ;;  %v2988_v2 = vld [vmem:[%s4416_s1 + $0xf4] ss:$8 sps:$4 sm:$0xff]  }
  0x25   : > { %v282_v53 = vld [vmem:[%s3615_s24 + $0x20] sm:$0xff]  ;;  %1942 = vmatprep.mubr.bf16.mxu1 %v2527_v52  ;;  %v2990_v3 = vld [vmem:[%s4416_s1 + $0x4f4] ss:$8 sps:$4 sm:$0xff]   ;;  %v2992_v4 = vld [vmem:[%s4416_s1 + $0xf0] ss:$8 sps:$4 sm:$0xff]  }
  0x26   : > { %1921 = vmatpush1.bf16.msra.mxu1 %v2932_v22  ;;  %v290_v54 = vld [vmem:[%s3615_s24 + $0x60] sm:$0xff]  ;;  %v2993_v5 = vld [vmem:[%s4416_s1 + $0x4f0] ss:$8 sps:$4 sm:$0xff]   ;;  %v3002_v12 = vld [vmem:[%s4416_s1 + $0x114] ss:$8 sps:$4 sm:$0xff]  }
  0x27   : > { %2093 = vmatpush1.bf16.msra.mxu0 %v2933_v23  ;;  %1922 = vmatprep.subr.bf16.mxu1 %v2934_v24  ;;  %v2535_v55 = vcombine.high %v282_v53, %v290_v54  ;;  %v2982_v62 = vld [vmem:[%s4416_s1 + $0xe4] ss:$8 sps:$4 sm:$0xff]   ;;  %v2986_v0 = vld [vmem:[%s4416_s1 + $0xe0] ss:$8 sps:$4 sm:$0xff]   ;;  %v2534_v10 = vcombine.low %v282_v53, %v290_v54  ;;  %v3005_v13 = vld [vmem:[%s4416_s1 + $0x514] ss:$8 sps:$4 sm:$0xff]  }
  0x28   : > { %2094 = vmatprep.subr.bf16.mxu0 %v2936_v25  ;;  %v2984_v63 = vld [vmem:[%s4416_s1 + $0x4e4] ss:$8 sps:$4 sm:$0xff]   ;;  %v2987_v1 = vld [vmem:[%s4416_s1 + $0x4e0] ss:$8 sps:$4 sm:$0xff]   ;;  %v3000_v14 = vld [vmem:[%s4416_s1 + $0x110] ss:$8 sps:$4 sm:$0xff]  }
  0x29   : > { %2114 = vmatprep.mubr.bf16.mxu0 %v2535_v55  ;;  %v2996_v6 = vld [vmem:[%s4416_s1 + $0x104] ss:$8 sps:$4 sm:$0xff]   ;;  %v2994_v9 = vld [vmem:[%s4416_s1 + $0x100] ss:$8 sps:$4 sm:$0xff]   ;;  %v3003_v15 = vld [vmem:[%s4416_s1 + $0x510] ss:$8 sps:$4 sm:$0xff]  }
  0x2a   : > { %1923 = vmatpush1.bf16.msra.mxu1 %v2938_v26  ;;  %v2999_v7 = vld [vmem:[%s4416_s1 + $0x504] ss:$8 sps:$4 sm:$0xff]   ;;  %v2997_v11 = vld [vmem:[%s4416_s1 + $0x500] ss:$8 sps:$4 sm:$0xff]   ;;  %v3014_v20 = vld [vmem:[%s4416_s1 + $0x134] ss:$8 sps:$4 sm:$0xff]  }
  0x2b   : > { %2095 = vmatpush1.bf16.msra.mxu0 %v2939_v27  ;;  %1924 = vmatprep.subr.bf16.mxu1 %v2940_v28  ;;  %v3008_v16 = vld [vmem:[%s4416_s1 + $0x124] ss:$8 sps:$4 sm:$0xff]   ;;  %v3006_v18 = vld [vmem:[%s4416_s1 + $0x120] ss:$8 sps:$4 sm:$0xff]   ;;  %v3017_v21 = vld [vmem:[%s4416_s1 + $0x534] ss:$8 sps:$4 sm:$0xff]  }
  0x2c   : > { %2096 = vmatprep.subr.bf16.mxu0 %v2942_v29  ;;  %v3011_v17 = vld [vmem:[%s4416_s1 + $0x524] ss:$8 sps:$4 sm:$0xff]   ;;  %v3009_v19 = vld [vmem:[%s4416_s1 + $0x520] ss:$8 sps:$4 sm:$0xff]   ;;  %v3012_v22 = vld [vmem:[%s4416_s1 + $0x130] ss:$8 sps:$4 sm:$0xff]  }
  0x2d   : > { %v3015_v23 = vld [vmem:[%s4416_s1 + $0x530] ss:$8 sps:$4 sm:$0xff]   ;;  %v3020_v24 = vld [vmem:[%s4416_s1 + $0x144] ss:$8 sps:$4 sm:$0xff]   ;;  %v3018_v26 = vld [vmem:[%s4416_s1 + $0x140] ss:$8 sps:$4 sm:$0xff]  }
  0x2e   : > { %1925 = vmatpush1.bf16.msra.mxu1 %v2944_v30  ;;  %v3023_v25 = vld [vmem:[%s4416_s1 + $0x544] ss:$8 sps:$4 sm:$0xff]   ;;  %v3021_v27 = vld [vmem:[%s4416_s1 + $0x540] ss:$8 sps:$4 sm:$0xff]   ;;  %v3026_v28 = vld [vmem:[%s4416_s1 + $0x154] ss:$8 sps:$4 sm:$0xff]  }
  0x2f   : > { %2097 = vmatpush1.bf16.msra.mxu0 %v2945_v31  ;;  %1926 = vmatprep.subr.bf16.mxu1 %v2946_v32  ;;  %v3029_v29 = vld [vmem:[%s4416_s1 + $0x554] ss:$8 sps:$4 sm:$0xff]   ;;  %v3024_v30 = vld [vmem:[%s4416_s1 + $0x150] ss:$8 sps:$4 sm:$0xff]   ;;  %v3032_v32 = vld [vmem:[%s4416_s1 + $0x164] ss:$8 sps:$4 sm:$0xff]  }
  0x30   : > { %2098 = vmatprep.subr.bf16.mxu0 %v2948_v33  ;;  %v3027_v31 = vld [vmem:[%s4416_s1 + $0x550] ss:$8 sps:$4 sm:$0xff]   ;;  %v3035_v33 = vld [vmem:[%s4416_s1 + $0x564] ss:$8 sps:$4 sm:$0xff]   ;;  %v3042_v48 = vld [vmem:[%s4416_s1 + $0x180] ss:$8 sps:$4 sm:$0xff]  }
  0x31   : > { %v3045_v49 = vld [vmem:[%s4416_s1 + $0x580] ss:$8 sps:$4 sm:$0xff]   ;;  %v3048_v52 = vld [vmem:[%s4416_s1 + $0x190] ss:$8 sps:$4 sm:$0xff]   ;;  %v3056_v54 = vld [vmem:[%s4416_s1 + $0x1a4] ss:$8 sps:$4 sm:$0xff]  }
  0x32   : > { %1927 = vmatpush1.bf16.msra.mxu1 %v2950_v34  ;;  %v3030_v34 = vld [vmem:[%s4416_s1 + $0x160] ss:$8 sps:$4 sm:$0xff]   ;;  %v3051_v53 = vld [vmem:[%s4416_s1 + $0x590] ss:$8 sps:$4 sm:$0xff]   ;;  %v3059_v55 = vld [vmem:[%s4416_s1 + $0x5a4] ss:$8 sps:$4 sm:$0xff]  }
  0x33   : > { %2099 = vmatpush1.bf16.msra.mxu0 %v2951_v35  ;;  %1928 = vmatprep.subr.bf16.mxu1 %v2952_v36  ;;  %v3033_v35 = vld [vmem:[%s4416_s1 + $0x560] ss:$8 sps:$4 sm:$0xff]  }
  0x34   : > { %2100 = vmatprep.subr.bf16.mxu0 %v2954_v37  ;;  %v3766_v36 = vld [vmem:[%s3615_s24 + $0x8] sm:$0xff] }
  0x35   : > { %v3769_v37 = vld [vmem:[%s3615_s24 + $0x48] sm:$0xff] }
  0x36   : > { %1929 = vmatpush1.bf16.msra.mxu1 %v2956_v38  ;;  %v3038_v38 = vld [vmem:[%s4416_s1 + $0x174] ss:$8 sps:$4 sm:$0xff]  }
  0x37   : > { %2101 = vmatpush1.bf16.msra.mxu0 %v2957_v39  ;;  %1930 = vmatprep.subr.bf16.mxu1 %v2958_v40  ;;  %v3041_v39 = vld [vmem:[%s4416_s1 + $0x574] ss:$8 sps:$4 sm:$0xff]   ;;  %v2529_v40 = vcombine.high %v3766_v36, %v3769_v37 }
  0x38   : > { %2102 = vmatprep.subr.bf16.mxu0 %v2960_v41  ;;  %v3780_v41 = vld [vmem:[%s3615_s24 + $0x28] sm:$0xff] }
  0x3a   : > { %1931 = vmatpush1.bf16.msra.mxu1 %v2962_v42  ;;  %v3783_v42 = vld [vmem:[%s3615_s24 + $0x68] sm:$0xff] }
  0x3b   : > { %2103 = vmatpush1.bf16.msra.mxu0 %v2963_v43  ;;  %1932 = vmatprep.subr.bf16.mxu1 %v2964_v44  ;;  %v2537_v43 = vcombine.high %v3780_v41, %v3783_v42  ;;  %v3036_v44 = vld [vmem:[%s4416_s1 + $0x170] ss:$8 sps:$4 sm:$0xff]  }
  0x3c   : > { %2104 = vmatprep.subr.bf16.mxu0 %v2966_v45  ;;  %v3039_v45 = vld [vmem:[%s4416_s1 + $0x570] ss:$8 sps:$4 sm:$0xff]  }
  0x3e   : > { %1933 = vmatpush1.bf16.msra.mxu1 %v2968_v46  ;;  %v3044_v46 = vld [vmem:[%s4416_s1 + $0x184] ss:$8 sps:$4 sm:$0xff]  }
  0x3f   : > { %2105 = vmatpush1.bf16.msra.mxu0 %v2969_v47  ;;  %1934 = vmatprep.subr.bf16.mxu1 %v2970_v50  ;;  %v3047_v47 = vld [vmem:[%s4416_s1 + $0x584] ss:$8 sps:$4 sm:$0xff]   ;;  %v3050_v50 = vld [vmem:[%s4416_s1 + $0x194] ss:$8 sps:$4 sm:$0xff]  }
  0x40   : > { %2106 = vmatprep.subr.bf16.mxu0 %v2972_v51  ;;  %v3053_v51 = vld [vmem:[%s4416_s1 + $0x594] ss:$8 sps:$4 sm:$0xff]  }
  0x42   : > { %1935 = vmatpush1.bf16.msra.mxu1 %v2974_v56  ;;  %v3054_v56 = vld [vmem:[%s4416_s1 + $0x1a0] ss:$8 sps:$4 sm:$0xff]  }
  0x43   : > { %2107 = vmatpush1.bf16.msra.mxu0 %v2975_v57  ;;  %1936 = vmatprep.subr.bf16.mxu1 %v2976_v58  ;;  %v3057_v57 = vld [vmem:[%s4416_s1 + $0x5a0] ss:$8 sps:$4 sm:$0xff]   ;;  %v3062_v58 = vld [vmem:[%s4416_s1 + $0x1b4] ss:$8 sps:$4 sm:$0xff]  }
  0x44   : > { %2108 = vmatprep.subr.bf16.mxu0 %v2978_v59  ;;  %v3065_v59 = vld [vmem:[%s4416_s1 + $0x5b4] ss:$8 sps:$4 sm:$0xff]  }
  0x46   : > { %1937 = vmatpush1.bf16.msra.mxu1 %v2980_v60  ;;  %v3060_v60 = vld [vmem:[%s4416_s1 + $0x1b0] ss:$8 sps:$4 sm:$0xff]  }
  0x47   : > { %2109 = vmatpush1.bf16.msra.mxu0 %v2981_v61  ;;  %1938 = vmatprep.subr.bf16.mxu1 %v2982_v62  ;;  %v3063_v61 = vld [vmem:[%s4416_s1 + $0x5b0] ss:$8 sps:$4 sm:$0xff]   ;;  %v3068_v62 = vld [vmem:[%s4416_s1 + $0x1c4] ss:$8 sps:$4 sm:$0xff]  }
  0x48   : > { %2110 = vmatprep.subr.bf16.mxu0 %v2984_v63  ;;  %v3071_v63 = vld [vmem:[%s4416_s1 + $0x5c4] ss:$8 sps:$4 sm:$0xff]  }
  0x4a   : > { %1939 = vmatpush1.bf16.msra.mxu1 %v2986_v0  ;;  %v3066_v0 = vld [vmem:[%s4416_s1 + $0x1c0] ss:$8 sps:$4 sm:$0xff]  }
  0x4b   : > { %2111 = vmatpush1.bf16.msra.mxu0 %v2987_v1  ;;  %1940 = vmatprep.subr.bf16.mxu1 %v2988_v2  ;;  %v3069_v1 = vld [vmem:[%s4416_s1 + $0x5c0] ss:$8 sps:$4 sm:$0xff]   ;;  %v3074_v2 = vld [vmem:[%s4416_s1 + $0x1d4] ss:$8 sps:$4 sm:$0xff]  }
  0x4c   : > { %2112 = vmatprep.subr.bf16.mxu0 %v2990_v3  ;;  %v3077_v3 = vld [vmem:[%s4416_s1 + $0x5d4] ss:$8 sps:$4 sm:$0xff]  }
  0x4e   : > { %1941 = vmatpush1.bf16.msra.mxu1 %v2992_v4  ;;  %v3072_v4 = vld [vmem:[%s4416_s1 + $0x1d0] ss:$8 sps:$4 sm:$0xff]  }
  0x4f   : > { %2113 = vmatpush1.bf16.msra.mxu0 %v2993_v5  ;;  %1953 = vmatprep.subr.bf16.mxu1 %v2996_v6  ;;  %v3075_v5 = vld [vmem:[%s4416_s1 + $0x5d0] ss:$8 sps:$4 sm:$0xff]   ;;  %v3080_v6 = vld [vmem:[%s4416_s1 + $0x1e4] ss:$8 sps:$4 sm:$0xff]  }
  0x50   : > { %2125 = vmatprep.subr.bf16.mxu0 %v2999_v7  ;;  %v3083_v7 = vld [vmem:[%s4416_s1 + $0x5e4] ss:$8 sps:$4 sm:$0xff]  }
  0x51   : > { %1943 = vmatmul.mubr.bf16.vlgmr.msra.gmra.mrb[0].mxu1 %v2526_v8  ;;  %v3078_v8 = vld [vmem:[%s4416_s1 + $0x1e0] ss:$8 sps:$4 sm:$0xff]  }
  0x52   : > { %2115 = vmatmul.mubr.bf16.vlgmr.msra.gmra.mrb[0].mxu0 %v2534_v10  ;;  %1954 = vmatpush1.bf16.msra.mxu1 %v2994_v9  ;;  %v3081_v9 = vld [vmem:[%s4416_s1 + $0x5e0] ss:$8 sps:$4 sm:$0xff]   ;;  %v3086_v10 = vld [vmem:[%s4416_s1 + $0x1f4] ss:$8 sps:$4 sm:$0xff]  }
  0x53   : > { %2126 = vmatpush1.bf16.msra.mxu0 %v2997_v11  ;;  %1955 = vmatprep.subr.bf16.mxu1 %v3002_v12  ;;  %v3089_v11 = vld [vmem:[%s4416_s1 + $0x5f4] ss:$8 sps:$4 sm:$0xff]   ;;  %v3084_v12 = vld [vmem:[%s4416_s1 + $0x1f0] ss:$8 sps:$4 sm:$0xff]  }
  0x54   : > { %2127 = vmatprep.subr.bf16.mxu0 %v3005_v13  ;;  %1985 = vmatprep.mubr.bf16.mxu1 %v2529_v40  ;;  %v3087_v13 = vld [vmem:[%s4416_s1 + $0x5f0] ss:$8 sps:$4 sm:$0xff]   ;;  %v3114_v40 = vld [vmem:[%s4416_s1 + $0x240] ss:$8 sps:$4 sm:$0xff]  }
  0x55   : > { %2157 = vmatprep.mubr.bf16.mxu0 %v2537_v43  ;;  %v3125_v43 = vld [vmem:[%s4416_s1 + $0x654] ss:$8 sps:$4 sm:$0xff]  }
  0x56   : > { %1956 = vmatpush1.bf16.msra.mxu1 %v3000_v14  ;;  %v3092_v14 = vld [vmem:[%s4416_s1 + $0x204] ss:$8 sps:$4 sm:$0xff]  }
  0x57   : > { %2128 = vmatpush1.bf16.msra.mxu0 %v3003_v15  ;;  %1957 = vmatprep.subr.bf16.mxu1 %v3008_v16  ;;  %v3095_v15 = vld [vmem:[%s4416_s1 + $0x604] ss:$8 sps:$4 sm:$0xff]   ;;  %v2528_v16 = vcombine.low %v3766_v36, %v3769_v37  ;;  %v3108_v36 = vld [vmem:[%s4416_s1 + $0x230] ss:$8 sps:$4 sm:$0xff]  }
  0x58   : > { %2129 = vmatprep.subr.bf16.mxu0 %v3011_v17  ;;  %v3090_v17 = vld [vmem:[%s4416_s1 + $0x200] ss:$8 sps:$4 sm:$0xff]   ;;  %v3111_v37 = vld [vmem:[%s4416_s1 + $0x630] ss:$8 sps:$4 sm:$0xff]  }
  0x5a   : > { %1958 = vmatpush1.bf16.msra.mxu1 %v3006_v18  ;;  %v2536_v18 = vcombine.low %v3780_v41, %v3783_v42  ;;  %v3117_v41 = vld [vmem:[%s4416_s1 + $0x640] ss:$8 sps:$4 sm:$0xff]   ;;  %v3122_v42 = vld [vmem:[%s4416_s1 + $0x254] ss:$8 sps:$4 sm:$0xff]  }
  0x5b   : > { %2130 = vmatpush1.bf16.msra.mxu0 %v3009_v19  ;;  %1959 = vmatprep.subr.bf16.mxu1 %v3014_v20  ;;  %v3093_v19 = vld [vmem:[%s4416_s1 + $0x600] ss:$8 sps:$4 sm:$0xff]   ;;  %v3098_v20 = vld [vmem:[%s4416_s1 + $0x214] ss:$8 sps:$4 sm:$0xff]  }
  0x5c   : > { %2131 = vmatprep.subr.bf16.mxu0 %v3017_v21  ;;  %v3101_v21 = vld [vmem:[%s4416_s1 + $0x614] ss:$8 sps:$4 sm:$0xff]  }
  0x5e   : > { %1960 = vmatpush1.bf16.msra.mxu1 %v3012_v22  ;;  %v3096_v22 = vld [vmem:[%s4416_s1 + $0x210] ss:$8 sps:$4 sm:$0xff]  }
  0x5f   : > { %2132 = vmatpush1.bf16.msra.mxu0 %v3015_v23  ;;  %1961 = vmatprep.subr.bf16.mxu1 %v3020_v24  ;;  %v3099_v23 = vld [vmem:[%s4416_s1 + $0x610] ss:$8 sps:$4 sm:$0xff]  }
  0x60   : > { %2133 = vmatprep.subr.bf16.mxu0 %v3023_v25  ;;  %v3918_v24 = vld [vmem:[%s3615_s24 + $0x10] sm:$0xff] }
  0x61   : > { %v3921_v25 = vld [vmem:[%s3615_s24 + $0x50] sm:$0xff] }
  0x62   : > { %1962 = vmatpush1.bf16.msra.mxu1 %v3018_v26  ;;  %v3104_v26 = vld [vmem:[%s4416_s1 + $0x224] ss:$8 sps:$4 sm:$0xff]  }
  0x63   : > { %2134 = vmatpush1.bf16.msra.mxu0 %v3021_v27  ;;  %1963 = vmatprep.subr.bf16.mxu1 %v3026_v28  ;;  %v3107_v27 = vld [vmem:[%s4416_s1 + $0x624] ss:$8 sps:$4 sm:$0xff]   ;;  %v2531_v28 = vcombine.high %v3918_v24, %v3921_v25 }
  0x64   : > { %2135 = vmatprep.subr.bf16.mxu0 %v3029_v29  ;;  %v3932_v29 = vld [vmem:[%s3615_s24 + $0x30] sm:$0xff] }
  0x66   : > { %1964 = vmatpush1.bf16.msra.mxu1 %v3024_v30  ;;  %v3935_v30 = vld [vmem:[%s3615_s24 + $0x70] sm:$0xff] }
  0x67   : > { %2136 = vmatpush1.bf16.msra.mxu0 %v3027_v31  ;;  %1965 = vmatprep.subr.bf16.mxu1 %v3032_v32  ;;  %v2539_v31 = vcombine.high %v3932_v29, %v3935_v30  ;;  %v3102_v32 = vld [vmem:[%s4416_s1 + $0x220] ss:$8 sps:$4 sm:$0xff]  }
  0x68   : > { %2137 = vmatprep.subr.bf16.mxu0 %v3035_v33  ;;  %v3105_v33 = vld [vmem:[%s4416_s1 + $0x620] ss:$8 sps:$4 sm:$0xff]  }
  0x6a   : > { %1966 = vmatpush1.bf16.msra.mxu1 %v3030_v34  ;;  %v3110_v34 = vld [vmem:[%s4416_s1 + $0x234] ss:$8 sps:$4 sm:$0xff]  }
  0x6b   : > { %2138 = vmatpush1.bf16.msra.mxu0 %v3033_v35  ;;  %1967 = vmatprep.subr.bf16.mxu1 %v3038_v38  ;;  %v3113_v35 = vld [vmem:[%s4416_s1 + $0x634] ss:$8 sps:$4 sm:$0xff]   ;;  %v3116_v38 = vld [vmem:[%s4416_s1 + $0x244] ss:$8 sps:$4 sm:$0xff]  }
  0x6c   : > { %2139 = vmatprep.subr.bf16.mxu0 %v3041_v39  ;;  %v3119_v39 = vld [vmem:[%s4416_s1 + $0x644] ss:$8 sps:$4 sm:$0xff]  }
  0x6e   : > { %1968 = vmatpush1.bf16.msra.mxu1 %v3036_v44  ;;  %v3120_v44 = vld [vmem:[%s4416_s1 + $0x250] ss:$8 sps:$4 sm:$0xff]  }
  0x6f   : > { %2140 = vmatpush1.bf16.msra.mxu0 %v3039_v45  ;;  %1969 = vmatprep.subr.bf16.mxu1 %v3044_v46  ;;  %v3123_v45 = vld [vmem:[%s4416_s1 + $0x650] ss:$8 sps:$4 sm:$0xff]   ;;  %v3128_v46 = vld [vmem:[%s4416_s1 + $0x264] ss:$8 sps:$4 sm:$0xff]  }
  0x70   : > { %2141 = vmatprep.subr.bf16.mxu0 %v3047_v47  ;;  %v3131_v47 = vld [vmem:[%s4416_s1 + $0x664] ss:$8 sps:$4 sm:$0xff]  }
  0x72   : > { %1970 = vmatpush1.bf16.msra.mxu1 %v3042_v48  ;;  %v3126_v48 = vld [vmem:[%s4416_s1 + $0x260] ss:$8 sps:$4 sm:$0xff]  }
  0x73   : > { %2142 = vmatpush1.bf16.msra.mxu0 %v3045_v49  ;;  %1971 = vmatprep.subr.bf16.mxu1 %v3050_v50  ;;  %v3129_v49 = vld [vmem:[%s4416_s1 + $0x660] ss:$8 sps:$4 sm:$0xff]   ;;  %v3134_v50 = vld [vmem:[%s4416_s1 + $0x274] ss:$8 sps:$4 sm:$0xff]  }
  0x74   : > { %2143 = vmatprep.subr.bf16.mxu0 %v3053_v51  ;;  %v3137_v51 = vld [vmem:[%s4416_s1 + $0x674] ss:$8 sps:$4 sm:$0xff]  }
  0x76   : > { %1972 = vmatpush1.bf16.msra.mxu1 %v3048_v52  ;;  %v3132_v52 = vld [vmem:[%s4416_s1 + $0x270] ss:$8 sps:$4 sm:$0xff]  }
  0x77   : > { %2144 = vmatpush1.bf16.msra.mxu0 %v3051_v53  ;;  %1973 = vmatprep.subr.bf16.mxu1 %v3056_v54  ;;  %v3135_v53 = vld [vmem:[%s4416_s1 + $0x670] ss:$8 sps:$4 sm:$0xff]   ;;  %v3140_v54 = vld [vmem:[%s4416_s1 + $0x284] ss:$8 sps:$4 sm:$0xff]  }
  0x78   : > { %2145 = vmatprep.subr.bf16.mxu0 %v3059_v55  ;;  %v3143_v55 = vld [vmem:[%s4416_s1 + $0x684] ss:$8 sps:$4 sm:$0xff]  }
  0x7a   : > { %1974 = vmatpush1.bf16.msra.mxu1 %v3054_v56  ;;  %v3138_v56 = vld [vmem:[%s4416_s1 + $0x280] ss:$8 sps:$4 sm:$0xff]  }
  0x7b   : > { %2146 = vmatpush1.bf16.msra.mxu0 %v3057_v57  ;;  %1975 = vmatprep.subr.bf16.mxu1 %v3062_v58  ;;  %v3141_v57 = vld [vmem:[%s4416_s1 + $0x680] ss:$8 sps:$4 sm:$0xff]   ;;  %v3146_v58 = vld [vmem:[%s4416_s1 + $0x294] ss:$8 sps:$4 sm:$0xff]  }
  0x7c   : > { %2147 = vmatprep.subr.bf16.mxu0 %v3065_v59  ;;  %v3149_v59 = vld [vmem:[%s4416_s1 + $0x694] ss:$8 sps:$4 sm:$0xff]  }
  0x7e   : > { %1976 = vmatpush1.bf16.msra.mxu1 %v3060_v60  ;;  %v3144_v60 = vld [vmem:[%s4416_s1 + $0x290] ss:$8 sps:$4 sm:$0xff]  }
  0x7f   : > { %2148 = vmatpush1.bf16.msra.mxu0 %v3063_v61  ;;  %1977 = vmatprep.subr.bf16.mxu1 %v3068_v62  ;;  %v3147_v61 = vld [vmem:[%s4416_s1 + $0x690] ss:$8 sps:$4 sm:$0xff]   ;;  %v3152_v62 = vld [vmem:[%s4416_s1 + $0x2a4] ss:$8 sps:$4 sm:$0xff]  }
  0x80   : > { %2149 = vmatprep.subr.bf16.mxu0 %v3071_v63  ;;  %v3155_v63 = vld [vmem:[%s4416_s1 + $0x6a4] ss:$8 sps:$4 sm:$0xff]  }
  0x82   : > { %1978 = vmatpush1.bf16.msra.mxu1 %v3066_v0  ;;  %v3150_v0 = vld [vmem:[%s4416_s1 + $0x2a0] ss:$8 sps:$4 sm:$0xff]  }
  0x83   : > { %2150 = vmatpush1.bf16.msra.mxu0 %v3069_v1  ;;  %1979 = vmatprep.subr.bf16.mxu1 %v3074_v2  ;;  %v3153_v1 = vld [vmem:[%s4416_s1 + $0x6a0] ss:$8 sps:$4 sm:$0xff]   ;;  %v3158_v2 = vld [vmem:[%s4416_s1 + $0x2b4] ss:$8 sps:$4 sm:$0xff]  }
  0x84   : > { %2151 = vmatprep.subr.bf16.mxu0 %v3077_v3  ;;  %v3161_v3 = vld [vmem:[%s4416_s1 + $0x6b4] ss:$8 sps:$4 sm:$0xff]  }
  0x86   : > { %1980 = vmatpush1.bf16.msra.mxu1 %v3072_v4  ;;  %v3156_v4 = vld [vmem:[%s4416_s1 + $0x2b0] ss:$8 sps:$4 sm:$0xff]  }
  0x87   : > { %2152 = vmatpush1.bf16.msra.mxu0 %v3075_v5  ;;  %1981 = vmatprep.subr.bf16.mxu1 %v3080_v6  ;;  %v3159_v5 = vld [vmem:[%s4416_s1 + $0x6b0] ss:$8 sps:$4 sm:$0xff]   ;;  %v3164_v6 = vld [vmem:[%s4416_s1 + $0x2c4] ss:$8 sps:$4 sm:$0xff]  }
  0x88   : > { %2153 = vmatprep.subr.bf16.mxu0 %v3083_v7  ;;  %v3167_v7 = vld [vmem:[%s4416_s1 + $0x6c4] ss:$8 sps:$4 sm:$0xff]  }
  0x8a   : > { %1982 = vmatpush1.bf16.msra.mxu1 %v3078_v8  ;;  %v3162_v8 = vld [vmem:[%s4416_s1 + $0x2c0] ss:$8 sps:$4 sm:$0xff]  }
  0x8b   : > { %2154 = vmatpush1.bf16.msra.mxu0 %v3081_v9  ;;  %1983 = vmatprep.subr.bf16.mxu1 %v3086_v10  ;;  %v3165_v9 = vld [vmem:[%s4416_s1 + $0x6c0] ss:$8 sps:$4 sm:$0xff]   ;;  %v3170_v10 = vld [vmem:[%s4416_s1 + $0x2d4] ss:$8 sps:$4 sm:$0xff]  }
  0x8c   : > { %2155 = vmatprep.subr.bf16.mxu0 %v3089_v11  ;;  %v3173_v11 = vld [vmem:[%s4416_s1 + $0x6d4] ss:$8 sps:$4 sm:$0xff]  }
  0x8e   : > { %1984 = vmatpush1.bf16.msra.mxu1 %v3084_v12  ;;  %v3168_v12 = vld [vmem:[%s4416_s1 + $0x2d0] ss:$8 sps:$4 sm:$0xff]  }
  0x8f   : > { %2156 = vmatpush1.bf16.msra.mxu0 %v3087_v13  ;;  %1996 = vmatprep.subr.bf16.mxu1 %v3092_v14  ;;  %v3171_v13 = vld [vmem:[%s4416_s1 + $0x6d0] ss:$8 sps:$4 sm:$0xff]   ;;  %v3176_v14 = vld [vmem:[%s4416_s1 + $0x2e4] ss:$8 sps:$4 sm:$0xff]  }
  0x90   : > { %2168 = vmatprep.subr.bf16.mxu0 %v3095_v15  ;;  %v3179_v15 = vld [vmem:[%s4416_s1 + $0x6e4] ss:$8 sps:$4 sm:$0xff]  }
  0x91   : > { %1986 = vmatmul.mubr.bf16.vlgmr.msra.gmra.mrb[0].mxu1 %v2528_v16  ;;  %v3174_v16 = vld [vmem:[%s4416_s1 + $0x2e0] ss:$8 sps:$4 sm:$0xff]  }
  0x92   : > { %2158 = vmatmul.mubr.bf16.vlgmr.msra.gmra.mrb[0].mxu0 %v2536_v18  ;;  %1997 = vmatpush1.bf16.msra.mxu1 %v3090_v17  ;;  %v3177_v17 = vld [vmem:[%s4416_s1 + $0x6e0] ss:$8 sps:$4 sm:$0xff]   ;;  %v3182_v18 = vld [vmem:[%s4416_s1 + $0x2f4] ss:$8 sps:$4 sm:$0xff]  }
  0x93   : > { %2169 = vmatpush1.bf16.msra.mxu0 %v3093_v19  ;;  %1998 = vmatprep.subr.bf16.mxu1 %v3098_v20  ;;  %v3185_v19 = vld [vmem:[%s4416_s1 + $0x6f4] ss:$8 sps:$4 sm:$0xff]   ;;  %v3180_v20 = vld [vmem:[%s4416_s1 + $0x2f0] ss:$8 sps:$4 sm:$0xff]  }
  0x94   : > { %2170 = vmatprep.subr.bf16.mxu0 %v3101_v21  ;;  %2028 = vmatprep.mubr.bf16.mxu1 %v2531_v28  ;;  %v3183_v21 = vld [vmem:[%s4416_s1 + $0x6f0] ss:$8 sps:$4 sm:$0xff]   ;;  %v2538_v28 = vcombine.low %v3932_v29, %v3935_v30 }
  0x95   : > { %2200 = vmatprep.mubr.bf16.mxu0 %v2539_v31  ;;  %v4115_v31 = vld [vmem:[%s3615_s24 + $0x58] sm:$0xff] }
  0x96   : > { %1999 = vmatpush1.bf16.msra.mxu1 %v3096_v22  ;;  %v3188_v22 = vld [vmem:[%s4416_s1 + $0x304] ss:$8 sps:$4 sm:$0xff]  }
  0x97   : > { %2171 = vmatpush1.bf16.msra.mxu0 %v3099_v23  ;;  %2000 = vmatprep.subr.bf16.mxu1 %v3104_v26  ;;  %v3191_v23 = vld [vmem:[%s4416_s1 + $0x704] ss:$8 sps:$4 sm:$0xff]   ;;  %v4108_v26 = vld [vmem:[%s3615_s24 + $0x18] sm:$0xff] }
  0x98   : > { %2172 = vmatprep.subr.bf16.mxu0 %v3107_v27  ;;  %v2530_v27 = vcombine.low %v3918_v24, %v3921_v25  ;;  %v3194_v24 = vld [vmem:[%s4416_s1 + $0x314] ss:$8 sps:$4 sm:$0xff]   ;;  %v2533_v29 = vcombine.high %v4108_v26, %v4115_v31 }
  0x99   : > { %v3197_v25 = vld [vmem:[%s4416_s1 + $0x714] ss:$8 sps:$4 sm:$0xff]  }
  0x9a   : > { %2001 = vmatpush1.bf16.msra.mxu1 %v3102_v32  ;;  %v4118_v32 = vld [vmem:[%s3615_s24 + $0x38] sm:$0xff] }
  0x9b   : > { %2173 = vmatpush1.bf16.msra.mxu0 %v3105_v33  ;;  %2002 = vmatprep.subr.bf16.mxu1 %v3110_v34  ;;  %v4121_v33 = vld [vmem:[%s3615_s24 + $0x78] sm:$0xff]  ;;  %v3186_v34 = vld [vmem:[%s4416_s1 + $0x300] ss:$8 sps:$4 sm:$0xff]   ;;  %s2518_s24 = sshll.u32 %s4322_s21, 4 }
  0x9c   : > { %2174 = vmatprep.subr.bf16.mxu0 %v3113_v35  ;;  %v3189_v35 = vld [vmem:[%s4416_s1 + $0x700] ss:$8 sps:$4 sm:$0xff]   ;;  %v2541_v30 = vcombine.high %v4118_v32, %v4121_v33  ;;  %s243_s29 = scalar_lea.vmem [#allocation2], %s2518_s24  ;;  %s4326_s5 = scalar_lea.vmem [#allocation4], %s2518_s24 }
  0x9d   : > { %s2338_s30 = sshll.u32 %s243_s29, 4  ;;  %s2354_s6 = sshll.u32 %s4326_s5, 4  ;;  %s4335_s30 = int_to_ptr.vmem [resolvable:$true] %s2338_s30  ;;  %s4344_s6 = int_to_ptr.vmem [resolvable:$true] %s2354_s6 }
  0x9e   : > { %2003 = vmatpush1.bf16.msra.mxu1 %v3108_v36  ;;  %v3192_v36 = vld [vmem:[%s4416_s1 + $0x310] ss:$8 sps:$4 sm:$0xff]   ;;  %s3282_s13 = scalar_lea.vmem %s4335_s30, 256 }
  0x9f   : > { %2175 = vmatpush1.bf16.msra.mxu0 %v3111_v37  ;;  %2004 = vmatprep.subr.bf16.mxu1 %v3116_v38  ;;  %v3195_v37 = vld [vmem:[%s4416_s1 + $0x710] ss:$8 sps:$4 sm:$0xff]   ;;  %v3200_v38 = vld [vmem:[%s4416_s1 + $0x324] ss:$8 sps:$4 sm:$0xff]   ;;  %p3283_p12 = scmp.ne.s32.totalorder %s4335_s30, %s3282_s13 }
  0xa0   : > { %2176 = vmatprep.subr.bf16.mxu0 %v3119_v39  ;;  %v3203_v39 = vld [vmem:[%s4416_s1 + $0x724] ss:$8 sps:$4 sm:$0xff]  }
  0xa1   : > { %p3284_p13 = pnand %p3283_p12, %p3461_p4 }
  0xa2   : > { %2005 = vmatpush1.bf16.msra.mxu1 %v3114_v40  ;;  %v3198_v40 = vld [vmem:[%s4416_s1 + $0x320] ss:$8 sps:$4 sm:$0xff]  }
  0xa3   : > { %2177 = vmatpush1.bf16.msra.mxu0 %v3117_v41  ;;  %2006 = vmatprep.subr.bf16.mxu1 %v3122_v42  ;;  %v3201_v41 = vld [vmem:[%s4416_s1 + $0x720] ss:$8 sps:$4 sm:$0xff]   ;;  %v3206_v42 = vld [vmem:[%s4416_s1 + $0x334] ss:$8 sps:$4 sm:$0xff]   ;;  %p3285_p0 = pneg %p3284_p13 }
  0xa4   : > { %2178 = vmatprep.subr.bf16.mxu0 %v3125_v43  ;;  %v3209_v43 = vld [vmem:[%s4416_s1 + $0x734] ss:$8 sps:$4 sm:$0xff]  }
  0xa6   : > { %2007 = vmatpush1.bf16.msra.mxu1 %v3120_v44  ;;  %v3204_v44 = vld [vmem:[%s4416_s1 + $0x330] ss:$8 sps:$4 sm:$0xff]  }
  0xa7   : > { %2179 = vmatpush1.bf16.msra.mxu0 %v3123_v45  ;;  %2008 = vmatprep.subr.bf16.mxu1 %v3128_v46  ;;  %v3207_v45 = vld [vmem:[%s4416_s1 + $0x730] ss:$8 sps:$4 sm:$0xff]   ;;  %v3212_v46 = vld [vmem:[%s4416_s1 + $0x344] ss:$8 sps:$4 sm:$0xff]  }
  0xa8   : > { %2180 = vmatprep.subr.bf16.mxu0 %v3131_v47  ;;  %v3215_v47 = vld [vmem:[%s4416_s1 + $0x744] ss:$8 sps:$4 sm:$0xff]  }
  0xaa   : > { %2009 = vmatpush1.bf16.msra.mxu1 %v3126_v48  ;;  %v3210_v48 = vld [vmem:[%s4416_s1 + $0x340] ss:$8 sps:$4 sm:$0xff]  }
  0xab   : > { %2181 = vmatpush1.bf16.msra.mxu0 %v3129_v49  ;;  %2010 = vmatprep.subr.bf16.mxu1 %v3134_v50  ;;  %v3213_v49 = vld [vmem:[%s4416_s1 + $0x740] ss:$8 sps:$4 sm:$0xff]   ;;  %v3218_v50 = vld [vmem:[%s4416_s1 + $0x354] ss:$8 sps:$4 sm:$0xff]  }
  0xac   : > { %2182 = vmatprep.subr.bf16.mxu0 %v3137_v51  ;;  %v3221_v51 = vld [vmem:[%s4416_s1 + $0x754] ss:$8 sps:$4 sm:$0xff]  }
  0xae   : > { %2011 = vmatpush1.bf16.msra.mxu1 %v3132_v52  ;;  %v3216_v52 = vld [vmem:[%s4416_s1 + $0x350] ss:$8 sps:$4 sm:$0xff]  }
  0xaf   : > { %2183 = vmatpush1.bf16.msra.mxu0 %v3135_v53  ;;  %2012 = vmatprep.subr.bf16.mxu1 %v3140_v54  ;;  %v3219_v53 = vld [vmem:[%s4416_s1 + $0x750] ss:$8 sps:$4 sm:$0xff]   ;;  %v3224_v54 = vld [vmem:[%s4416_s1 + $0x364] ss:$8 sps:$4 sm:$0xff]  }
  0xb0   : > { %2184 = vmatprep.subr.bf16.mxu0 %v3143_v55  ;;  %v3227_v55 = vld [vmem:[%s4416_s1 + $0x764] ss:$8 sps:$4 sm:$0xff]  }
  0xb2   : > { %2013 = vmatpush1.bf16.msra.mxu1 %v3138_v56  ;;  %v3222_v56 = vld [vmem:[%s4416_s1 + $0x360] ss:$8 sps:$4 sm:$0xff]  }
  0xb3   : > { %2185 = vmatpush1.bf16.msra.mxu0 %v3141_v57  ;;  %2014 = vmatprep.subr.bf16.mxu1 %v3146_v58  ;;  %v3225_v57 = vld [vmem:[%s4416_s1 + $0x760] ss:$8 sps:$4 sm:$0xff]   ;;  %v3230_v58 = vld [vmem:[%s4416_s1 + $0x374] ss:$8 sps:$4 sm:$0xff]  }
  0xb4   : > { %2186 = vmatprep.subr.bf16.mxu0 %v3149_v59  ;;  %v3233_v59 = vld [vmem:[%s4416_s1 + $0x774] ss:$8 sps:$4 sm:$0xff]  }
  0xb6   : > { %2015 = vmatpush1.bf16.msra.mxu1 %v3144_v60  ;;  %v3228_v60 = vld [vmem:[%s4416_s1 + $0x370] ss:$8 sps:$4 sm:$0xff]  }
  0xb7   : > { %2187 = vmatpush1.bf16.msra.mxu0 %v3147_v61  ;;  %2016 = vmatprep.subr.bf16.mxu1 %v3152_v62  ;;  %v3231_v61 = vld [vmem:[%s4416_s1 + $0x770] ss:$8 sps:$4 sm:$0xff]   ;;  %v3236_v62 = vld [vmem:[%s4416_s1 + $0x384] ss:$8 sps:$4 sm:$0xff]  }
  0xb8   : > { %2188 = vmatprep.subr.bf16.mxu0 %v3155_v63  ;;  %v3239_v63 = vld [vmem:[%s4416_s1 + $0x784] ss:$8 sps:$4 sm:$0xff]  }
  0xba   : > { %2017 = vmatpush1.bf16.msra.mxu1 %v3150_v0  ;;  %v3234_v0 = vld [vmem:[%s4416_s1 + $0x380] ss:$8 sps:$4 sm:$0xff]  }
  0xbb   : > { %2189 = vmatpush1.bf16.msra.mxu0 %v3153_v1  ;;  %2018 = vmatprep.subr.bf16.mxu1 %v3158_v2  ;;  %v3237_v1 = vld [vmem:[%s4416_s1 + $0x780] ss:$8 sps:$4 sm:$0xff]   ;;  %v3242_v2 = vld [vmem:[%s4416_s1 + $0x394] ss:$8 sps:$4 sm:$0xff]  }
  0xbc   : > { %2190 = vmatprep.subr.bf16.mxu0 %v3161_v3  ;;  %v3245_v3 = vld [vmem:[%s4416_s1 + $0x794] ss:$8 sps:$4 sm:$0xff]  }
  0xbe   : > { %2019 = vmatpush1.bf16.msra.mxu1 %v3156_v4  ;;  %v3240_v4 = vld [vmem:[%s4416_s1 + $0x390] ss:$8 sps:$4 sm:$0xff]  }
  0xbf   : > { %2191 = vmatpush1.bf16.msra.mxu0 %v3159_v5  ;;  %2020 = vmatprep.subr.bf16.mxu1 %v3164_v6  ;;  %v3243_v5 = vld [vmem:[%s4416_s1 + $0x790] ss:$8 sps:$4 sm:$0xff]   ;;  %v3248_v6 = vld [vmem:[%s4416_s1 + $0x3a4] ss:$8 sps:$4 sm:$0xff]  }
  0xc0   : > { %2192 = vmatprep.subr.bf16.mxu0 %v3167_v7  ;;  %v3251_v7 = vld [vmem:[%s4416_s1 + $0x7a4] ss:$8 sps:$4 sm:$0xff]  }
  0xc2   : > { %2021 = vmatpush1.bf16.msra.mxu1 %v3162_v8  ;;  %v3246_v8 = vld [vmem:[%s4416_s1 + $0x3a0] ss:$8 sps:$4 sm:$0xff]  }
  0xc3   : > { %2193 = vmatpush1.bf16.msra.mxu0 %v3165_v9  ;;  %2022 = vmatprep.subr.bf16.mxu1 %v3170_v10  ;;  %v3249_v9 = vld [vmem:[%s4416_s1 + $0x7a0] ss:$8 sps:$4 sm:$0xff]   ;;  %v3254_v10 = vld [vmem:[%s4416_s1 + $0x3b4] ss:$8 sps:$4 sm:$0xff]  }
  0xc4   : > { %2194 = vmatprep.subr.bf16.mxu0 %v3173_v11  ;;  %v3257_v11 = vld [vmem:[%s4416_s1 + $0x7b4] ss:$8 sps:$4 sm:$0xff]  }
  0xc6   : > { %2023 = vmatpush1.bf16.msra.mxu1 %v3168_v12  ;;  %v3252_v12 = vld [vmem:[%s4416_s1 + $0x3b0] ss:$8 sps:$4 sm:$0xff]  }
  0xc7   : > { %2195 = vmatpush1.bf16.msra.mxu0 %v3171_v13  ;;  %2024 = vmatprep.subr.bf16.mxu1 %v3176_v14  ;;  %v3255_v13 = vld [vmem:[%s4416_s1 + $0x7b0] ss:$8 sps:$4 sm:$0xff]   ;;  %v3260_v14 = vld [vmem:[%s4416_s1 + $0x3c4] ss:$8 sps:$4 sm:$0xff]  }
  0xc8   : > { %2196 = vmatprep.subr.bf16.mxu0 %v3179_v15  ;;  %v3263_v15 = vld [vmem:[%s4416_s1 + $0x7c4] ss:$8 sps:$4 sm:$0xff]  }
  0xca   : > { %2025 = vmatpush1.bf16.msra.mxu1 %v3174_v16  ;;  %v3258_v16 = vld [vmem:[%s4416_s1 + $0x3c0] ss:$8 sps:$4 sm:$0xff]  }
  0xcb   : > { %2197 = vmatpush1.bf16.msra.mxu0 %v3177_v17  ;;  %2026 = vmatprep.subr.bf16.mxu1 %v3182_v18  ;;  %v3261_v17 = vld [vmem:[%s4416_s1 + $0x7c0] ss:$8 sps:$4 sm:$0xff]   ;;  %v3266_v18 = vld [vmem:[%s4416_s1 + $0x3d4] ss:$8 sps:$4 sm:$0xff]  }
  0xcc   : > { %2198 = vmatprep.subr.bf16.mxu0 %v3185_v19  ;;  %v3269_v19 = vld [vmem:[%s4416_s1 + $0x7d4] ss:$8 sps:$4 sm:$0xff]  }
  0xce   : > { %2027 = vmatpush1.bf16.msra.mxu1 %v3180_v20  ;;  %v3264_v20 = vld [vmem:[%s4416_s1 + $0x3d0] ss:$8 sps:$4 sm:$0xff]  }
  0xcf   : > { %2199 = vmatpush1.bf16.msra.mxu0 %v3183_v21  ;;  %2039 = vmatprep.subr.bf16.mxu1 %v3188_v22  ;;  %v3267_v21 = vld [vmem:[%s4416_s1 + $0x7d0] ss:$8 sps:$4 sm:$0xff]   ;;  %v3272_v22 = vld [vmem:[%s4416_s1 + $0x3e4] ss:$8 sps:$4 sm:$0xff]  }
  0xd0   : > { %2211 = vmatprep.subr.bf16.mxu0 %v3191_v23  ;;  %v3275_v23 = vld [vmem:[%s4416_s1 + $0x7e4] ss:$8 sps:$4 sm:$0xff]  }
  0xd1   : > { %2029 = vmatmul.mubr.bf16.vlgmr.msra.gmra.mrb[0].mxu1 %v2530_v27  ;;  %v3270_v27 = vld [vmem:[%s4416_s1 + $0x3e0] ss:$8 sps:$4 sm:$0xff]  }
  0xd2   : > { %2201 = vmatmul.mubr.bf16.vlgmr.msra.gmra.mrb[0].mxu0 %v2538_v28  ;;  %2040 = vmatpush1.bf16.msra.mxu1 %v3186_v34  ;;  %v3273_v28 = vld [vmem:[%s4416_s1 + $0x7e0] ss:$8 sps:$4 sm:$0xff]   ;;  %v3278_v34 = vld [vmem:[%s4416_s1 + $0x3f4] ss:$8 sps:$4 sm:$0xff]  }
  0xd3   : > { %2212 = vmatpush1.bf16.msra.mxu0 %v3189_v35  ;;  %2041 = vmatprep.subr.bf16.mxu1 %v3194_v24  ;;  %v3281_v35 = vld [vmem:[%s4416_s1 + $0x7f4] ss:$8 sps:$4 sm:$0xff]   ;;  %v3276_v24 = vld [vmem:[%s4416_s1 + $0x3f0] ss:$8 sps:$4 sm:$0xff]  }
  0xd4   : > { %2213 = vmatprep.subr.bf16.mxu0 %v3197_v25  ;;  %2071 = vmatprep.mubr.bf16.mxu1 %v2533_v29  ;;  %v3279_v25 = vld [vmem:[%s4416_s1 + $0x7f0] ss:$8 sps:$4 sm:$0xff]   ;;  %v2532_v29 = vcombine.low %v4108_v26, %v4115_v31 }
  0xd5   : > { %2243 = vmatprep.mubr.bf16.mxu0 %v2541_v30  ;;  %v2540_v30 = vcombine.low %v4118_v32, %v4121_v33 }
  0xd6   : > { %2042 = vmatpush1.bf16.msra.mxu1 %v3192_v36 }
  0xd7   : > { %2214 = vmatpush1.bf16.msra.mxu0 %v3195_v37  ;;  %2043 = vmatprep.subr.bf16.mxu1 %v3200_v38 }
  0xd8   : > { %2215 = vmatprep.subr.bf16.mxu0 %v3203_v39 }
  0xda   : > { %2044 = vmatpush1.bf16.msra.mxu1 %v3198_v40 }
  0xdb   : > { %2216 = vmatpush1.bf16.msra.mxu0 %v3201_v41  ;;  %2045 = vmatprep.subr.bf16.mxu1 %v3206_v42 }
  0xdc   : > { %2217 = vmatprep.subr.bf16.mxu0 %v3209_v43 }
  0xde   : > { %2046 = vmatpush1.bf16.msra.mxu1 %v3204_v44 }
  0xdf   : > { %2218 = vmatpush1.bf16.msra.mxu0 %v3207_v45  ;;  %2047 = vmatprep.subr.bf16.mxu1 %v3212_v46 }
  0xe0   : > { %2219 = vmatprep.subr.bf16.mxu0 %v3215_v47 }
  0xe2   : > { %2048 = vmatpush1.bf16.msra.mxu1 %v3210_v48 }
  0xe3   : > { %2220 = vmatpush1.bf16.msra.mxu0 %v3213_v49  ;;  %2049 = vmatprep.subr.bf16.mxu1 %v3218_v50 }
  0xe4   : > { %2221 = vmatprep.subr.bf16.mxu0 %v3221_v51 }
  0xe6   : > { %2050 = vmatpush1.bf16.msra.mxu1 %v3216_v52 }
  0xe7   : > { %2222 = vmatpush1.bf16.msra.mxu0 %v3219_v53  ;;  %2051 = vmatprep.subr.bf16.mxu1 %v3224_v54  ;;  %v2290_v54 = vlaneseq }
  0xe8   : > { %2223 = vmatprep.subr.bf16.mxu0 %v3227_v55 }
  0xea   : > { %2052 = vmatpush1.bf16.msra.mxu1 %v3222_v56 }
  0xeb   : > { %2224 = vmatpush1.bf16.msra.mxu0 %v3225_v57  ;;  %2053 = vmatprep.subr.bf16.mxu1 %v3230_v58 }
  0xec   : > { %2225 = vmatprep.subr.bf16.mxu0 %v3233_v59 }
  0xee   : > { %2054 = vmatpush1.bf16.msra.mxu1 %v3228_v60 }
  0xef   : > { %2226 = vmatpush1.bf16.msra.mxu0 %v3231_v61  ;;  %2055 = vmatprep.subr.bf16.mxu1 %v3236_v62 }
  0xf0   : > { %2227 = vmatprep.subr.bf16.mxu0 %v3239_v63  ;;  %v2291_v63 = vshrl.u32 %v2290_v54, 7 }
  0xf2   : > { %2056 = vmatpush1.bf16.msra.mxu1 %v3234_v0  ;;  %vm2292_vm0 = vcmp.eq.s32.totalorder %v2291_v63, 0 }
  0xf3   : > { %2228 = vmatpush1.bf16.msra.mxu0 %v3237_v1  ;;  %2057 = vmatprep.subr.bf16.mxu1 %v3242_v2 }
  0xf4   : > { %2229 = vmatprep.subr.bf16.mxu0 %v3245_v3 }
  0xf6   : > { %2058 = vmatpush1.bf16.msra.mxu1 %v3240_v4 }
  0xf7   : > { %2230 = vmatpush1.bf16.msra.mxu0 %v3243_v5  ;;  %2059 = vmatprep.subr.bf16.mxu1 %v3248_v6 }
  0xf8   : > { %2231 = vmatprep.subr.bf16.mxu0 %v3251_v7 }
  0xfa   : > { %2060 = vmatpush1.bf16.msra.mxu1 %v3246_v8 }
  0xfb   : > { %2232 = vmatpush1.bf16.msra.mxu0 %v3249_v9  ;;  %2061 = vmatprep.subr.bf16.mxu1 %v3254_v10 }
  0xfc   : > { %2233 = vmatprep.subr.bf16.mxu0 %v3257_v11 }
  0xfe   : > { %2062 = vmatpush1.bf16.msra.mxu1 %v3252_v12 }
  0xff   : > { %2234 = vmatpush1.bf16.msra.mxu0 %v3255_v13  ;;  %2063 = vmatprep.subr.bf16.mxu1 %v3260_v14 }
 0x100   : > { %2235 = vmatprep.subr.bf16.mxu0 %v3263_v15 }
 0x102   : > { %2064 = vmatpush1.bf16.msra.mxu1 %v3258_v16 }
 0x103   : > { %2236 = vmatpush1.bf16.msra.mxu0 %v3261_v17  ;;  %2065 = vmatprep.subr.bf16.mxu1 %v3266_v18 }
 0x104   : > { %2237 = vmatprep.subr.bf16.mxu0 %v3269_v19 }
 0x106   : > { %2066 = vmatpush1.bf16.msra.mxu1 %v3264_v20 }
 0x107   : > { %2238 = vmatpush1.bf16.msra.mxu0 %v3267_v21  ;;  %2067 = vmatprep.subr.bf16.mxu1 %v3272_v22 }
 0x108   : > { %2239 = vmatprep.subr.bf16.mxu0 %v3275_v23 }
 0x10a   : > { %2068 = vmatpush1.bf16.msra.mxu1 %v3270_v27 }
 0x10b   : > { %2240 = vmatpush1.bf16.msra.mxu0 %v3273_v28  ;;  %2069 = vmatprep.subr.bf16.mxu1 %v3278_v34 }
 0x10c   : > { %2241 = vmatprep.subr.bf16.mxu0 %v3281_v35 }
 0x10e   : > { %2070 = vmatpush1.bf16.msra.mxu1 %v3276_v24 }
 0x10f   : > { %2242 = vmatpush1.bf16.msra.mxu0 %v3279_v25 }
 0x111   : > { %2072 = vmatmul.mubr.bf16.vlgmr.msra.gmra.mrb[0].mxu1 %v2532_v29 }
 0x112   : > { %2244 = vmatmul.mubr.bf16.vlgmr.msra.gmra.mrb[0].mxu0 %v2540_v30 }
 0x1e4   : > { %v2073_v36 = vpop.f32.mrb[0].mxu1 }
 0x1e5   : > { %v2245_v37 = vpop.f32.mrb[0].mxu0  ;;  %v2075_v39 = vpop.f32.mrb[1].mxu1 }
 0x1e6   : > { %v2810_v38 = vadd.f32 %v2245_v37, %v2073_v36  ;;  %v2247_v40 = vpop.f32.mrb[1].mxu0  ;;  %v2077_v42 = vpop.f32.mrb[2].mxu1 }
 0x1e7   : > { %v2811_v41 = vadd.f32 %v2247_v40, %v2075_v39  ;;  %v2249_v26 = vpop.f32.mrb[2].mxu0  ;;  %v2079_v32 = vpop.f32.mrb[3].mxu1 }
 0x1e8   : > { %2254 = vst [vmem:[%s273_s22] sm:$0xff] %v2810_v38  ;;  %v2812_v31 = vadd.f32 %v2249_v26, %v2077_v42  ;;  %v2251_v33 = vpop.f32.mrb[3].mxu0  ;;  %v2272_v44 = vmul.f32 %v2810_v38, %v2810_v38 }
 0x1e9   : > { %2255 = vst [vmem:[%s273_s22 + $0x8] sm:$0xff] %v2811_v41  ;;  %v2813_v43 = vadd.f32 %v2251_v33, %v2079_v32  ;;  %v2273_v47 = vmul.f32 %v2811_v41, %v2811_v41 }
 0x1ea   : > { %2256 = vst [vmem:[%s273_s22 + $0x10] sm:$0xff] %v2812_v31  ;;  %v2258_v45 = vadd.f32 %v2812_v31, %v2810_v38  ;;  %v2274_v46 = vmul.f32 %v2812_v31, %v2812_v31 }
 0x1eb   : > { %2257 = vst [vmem:[%s273_s22 + $0x18] sm:$0xff] %v2813_v43  ;;  %v2265_v48 = vadd.f32 %v2813_v43, %v2811_v41  ;;  %v2275_v49 = vmul.f32 %v2813_v43, %v2813_v43  ;;  %s3286_s22 = sshll.u32 %s3394_s14, 4  ;;  %s3287_s22 = int_to_ptr.vmem [resolvable:$false] %s3286_s22 }
 0x1ec   : > { %v2259_v50 = vrot.slane %v2258_v45, 4  ;;  %v2276_v51 = vadd.f32 %v2274_v46, %v2272_v44  ;;  %s3288_s24 = scalar_lea.vmem %s3287_s22, 512  ;;  %p3289_p1 = scmp.lt.s32.totalorder %s4335_s30, %s3287_s22 }
 0x1ed   : > { %v2266_v52 = vrot.slane %v2265_v48, 4  ;;  %v2283_v53 = vadd.f32 %v2275_v49, %v2273_v47  ;;  %p3290_p2 = scmp.lt.s32.totalorder %s3288_s24, %s3282_s13 }
 0x1ee   : > { %v2260_v55 = vadd.f32 %v2259_v50, %v2258_v45  ;;  %v2277_v56 = vrot.slane %v2276_v51, 4 }
 0x1ef   : > { %v2267_v57 = vadd.f32 %v2266_v52, %v2265_v48  ;;  %v2284_v58 = vrot.slane %v2283_v53, 4  ;;  %p3291_p3 = por %p3290_p2, %p3289_p1 }
 0x1f0   : > { %v2261_v59 = vrot.slane %v2260_v55, 2  ;;  %v2278_v60 = vadd.f32 %v2277_v56, %v2276_v51 }
 0x1f1   : > { %v2268_v61 = vrot.slane %v2267_v57, 2  ;;  %v2285_v62 = vadd.f32 %v2284_v58, %v2283_v53  ;;  %p3292_p5 = pnand %p3291_p3, %p3285_p0 }
 0x1f2   : > { %v2262_v0 = vadd.f32 %v2261_v59, %v2260_v55  ;;  %v2279_v1 = vrot.slane %v2278_v60, 2 }
 0x1f3   : > { %v2269_v2 = vadd.f32 %v2268_v61, %v2267_v57  ;;  %v2286_v3 = vrot.slane %v2285_v62, 2 }
 0x1f4   : > { %v2263_v4 = vrot.slane %v2262_v0, 1  ;;  %v2280_v5 = vadd.f32 %v2279_v1, %v2278_v60 }
 0x1f5   : > { %v2270_v6 = vrot.slane %v2269_v2, 1  ;;  %v2287_v7 = vadd.f32 %v2286_v3, %v2285_v62 }
 0x1f6   : > { %v2264_v8 = vadd.f32 %v2263_v4, %v2262_v0  ;;  %v2281_v9 = vrot.slane %v2280_v5, 1 }
 0x1f7   : > { %v2271_v10 = vadd.f32 %v2270_v6, %v2269_v2  ;;  %v2288_v11 = vrot.slane %v2287_v7, 1 }
 0x1f8   : > { %v2293_v12 = vsel %vm2292_vm0, %v2264_v8, 0.0  ;;  %v2282_v13 = vadd.f32 %v2281_v9, %v2280_v5 }
 0x1f9   : > { %v2294_v14 = vsel %vm2292_vm0, %v2271_v10, 0.0  ;;  %2295 = vst [vmem:[%s243_s29] sm:$0xff] %v2293_v12  ;;  %v2289_v15 = vadd.f32 %v2288_v11, %v2287_v7 }
 0x1fa   : > { %2296 = vst [vmem:[%s243_s29 + $0x8] sm:$0xff] %v2294_v14  ;;  %v2297_v16 = vsel %vm2292_vm0, %v2282_v13, 0.0 }
 0x1fb   : > { %3295 = shalt.err (!%p3292_p5)
}
 0x1fc   : > { %s3296_s26 = scalar_lea.hbm %s4333_s9, 256  ;;  %s3300_s7 = scalar_lea.hbm %s4418_s3, 512 }
 0x1fd   : > { %p3297_p6 = scmp.ne.s32.totalorder %s4333_s9, %s3296_s26  ;;  %p3301_p10 = scmp.lt.u32.totalorder %s4333_s9, %s4418_s3 }
 0x1fe   : > { %p3302_p11 = scmp.lt.u32.totalorder %s3300_s7, %s3296_s26  ;;  %p3304_p13 = scmp.lt.u32.totalorder %s3296_s26, %s4333_s9 }
 0x1ff   : > { %p3298_p7 = pnand %p3297_p6, %p3461_p4 }
 0x200   : > { %p3303_p12 = por %p3302_p11, %p3301_p10 }
 0x201   : > { %p3299_p9 = pneg %p3298_p7 }
 0x202   : > { %p3305_p0 = por %p3304_p13, %p3303_p12 }
 0x204   : > { %p3306_p1 = pnand %p3305_p0, %p3299_p9 }
 0x206   : > { %3309 = shalt.err (!%p3306_p1)
}
 0x207   : > { %2838 = dma.vmem_to_hbm [thread:$0]  (%p3461_p4), %s4335_s30, 256, %s4333_s9, %s2312_s12   ;;  %v2298_v17 = vsel %vm2292_vm0, %v2289_v15, 0.0  ;;  %2299 = vst [vmem:[%s4326_s5] sm:$0xff] %v2297_v16 }
 0x208   : > { %2300 = vst [vmem:[%s4326_s5 + $0x8] sm:$0xff] %v2298_v17  ;;  %s2317_s13 = scalar_lea.sflag [#allocation5], %s4322_s21  ;;  %s3310_s14 = scalar_lea.vmem %s4344_s6, 256 }
 0x209   : > { %p3311_p2 = scmp.ne.s32.totalorder %s4344_s6, %s3310_s14  ;;  %s3395_s22 = smov [#allocation4]  }
 0x20a   : > { %s3314_s24 = sshll.u32 %s3395_s22, 4  ;;  %s3315_s24 = int_to_ptr.vmem [resolvable:$false] %s3314_s24 }
 0x20b   : > { %p3312_p3 = pnand %p3311_p2, %p3461_p4  ;;  %s3316_s26 = scalar_lea.vmem %s3315_s24, 512 }
 0x20c   : > { %p3317_p6 = scmp.lt.s32.totalorder %s4344_s6, %s3315_s24  ;;  %p3318_p7 = scmp.lt.s32.totalorder %s3316_s26, %s3310_s14 }
 0x20d   : > { %p3313_p5 = pneg %p3312_p3 }
 0x20e   : > { %p3319_p9 = por %p3318_p7, %p3317_p6 }
 0x210   : > { %p3320_p10 = pnand %p3319_p9, %p3313_p5 }
 0x212   : > { %3323 = shalt.err (!%p3320_p10)
}
 0x213   : > { %s3324_s21 = scalar_lea.hbm %s4342_s11, 256  ;;  %s3328_s9 = scalar_lea.hbm %s4419_s4, 512 }
 0x214   : > { %p3325_p11 = scmp.ne.s32.totalorder %s4342_s11, %s3324_s21  ;;  %p3329_p0 = scmp.lt.u32.totalorder %s4342_s11, %s4419_s4 }
 0x215   : > { %p3330_p1 = scmp.lt.u32.totalorder %s3328_s9, %s3324_s21  ;;  %p3332_p3 = scmp.lt.u32.totalorder %s3324_s21, %s4342_s11 }
 0x216   : > { %p3326_p12 = pnand %p3325_p11, %p3461_p4 }
 0x217   : > { %p3331_p2 = por %p3330_p1, %p3329_p0 }
 0x218   : > { %p3327_p13 = pneg %p3326_p12 }
 0x219   : > { %p3333_p5 = por %p3332_p3, %p3331_p2 }
 0x21b   : > { %p3334_p6 = pnand %p3333_p5, %p3327_p13 }
 0x21d   : > { %3337 = shalt.err (!%p3334_p6)
}
 0x21e   : > { %2839 = dma.vmem_to_hbm [thread:$0]  (%p3461_p4), %s4344_s6, 256, %s4342_s11, %s2317_s13  }
 0x21f PF: > { %p2849_p7 = scmp.ge.s32.totalorder %s3392_s20, 2  ;;  %s2379_s8 = sand.u32 1, %s3372_s15  }
 0x220   : > { %s2380_s7 = scalar_lea.sflag [#allocation3], %s2379_s8 }
 0x221   : > { %p2843_p9 = pnand %p2849_p7, %p3468_p8 }
 0x223   : > { %3363 = dma.done.wait (!%p2843_p9), %s2380_s7, 256  }
 0x224   : > { %3365 = vsyncadd (!%p2843_p9), %s2380_s7, 4294967040  ;;  %s2389_s18 = scalar_lea.sflag [#allocation5], %s2379_s8 }
 0x225   : > { %3367 = dma.done.wait (!%p2843_p9), %s2389_s18, 256  }
 0x226   : > { %3369 = vsyncadd (!%p2843_p9), %s2389_s18, 4294967040  ;;  %s21_s20 = sadd.s32 1, %s3392_s20   ;;  %s4422_s15 = smov %s3376_s16 }
 0x227   : > { %p18_p10 = scmp.ge.s32.totalorder %s21_s20, 4   ;;  %s4423_s16 = smov %s3380_s17 }
 0x228   : > { %s4424_s17 = smov %s3474_s28  ;;  %s4425_s18 = smov %s3388_s19 }
 0x229   : > { %s4426_s19 = smov %s4428_s23  ;;  %20 = sbr.rel (!%p18_p10) target bundleno = 6 (0x6), region = 95 }
 0x230   :  { %2394 = vsyncpa [#allocation3], 1 }
 0x231   :  { %2396 = vsyncpa [#allocation3 + $0x1], 1 }
 0x232   :  { %2397 = vsyncpa [#allocation5], 1 }
 0x233   :  { %2399 = vsyncpa [#allocation5 + $0x1], 1 }

// kernel: cond_cnn_discriminator_forward.17
= control target key start
LH: loop header
LB: loop body
LE: loop exit
PB: predicated region body
PF: predicated region fallthrough
CT: control target
= control target key end

     0   :  { %v38_v0 = vlaneseq  ;;  %v585_v2 = vmov 1983009808   ;;  %vm494_vm0 = vcmask 1041408   ;;  %vm574_vm1 = vcmask 1024   ;;  %s778_s2 = inlined_call_operand.vmem [shape: f32[1,4096], index: 2, kind: input, shape index: {}]   ;;  %s779_s0 = inlined_call_operand.vmem [shape: f32[2,4096], index: 0, kind: input, shape index: {}]   ;;  %s780_s1 = inlined_call_operand.vmem [shape: f32[2,1], index: 1, kind: input, shape index: {}]   ;;  %s781_s3 = inlined_call_operand.<no memory space> [shape: f32[1,1], index: 3, kind: input, shape index: {}]   ;;  %s782_s4 = inlined_call_operand.<no memory space> [shape: f32[1,1], index: 4, kind: input, shape index: {}]   ;;  %s783_s5 = inlined_call_operand.vmem [shape: f32[2,1], index: 5, kind: output, shape index: {}]  }
   0x1   :  { %v169_v3 = vunpack.c.l.s4 %v585_v2  ;;  %v30_v5 = vld [vmem:[%s778_s2] sm:$0xff]  ;;  %v31_v27 = vld [vmem:[%s778_s2 + $0x8] sm:$0xff]  ;;  %v32_v53 = vld [vmem:[%s778_s2 + $0x10] sm:$0xff] }
   0x2   :  { %v39_v1 = vshrl.u32 %v38_v0, 7  ;;  %v22_v31 = vld [vmem:[%s779_s0] sm:$0xff]  ;;  %v23_v43 = vld [vmem:[%s779_s0 + $0x8] sm:$0xff]  ;;  %v24_v61 = vld [vmem:[%s779_s0 + $0x10] sm:$0xff] }
   0x3   :  { %v170_v9 = vunpack.c.0.s8 %v169_v3 }
   0x4   :  { %v616_v4 = vsub.s32 0, %v39_v1  ;;  %v621_v6 = vsub.s32 1, %v39_v1  ;;  %v623_v7 = vsub.s32 2, %v39_v1  ;;  %v625_v8 = vsub.s32 3, %v39_v1 }
   0x5   :  { %v628_v11 = vsub.s32 4, %v39_v1  ;;  %v630_v12 = vsub.s32 5, %v39_v1  ;;  %v632_v13 = vsub.s32 6, %v39_v1  ;;  %v637_v17 = vsub.s32 7, %v39_v1 }
   0x6   :  { %v41_v10 = vrot.slane %v30_v5, %v616_v4  ;;  %v45_v14 = vrot.slane %v30_v5, %v621_v6  ;;  %v49_v15 = vrot.slane %v30_v5, %v623_v7  ;;  %v53_v16 = vrot.slane %v30_v5, %v625_v8 }
   0x7   :  { %v57_v18 = vrot.slane %v30_v5, %v628_v11  ;;  %v61_v19 = vrot.slane %v30_v5, %v630_v12  ;;  %v65_v20 = vrot.slane %v30_v5, %v632_v13  ;;  %v69_v21 = vrot.slane %v30_v5, %v637_v17 }
   0x8   :  { %v166_v22 = vcombine.low %v41_v10, %v45_v14  ;;  %v167_v23 = vcombine.low %v49_v15, %v53_v16  ;;  %v643_v24 = vsub.s32 %v170_v9, %v39_v1  ;;  %v73_v32 = vrot.slane %v31_v27, %v616_v4 }
   0x9   :  { %v183_v28 = vcombine.low %v57_v18, %v61_v19  ;;  %v184_v29 = vcombine.low %v65_v20, %v69_v21  ;;  %v77_v33 = vrot.slane %v31_v27, %v621_v6  ;;  %v81_v34 = vrot.slane %v31_v27, %v623_v7 }
   0xa   :  { %v174_v25 = vrot.slane %v166_v22, %v643_v24  ;;  %v181_v26 = vrot.slane %v167_v23, %v643_v24  ;;  %v85_v35 = vrot.slane %v31_v27, %v625_v8  ;;  %v89_v45 = vrot.slane %v31_v27, %v628_v11 }
   0xb   :  { %v191_v36 = vrot.slane %v183_v28, %v643_v24  ;;  %v198_v37 = vrot.slane %v184_v29, %v643_v24  ;;  %v200_v40 = vcombine.low %v73_v32, %v77_v33  ;;  %v93_v46 = vrot.slane %v31_v27, %v630_v12 }
   0xc   :  { %v182_v30 = vcombine.low %v174_v25, %v181_v26  ;;  %v201_v41 = vcombine.low %v81_v34, %v85_v35  ;;  %v97_v47 = vrot.slane %v31_v27, %v632_v13  ;;  %v101_v48 = vrot.slane %v31_v27, %v637_v17 }
   0xd   :  { %v199_v39 = vcombine.low %v191_v36, %v198_v37  ;;  %v208_v49 = vrot.slane %v200_v40, %v643_v24  ;;  %v217_v55 = vcombine.low %v89_v45, %v93_v46  ;;  %v105_v62 = vrot.slane %v32_v53, %v616_v4 }
   0xe   :  { %v310_v38 = vmul.f32 %v182_v30, %v22_v31  ;;  %v215_v50 = vrot.slane %v201_v41, %v643_v24  ;;  %v218_v56 = vcombine.low %v97_v47, %v101_v48  ;;  %v109_v0 = vrot.slane %v32_v53, %v621_v6  ;;  %v25_v31 = vld [vmem:[%s779_s0 + $0x18] sm:$0xff] }
   0xf   :  { %v311_v51 = vmul.f32 %v199_v39, %v23_v43  ;;  %v113_v1 = vrot.slane %v32_v53, %v623_v7  ;;  %v117_v5 = vrot.slane %v32_v53, %v625_v8  ;;  %v225_v9 = vrot.slane %v217_v55, %v643_v24  ;;  %v33_v47 = vld [vmem:[%s778_s2 + $0x18] sm:$0xff] }
  0x10   :  { %v326_v42 = vcombine.high %v310_v38, %v310_v38  ;;  %v333_v44 = vrot.slane %v310_v38, %v643_v24  ;;  %v216_v57 = vcombine.low %v208_v49, %v215_v50  ;;  %v232_v10 = vrot.slane %v218_v56, %v643_v24  ;;  %v26_v56 = vld [vmem:[%s779_s0 + $0x20] sm:$0xff] }
  0x11   :  { %v343_v59 = vcombine.high %v311_v51, %v311_v51  ;;  %v350_v60 = vrot.slane %v311_v51, %v643_v24  ;;  %v234_v23 = vcombine.low %v105_v62, %v109_v0  ;;  %v235_v25 = vcombine.low %v113_v1, %v117_v5 }
  0x12   :  { %v340_v52 = vrot.slane %v326_v42, %v643_v24  ;;  %v341_v54 = vcombine.high %v333_v44, %v333_v44  ;;  %v495_v63 = vsel %vm494_vm0, %v333_v44, 0.0  ;;  %v312_v15 = vmul.f32 %v216_v57, %v24_v61 }
  0x13   :  { %v357_v16 = vrot.slane %v343_v59, %v643_v24  ;;  %v358_v18 = vcombine.high %v350_v60, %v350_v60  ;;  %v502_v21 = vsel %vm494_vm0, %v350_v60, 0.0  ;;  %v233_v22 = vcombine.low %v225_v9, %v232_v10 }
  0x14   :  { %v342_v58 = vcombine.high %v340_v52, %v340_v52  ;;  %v496_v2 = vsel %vm494_vm0, %v341_v54, 0.0  ;;  %v498_v3 = vsel %vm494_vm0, %v340_v52, 0.0  ;;  %v360_v28 = vcombine.high %v312_v15, %v312_v15 }
  0x15   :  { %v497_v14 = vadd.f32 %v496_v2, %v495_v63  ;;  %v359_v27 = vcombine.high %v357_v16, %v357_v16  ;;  %v367_v29 = vrot.slane %v312_v15, %v643_v24  ;;  %v504_v30 = vsel %vm494_vm0, %v358_v18, 0.0 }
  0x16   :  { %v500_v19 = vsel %vm494_vm0, %v342_v58, 0.0  ;;  %v121_v33 = vrot.slane %v32_v53, %v628_v11  ;;  %v125_v34 = vrot.slane %v32_v53, %v630_v12  ;;  %v129_v35 = vrot.slane %v32_v53, %v632_v13 }
  0x17   :  { %v499_v20 = vadd.f32 %v498_v3, %v497_v14  ;;  %v506_v36 = vsel %vm494_vm0, %v357_v16, 0.0  ;;  %v133_v37 = vrot.slane %v32_v53, %v637_v17  ;;  %v242_v38 = vrot.slane %v234_v23, %v643_v24 }
  0x18   :  { %v249_v39 = vrot.slane %v235_v25, %v643_v24  ;;  %v313_v41 = vmul.f32 %v233_v22, %v25_v31  ;;  %v374_v42 = vrot.slane %v360_v28, %v643_v24  ;;  %v375_v43 = vcombine.high %v367_v29, %v367_v29 }
  0x19   :  { %v501_v26 = vadd.f32 %v500_v19, %v499_v20  ;;  %v508_v44 = vsel %vm494_vm0, %v359_v27, 0.0  ;;  %v510_v46 = vsel %vm494_vm0, %v367_v29, 0.0  ;;  %v251_v49 = vcombine.low %v121_v33, %v125_v34  ;;  %v27_v20 = vld [vmem:[%s779_s0 + $0x28] sm:$0xff] }
  0x1a   :  { %v250_v48 = vcombine.low %v242_v38, %v249_v39  ;;  %v252_v50 = vcombine.low %v129_v35, %v133_v37  ;;  %v376_v52 = vcombine.high %v374_v42, %v374_v42  ;;  %v377_v53 = vcombine.high %v313_v41, %v313_v41 }
  0x1b   :  { %v503_v32 = vadd.f32 %v502_v21, %v501_v26  ;;  %v384_v54 = vrot.slane %v313_v41, %v643_v24  ;;  %v512_v55 = vsel %vm494_vm0, %v375_v43, 0.0  ;;  %v137_v58 = vrot.slane %v33_v47, %v616_v4  ;;  %v28_v41 = vld [vmem:[%s779_s0 + $0x30] sm:$0xff] }
  0x1c   :  { %v141_v59 = vrot.slane %v33_v47, %v621_v6  ;;  %v145_v60 = vrot.slane %v33_v47, %v623_v7  ;;  %v514_v61 = vsel %vm494_vm0, %v374_v42, 0.0  ;;  %v149_v62 = vrot.slane %v33_v47, %v625_v8 }
  0x1d   :  { %v505_v40 = vadd.f32 %v504_v30, %v503_v32  ;;  %v259_v63 = vrot.slane %v251_v49, %v643_v24  ;;  %v266_v0 = vrot.slane %v252_v50, %v643_v24  ;;  %v314_v2 = vmul.f32 %v250_v48, %v26_v56 }
  0x1e   :  { %v391_v3 = vrot.slane %v377_v53, %v643_v24  ;;  %v392_v5 = vcombine.high %v384_v54, %v384_v54  ;;  %v516_v9 = vsel %vm494_vm0, %v376_v52, 0.0  ;;  %v518_v6 = vsel %vm494_vm0, %v384_v54, 0.0 }
  0x1f   :  { %v507_v45 = vadd.f32 %v506_v36, %v505_v40  ;;  %v267_v10 = vcombine.low %v259_v63, %v266_v0  ;;  %v268_v7 = vcombine.low %v137_v58, %v141_v59  ;;  %v269_v14 = vcombine.low %v145_v60, %v149_v62  ;;  %v29_v59 = vld [vmem:[%s779_s0 + $0x38] sm:$0xff] }
  0x20   :  { %v393_v16 = vcombine.high %v391_v3, %v391_v3  ;;  %v394_v8 = vcombine.high %v314_v2, %v314_v2  ;;  %v401_v18 = vrot.slane %v314_v2, %v643_v24  ;;  %v520_v19 = vsel %vm494_vm0, %v392_v5, 0.0 }
  0x21   :  { %v509_v51 = vadd.f32 %v508_v44, %v507_v45  ;;  %v153_v22 = vrot.slane %v33_v47, %v628_v11  ;;  %v157_v23 = vrot.slane %v33_v47, %v630_v12  ;;  %v161_v25 = vrot.slane %v33_v47, %v632_v13 }
  0x22   :  { %v522_v26 = vsel %vm494_vm0, %v391_v3, 0.0  ;;  %v165_v27 = vrot.slane %v33_v47, %v637_v17  ;;  %v276_v28 = vrot.slane %v268_v7, %v643_v24  ;;  %v283_v29 = vrot.slane %v269_v14, %v643_v24 }
  0x23   :  { %v511_v57 = vadd.f32 %v510_v46, %v509_v51  ;;  %v315_v31 = vmul.f32 %v267_v10, %v27_v20  ;;  %v408_v32 = vrot.slane %v394_v8, %v643_v24  ;;  %v409_v33 = vcombine.high %v401_v18, %v401_v18 }
  0x24   :  { %v524_v34 = vsel %vm494_vm0, %v393_v16, 0.0  ;;  %v526_v12 = vsel %vm494_vm0, %v401_v18, 0.0  ;;  %v284_v35 = vcombine.low %v276_v28, %v283_v29  ;;  %v285_v13 = vcombine.low %v153_v22, %v157_v23 }
  0x25   :  { %v513_v1 = vadd.f32 %v512_v55, %v511_v57  ;;  %v286_v36 = vcombine.low %v161_v25, %v165_v27  ;;  %v410_v38 = vcombine.high %v408_v32, %v408_v32  ;;  %v411_v17 = vcombine.high %v315_v31, %v315_v31 }
  0x26   :  { %v418_v39 = vrot.slane %v315_v31, %v643_v24  ;;  %v528_v40 = vsel %vm494_vm0, %v409_v33, 0.0  ;;  %v530_v43 = vsel %vm494_vm0, %v408_v32, 0.0  ;;  %v293_v44 = vrot.slane %v285_v13, %v643_v24 }
  0x27   :  { %v515_v4 = vadd.f32 %v514_v61, %v513_v1  ;;  %v300_v45 = vrot.slane %v286_v36, %v643_v24  ;;  %v316_v47 = vmul.f32 %v284_v35, %v28_v41  ;;  %v425_v48 = vrot.slane %v411_v17, %v643_v24 }
  0x28   :  { %v426_v49 = vcombine.high %v418_v39, %v418_v39  ;;  %v532_v50 = vsel %vm494_vm0, %v410_v38, 0.0  ;;  %v534_v52 = vsel %vm494_vm0, %v418_v39, 0.0  ;;  %v562_v32 = vstv %s781_s3 }
  0x29   :  { %v517_v15 = vadd.f32 %v516_v9, %v515_v4  ;;  %v301_v53 = vcombine.low %v293_v44, %v300_v45  ;;  %v427_v55 = vcombine.high %v425_v48, %v425_v48  ;;  %v428_v56 = vcombine.high %v316_v47, %v316_v47 }
  0x2a   :  { %v435_v57 = vrot.slane %v316_v47, %v643_v24  ;;  %v536_v58 = vsel %vm494_vm0, %v426_v49, 0.0  ;;  %v538_v61 = vsel %vm494_vm0, %v425_v48, 0.0 }
  0x2b   :  { %v519_v21 = vadd.f32 %v518_v6, %v517_v15  ;;  %v317_v63 = vmul.f32 %v301_v53, %v29_v59  ;;  %v442_v0 = vrot.slane %v428_v56, %v643_v24  ;;  %v540_v2 = vsel %vm494_vm0, %v427_v55, 0.0 }
  0x2c   :  { %v443_v1 = vcombine.high %v435_v57, %v435_v57  ;;  %v542_v5 = vsel %vm494_vm0, %v435_v57, 0.0 }
  0x2d   :  { %v521_v30 = vadd.f32 %v520_v19, %v519_v21  ;;  %v444_v4 = vcombine.high %v442_v0, %v442_v0  ;;  %v445_v6 = vcombine.high %v317_v63, %v317_v63  ;;  %v452_v10 = vrot.slane %v317_v63, %v643_v24 }
  0x2e   :  { %v544_v7 = vsel %vm494_vm0, %v443_v1, 0.0  ;;  %v546_v15 = vsel %vm494_vm0, %v442_v0, 0.0 }
  0x2f   :  { %v523_v11 = vadd.f32 %v522_v26, %v521_v30  ;;  %v459_v8 = vrot.slane %v445_v6, %v643_v24  ;;  %v460_v18 = vcombine.high %v452_v10, %v452_v10  ;;  %v548_v19 = vsel %vm494_vm0, %v444_v4, 0.0  ;;  %v560_v24 = vld [vmem:[%s780_s1] sm:$0x3] }
  0x30   :  { %v550_v21 = vsel %vm494_vm0, %v452_v10, 0.0  ;;  %v563_v33 = vmul.f32 %v562_v32, %v560_v24 }
  0x31   :  { %v525_v37 = vadd.f32 %v524_v34, %v523_v11  ;;  %v461_v23 = vcombine.high %v459_v8, %v459_v8  ;;  %v552_v25 = vsel %vm494_vm0, %v460_v18, 0.0  ;;  %v554_v27 = vsel %vm494_vm0, %v459_v8, 0.0 }
  0x32   :  { %v566_v11 = vstv %s782_s4 }
  0x33   :  { %v527_v42 = vadd.f32 %v526_v12, %v525_v37  ;;  %v556_v29 = vsel %vm494_vm0, %v461_v23, 0.0 }
  0x35   :  { %v529_v46 = vadd.f32 %v528_v40, %v527_v42 }
  0x37   :  { %v531_v51 = vadd.f32 %v530_v43, %v529_v46 }
  0x39   :  { %v533_v54 = vadd.f32 %v532_v50, %v531_v51 }
  0x3b   :  { %v535_v60 = vadd.f32 %v534_v52, %v533_v54 }
  0x3d   :  { %v537_v62 = vadd.f32 %v536_v58, %v535_v60 }
  0x3f   :  { %v539_v3 = vadd.f32 %v538_v61, %v537_v62 }
  0x41   :  { %v541_v9 = vadd.f32 %v540_v2, %v539_v3 }
  0x43   :  { %v543_v14 = vadd.f32 %v542_v5, %v541_v9 }
  0x45   :  { %v545_v16 = vadd.f32 %v544_v7, %v543_v14 }
  0x47   :  { %v547_v20 = vadd.f32 %v546_v15, %v545_v16 }
  0x49   :  { %v549_v22 = vadd.f32 %v548_v19, %v547_v20 }
  0x4b   :  { %v551_v26 = vadd.f32 %v550_v21, %v549_v22 }
  0x4d   :  { %v553_v28 = vadd.f32 %v552_v25, %v551_v26 }
  0x4f   :  { %v555_v30 = vadd.f32 %v554_v27, %v553_v28 }
  0x51   :  { %v557_v31 = vadd.f32 %v556_v29, %v555_v30 }
  0x53   :  { %558 = vadd.xlane.f32.xlu0 %v557_v31 }
  0xe0   :  { %v559_v34 = vpop.xlane.xlu0 %558 }
  0xe1   :  { %v564_v12 = vadd.f32 %v563_v33, %v559_v34 }
  0xe3   :  { %v567_v35 = vadd.f32 %v566_v11, %v564_v12 }
  0xe5   :  { %v568_v13 = vsub.f32 0.0, %v567_v35 }
  0xe7   :  { %v569_v36 = vmul.f32 1.442695, %v568_v13 }
  0xe9   :  { %581 = vpow2.f32 %v569_v36 }
  0xf3   :  { %v582_v37 = vpop.eup %581 }
  0xf4   :  { %v571_v38 = vadd.f32 1.0, %v582_v37 }
  0xf6   :  { %583 = vrcp.f32 %v571_v38 }
 0x100   :  { %v584_v17 = vpop.eup %583 }
 0x101   :  { %575 = vst.msk [vmem:[%s783_s5] sm:$0x3] %vm574_vm1, %v584_v17 }

</bundles_post_ra>
